<compile_context>
chip_gen: v7x
topology: tpu7x:2x2x1
jax: 0.10.0
libtpu: 0.0.40
codegen_flags: <defaults>
</compile_context>

<pallas_src>
import functools

import jax
import jax.numpy as jnp
import numpy as np
from jax.experimental import pallas as pl
from jax.experimental.pallas import tpu as pltpu


# ----------------------------------------------------------------------------
# Fused ScaledResNet kernel (B_blk images per grid step)
# ----------------------------------------------------------------------------
def _scaled_resnet_kernel(x_ref, w1_ref, b1_ref, w2_ref, b2_ref, o_ref,
                          pad_scr, col_scr, *, B, H, W, C, K, pad, res_scale):
    """x_ref   : (B, H, W, C)      f32   unpadded input (conv1 input + residual)
       w*_ref  : (K*K*C, C)        bf16  conv weights, tap-major rows
       b*_ref  : (1, C)            f32   conv biases
       o_ref   : (B*H, W*C)        f32   lane-dense output slab
       pad_scr : (B, Hp, Wp, C)    bf16  padded conv operand (reused for x and y)
       col_scr : (B*H*W, K*K*C)    bf16  im2col slab (reused for both convs)
    """
    f32, bf16 = jnp.float32, jnp.bfloat16
    M = B * H * W
    Hp, Wp = H + 2 * pad, W + 2 * pad

    # Zero only the pad ring; the center is fully overwritten below and the
    # ring stays zero between conv1 and conv2.
    if pad > 0:
        zrow = jnp.zeros((B, pad, Wp, C), bf16)
        pad_scr[:, 0:pad, :, :] = zrow
        pad_scr[:, Hp - pad:Hp, :, :] = zrow
        zcol = jnp.zeros((B, Hp, pad, C), bf16)
        pad_scr[:, :, 0:pad, :] = zcol
        pad_scr[:, :, Wp - pad:Wp, :] = zcol

    def im2col():
        # col[:, t*C:(t+1)*C] = shifted window for tap t = ky*K + kx.
        for ky in range(K):
            for kx in range(K):
                t = ky * K + kx
                win = pad_scr[:, ky:ky + H, kx:kx + W, :]      # (B,H,W,C) bf16
                col_scr[:, t * C:(t + 1) * C] = win.reshape(M, C)

    # ---- conv1 + bias + ReLU : one MXU matmul -------------------------------
    pad_scr[:, pad:pad + H, pad:pad + W, :] = x_ref[...].astype(bf16)
    im2col()
    acc = jnp.dot(col_scr[...], w1_ref[...], preferred_element_type=f32)  # (M,C)
    y = jnp.maximum(acc + b1_ref[...], 0.0)

    # ---- conv2 + bias : one MXU matmul, then scale + residual ---------------
    pad_scr[:, pad:pad + H, pad:pad + W, :] = y.reshape(B, H, W, C).astype(bf16)
    im2col()
    acc = jnp.dot(col_scr[...], w2_ref[...], preferred_element_type=f32)  # (M,C)
    out = (acc + b2_ref[...]) * res_scale + x_ref[...].reshape(M, C)      # f32 residual

    # ---- lane-dense store: o_ref is (B*H, W*C) ------------------------------
    # (W column chunks instead of a lane-mixing reshape of the whole value.)
    out3 = out.reshape(B * H, W, C)          # leading-dim split only
    for j in range(W):
        o_ref[:, j * C:(j + 1) * C] = out3[:, j, :].astype(o_ref.dtype)


# ----------------------------------------------------------------------------
# Wrapper (layout plumbing only: NCHW <-> NHWC, weight reshape, dtype casts)
# ----------------------------------------------------------------------------
def _pick_block_batch(n, h, w):
    """Smallest divisor of n giving matmul M = b*h*w >= 256, capped at 2048."""
    divs = [d for d in range(1, n + 1) if n % d == 0 and d * h * w <= 2048]
    if not divs:
        return 1
    for d in divs:
        if d * h * w >= 256:
            return d
    return divs[-1]


def scaled_resnet_forward(x_nchw, params, *, res_scale=1.0, block_batch=None):
    w1, b1, w2, b2 = params["w1"], params["b1"], params["w2"], params["b2"]
    K = w1.shape[0]
    pad = K // 2
    N, C, H, W = x_nchw.shape
    Hp, Wp = H + 2 * pad, W + 2 * pad
    KKC = K * K * C

    if block_batch is None:
        block_batch = _pick_block_batch(N, H, W)
    B = block_batch
    assert N % B == 0, (N, B)
    M = B * H * W

    # Single unpadded f32 input: used for conv1 (cast to bf16 in-kernel) and
    # for the exact-f32 residual add.  No jnp.pad HBM copy, no duplicate array.
    x = jnp.transpose(x_nchw, (0, 2, 3, 1)).astype(jnp.float32)       # NHWC

    w1k = w1.reshape(KKC, C).astype(jnp.bfloat16)   # tap-major rows = im2col order
    w2k = w2.reshape(KKC, C).astype(jnp.bfloat16)
    b1r = b1.reshape(1, C).astype(jnp.float32)
    b2r = b2.reshape(1, C).astype(jnp.float32)

    # res_scale is baked in as a compile-time constant (module attribute).
    kernel = functools.partial(_scaled_resnet_kernel, B=B, H=H, W=W, C=C, K=K,
                               pad=pad, res_scale=float(res_scale))

    out = pl.pallas_call(
        kernel,
        out_shape=jax.ShapeDtypeStruct((N * H, W * C), jnp.float32),  # lane-dense
        grid=(N // B,),
        in_specs=[
            pl.BlockSpec((B, H, W, C), lambda n: (n, 0, 0, 0)),   # x (f32, once)
            pl.BlockSpec((KKC, C), lambda n: (0, 0)),             # w1, VMEM-resident
            pl.BlockSpec((1, C), lambda n: (0, 0)),               # b1
            pl.BlockSpec((KKC, C), lambda n: (0, 0)),             # w2, VMEM-resident
            pl.BlockSpec((1, C), lambda n: (0, 0)),               # b2
        ],
        out_specs=pl.BlockSpec((B * H, W * C), lambda n: (n, 0)),
        scratch_shapes=[
            pltpu.VMEM((B, Hp, Wp, C), jnp.bfloat16),   # padded x / y (reused)
            pltpu.VMEM((M, KKC), jnp.bfloat16),         # im2col slab (reused)
        ],
        compiler_params=pltpu.CompilerParams(
            dimension_semantics=("parallel",),          # batch blocks over TCs
        ),
    )(x, w1k, b1r, w2k, b2r)

    out = out.reshape(N, H, W, C)
    return jnp.transpose(out, (0, 3, 1, 2))             # back to NCHW


# ----------------------------------------------------------------------------
# Deterministic parameter init (shapes follow the PyTorch module defaults)
# ----------------------------------------------------------------------------
def init_params(key, num_features=64, kernel_size=3):
    C, K = num_features, kernel_size
    k1, k2, k3, k4 = jax.random.split(key, 4)
    fan_in = K * K * C
    w1 = jax.random.normal(k1, (K, K, C, C), jnp.float32) * (2.0 / fan_in) ** 0.5
    b1 = 0.1 * jax.random.normal(k2, (C,), jnp.float32)
    w2 = jax.random.normal(k3, (K, K, C, C), jnp.float32) * (2.0 / fan_in) ** 0.5
    b2 = 0.1 * jax.random.normal(k4, (C,), jnp.float32)
    return {"w1": w1, "b1": b1, "w2": w2, "b2": b2}


# ----------------------------------------------------------------------------
# Pure-JAX reference (conv operands pre-rounded to bf16 exactly like the MXU
# inputs; accumulation and epilogue in f32, residual added in full f32).
# ----------------------------------------------------------------------------
def reference_forward(x_nchw, params, *, res_scale=1.0):
    def conv(x, w, b):
        xb = x.astype(jnp.bfloat16).astype(jnp.float32)
        wb = w.astype(jnp.bfloat16).astype(jnp.float32)
        y = jax.lax.conv_general_dilated(
            xb, wb, window_strides=(1, 1), padding="SAME",
            dimension_numbers=("NCHW", "HWIO", "NCHW"),
            preferred_element_type=jnp.float32,
            precision=jax.lax.Precision.HIGHEST)
        return y + b.reshape(1, -1, 1, 1)

    y = jax.nn.relu(conv(x_nchw, params["w1"], params["b1"]))
    res = conv(y, params["w2"], params["b2"]) * res_scale
    return res + x_nchw.astype(jnp.float32)


if __name__ == "__main__":
    key = jax.random.PRNGKey(0)
    kp, kx = jax.random.split(key)

    num_features = 64     # module default
    res_scale = 1.0       # module default
    params = init_params(kp, num_features=num_features, kernel_size=3)

    # NCHW input with channels == num_features (small spatial dims).
    x = jax.random.normal(kx, (2, num_features, 8, 8), jnp.float32)

    out = scaled_resnet_forward(x, params, res_scale=res_scale)
    out = jax.block_until_ready(out)
    assert out.shape == x.shape, out.shape
    assert bool(jnp.all(jnp.isfinite(out)))

    ref = reference_forward(x, params, res_scale=res_scale)
    np.testing.assert_allclose(np.asarray(out), np.asarray(ref),
                               rtol=1e-3, atol=1e-3)
    print("KERNEL_OK")
</pallas_src>

<mosaic_0001>
module attributes {stable_mosaic.version = 11 : i64} {
  func.func @_scaled_resnet_kernel(%arg0: i32, %arg1: memref<2x8x8x64xf32, #tpu.memory_space<vmem>>, %arg2: memref<576x64xbf16, #tpu.memory_space<vmem>>, %arg3: memref<1x64xf32, #tpu.memory_space<vmem>>, %arg4: memref<576x64xbf16, #tpu.memory_space<vmem>>, %arg5: memref<1x64xf32, #tpu.memory_space<vmem>>, %arg6: memref<16x512xf32, #tpu.memory_space<vmem>>, %arg7: memref<2x10x10x64xbf16, #tpu.memory_space<vmem>>, %arg8: memref<128x576xbf16, #tpu.memory_space<vmem>>) attributes {dimension_semantics = [#tpu.dimension_semantics<parallel>], iteration_bounds = array<i64: 1>, scalar_prefetch = 0 : i64, scratch_operands = 2 : i64, tpu.core_type = #tpu.core_type<tc>, window_params = [{transform_indices = @transform_0, window_bounds = array<i64: 2, 8, 8, 64>}, {pipeline_mode = #tpu.pipeline_mode<synchronous>, transform_indices = @transform_1, window_bounds = array<i64: 576, 64>}, {pipeline_mode = #tpu.pipeline_mode<synchronous>, transform_indices = @transform_2, window_bounds = array<i64: 1, 64>}, {pipeline_mode = #tpu.pipeline_mode<synchronous>, transform_indices = @transform_3, window_bounds = array<i64: 576, 64>}, {pipeline_mode = #tpu.pipeline_mode<synchronous>, transform_indices = @transform_4, window_bounds = array<i64: 1, 64>}, {transform_indices = @transform_5, window_bounds = array<i64: 16, 512>}]} {
    %cst = arith.constant 0.000000e+00 : bf16
    %0 = vector.broadcast %cst : bf16 to vector<2x1x10x64xbf16>
    %c0 = arith.constant 0 : index
    %c0_0 = arith.constant 0 : index
    %c0_1 = arith.constant 0 : index
    %c0_2 = arith.constant 0 : index
    %1 = vector.load %arg7[%c0, %c0_0, %c0_1, %c0_2] : memref<2x10x10x64xbf16, #tpu.memory_space<vmem>>, vector<2x1x10x64xbf16>
    tpu.vector_store %arg7[%c0, %c0_0, %c0_1, %c0_2], %0 {strides = array<i32>} : memref<2x10x10x64xbf16, #tpu.memory_space<vmem>>, vector<2x1x10x64xbf16>,
    %c0_3 = arith.constant 0 : index
    %c9 = arith.constant 9 : index
    %c0_4 = arith.constant 0 : index
    %c0_5 = arith.constant 0 : index
    %2 = vector.load %arg7[%c0_3, %c9, %c0_4, %c0_5] : memref<2x10x10x64xbf16, #tpu.memory_space<vmem>>, vector<2x1x10x64xbf16>
    tpu.vector_store %arg7[%c0_3, %c9, %c0_4, %c0_5], %0 {strides = array<i32>} : memref<2x10x10x64xbf16, #tpu.memory_space<vmem>>, vector<2x1x10x64xbf16>,
    %cst_6 = arith.constant 0.000000e+00 : bf16
    %3 = vector.broadcast %cst_6 : bf16 to vector<2x10x1x64xbf16>
    %c0_7 = arith.constant 0 : index
    %c0_8 = arith.constant 0 : index
    %c0_9 = arith.constant 0 : index
    %c0_10 = arith.constant 0 : index
    %4 = vector.load %arg7[%c0_7, %c0_8, %c0_9, %c0_10] : memref<2x10x10x64xbf16, #tpu.memory_space<vmem>>, vector<2x10x1x64xbf16>
    tpu.vector_store %arg7[%c0_7, %c0_8, %c0_9, %c0_10], %3 {strides = array<i32>} : memref<2x10x10x64xbf16, #tpu.memory_space<vmem>>, vector<2x10x1x64xbf16>,
    %c0_11 = arith.constant 0 : index
    %c0_12 = arith.constant 0 : index
    %c9_13 = arith.constant 9 : index
    %c0_14 = arith.constant 0 : index
    %5 = vector.load %arg7[%c0_11, %c0_12, %c9_13, %c0_14] : memref<2x10x10x64xbf16, #tpu.memory_space<vmem>>, vector<2x10x1x64xbf16>
    tpu.vector_store %arg7[%c0_11, %c0_12, %c9_13, %c0_14], %3 {strides = array<i32>} : memref<2x10x10x64xbf16, #tpu.memory_space<vmem>>, vector<2x10x1x64xbf16>,
    %c0_15 = arith.constant 0 : index
    %c0_16 = arith.constant 0 : index
    %c0_17 = arith.constant 0 : index
    %c0_18 = arith.constant 0 : index
    %6 = vector.load %arg1[%c0_15, %c0_16, %c0_17, %c0_18] : memref<2x8x8x64xf32, #tpu.memory_space<vmem>>, vector<2x8x8x64xf32>
    %7 = arith.truncf %6 : vector<2x8x8x64xf32> to vector<2x8x8x64xbf16>
    %c0_19 = arith.constant 0 : index
    %c1 = arith.constant 1 : index
    %c1_20 = arith.constant 1 : index
    %c0_21 = arith.constant 0 : index
    %8 = vector.load %arg7[%c0_19, %c1, %c1_20, %c0_21] : memref<2x10x10x64xbf16, #tpu.memory_space<vmem>>, vector<2x8x8x64xbf16>
    tpu.vector_store %arg7[%c0_19, %c1, %c1_20, %c0_21], %7 {strides = array<i32>} : memref<2x10x10x64xbf16, #tpu.memory_space<vmem>>, vector<2x8x8x64xbf16>,
    %c0_22 = arith.constant 0 : index
    %c0_23 = arith.constant 0 : index
    %c0_24 = arith.constant 0 : index
    %c0_25 = arith.constant 0 : index
    %9 = vector.load %arg7[%c0_22, %c0_23, %c0_24, %c0_25] : memref<2x10x10x64xbf16, #tpu.memory_space<vmem>>, vector<2x8x8x64xbf16>
    %10 = vector.shape_cast %9 : vector<2x8x8x64xbf16> to vector<128x64xbf16>
    %c0_26 = arith.constant 0 : index
    %c0_27 = arith.constant 0 : index
    %11 = vector.load %arg8[%c0_26, %c0_27] : memref<128x576xbf16, #tpu.memory_space<vmem>>, vector<128x64xbf16>
    tpu.vector_store %arg8[%c0_26, %c0_27], %10 {strides = array<i32>} : memref<128x576xbf16, #tpu.memory_space<vmem>>, vector<128x64xbf16>,
    %c0_28 = arith.constant 0 : index
    %c0_29 = arith.constant 0 : index
    %c1_30 = arith.constant 1 : index
    %c0_31 = arith.constant 0 : index
    %12 = vector.load %arg7[%c0_28, %c0_29, %c1_30, %c0_31] : memref<2x10x10x64xbf16, #tpu.memory_space<vmem>>, vector<2x8x8x64xbf16>
    %13 = vector.shape_cast %12 : vector<2x8x8x64xbf16> to vector<128x64xbf16>
    %c0_32 = arith.constant 0 : index
    %c64 = arith.constant 64 : index
    %14 = vector.load %arg8[%c0_32, %c64] : memref<128x576xbf16, #tpu.memory_space<vmem>>, vector<128x64xbf16>
    tpu.vector_store %arg8[%c0_32, %c64], %13 {strides = array<i32>} : memref<128x576xbf16, #tpu.memory_space<vmem>>, vector<128x64xbf16>,
    %c0_33 = arith.constant 0 : index
    %c0_34 = arith.constant 0 : index
    %c2 = arith.constant 2 : index
    %c0_35 = arith.constant 0 : index
    %15 = vector.load %arg7[%c0_33, %c0_34, %c2, %c0_35] : memref<2x10x10x64xbf16, #tpu.memory_space<vmem>>, vector<2x8x8x64xbf16>
    %16 = vector.shape_cast %15 : vector<2x8x8x64xbf16> to vector<128x64xbf16>
    %c0_36 = arith.constant 0 : index
    %c128 = arith.constant 128 : index
    %17 = vector.load %arg8[%c0_36, %c128] : memref<128x576xbf16, #tpu.memory_space<vmem>>, vector<128x64xbf16>
    tpu.vector_store %arg8[%c0_36, %c128], %16 {strides = array<i32>} : memref<128x576xbf16, #tpu.memory_space<vmem>>, vector<128x64xbf16>,
    %c0_37 = arith.constant 0 : index
    %c1_38 = arith.constant 1 : index
    %c0_39 = arith.constant 0 : index
    %c0_40 = arith.constant 0 : index
    %18 = vector.load %arg7[%c0_37, %c1_38, %c0_39, %c0_40] : memref<2x10x10x64xbf16, #tpu.memory_space<vmem>>, vector<2x8x8x64xbf16>
    %19 = vector.shape_cast %18 : vector<2x8x8x64xbf16> to vector<128x64xbf16>
    %c0_41 = arith.constant 0 : index
    %c192 = arith.constant 192 : index
    %20 = vector.load %arg8[%c0_41, %c192] : memref<128x576xbf16, #tpu.memory_space<vmem>>, vector<128x64xbf16>
    tpu.vector_store %arg8[%c0_41, %c192], %19 {strides = array<i32>} : memref<128x576xbf16, #tpu.memory_space<vmem>>, vector<128x64xbf16>,
    %c0_42 = arith.constant 0 : index
    %c1_43 = arith.constant 1 : index
    %c1_44 = arith.constant 1 : index
    %c0_45 = arith.constant 0 : index
    %21 = vector.load %arg7[%c0_42, %c1_43, %c1_44, %c0_45] : memref<2x10x10x64xbf16, #tpu.memory_space<vmem>>, vector<2x8x8x64xbf16>
    %22 = vector.shape_cast %21 : vector<2x8x8x64xbf16> to vector<128x64xbf16>
    %c0_46 = arith.constant 0 : index
    %c256 = arith.constant 256 : index
    %23 = vector.load %arg8[%c0_46, %c256] : memref<128x576xbf16, #tpu.memory_space<vmem>>, vector<128x64xbf16>
    tpu.vector_store %arg8[%c0_46, %c256], %22 {strides = array<i32>} : memref<128x576xbf16, #tpu.memory_space<vmem>>, vector<128x64xbf16>,
    %c0_47 = arith.constant 0 : index
    %c1_48 = arith.constant 1 : index
    %c2_49 = arith.constant 2 : index
    %c0_50 = arith.constant 0 : index
    %24 = vector.load %arg7[%c0_47, %c1_48, %c2_49, %c0_50] : memref<2x10x10x64xbf16, #tpu.memory_space<vmem>>, vector<2x8x8x64xbf16>
    %25 = vector.shape_cast %24 : vector<2x8x8x64xbf16> to vector<128x64xbf16>
    %c0_51 = arith.constant 0 : index
    %c320 = arith.constant 320 : index
    %26 = vector.load %arg8[%c0_51, %c320] : memref<128x576xbf16, #tpu.memory_space<vmem>>, vector<128x64xbf16>
    tpu.vector_store %arg8[%c0_51, %c320], %25 {strides = array<i32>} : memref<128x576xbf16, #tpu.memory_space<vmem>>, vector<128x64xbf16>,
    %c0_52 = arith.constant 0 : index
    %c2_53 = arith.constant 2 : index
    %c0_54 = arith.constant 0 : index
    %c0_55 = arith.constant 0 : index
    %27 = vector.load %arg7[%c0_52, %c2_53, %c0_54, %c0_55] : memref<2x10x10x64xbf16, #tpu.memory_space<vmem>>, vector<2x8x8x64xbf16>
    %28 = vector.shape_cast %27 : vector<2x8x8x64xbf16> to vector<128x64xbf16>
    %c0_56 = arith.constant 0 : index
    %c384 = arith.constant 384 : index
    %29 = vector.load %arg8[%c0_56, %c384] : memref<128x576xbf16, #tpu.memory_space<vmem>>, vector<128x64xbf16>
    tpu.vector_store %arg8[%c0_56, %c384], %28 {strides = array<i32>} : memref<128x576xbf16, #tpu.memory_space<vmem>>, vector<128x64xbf16>,
    %c0_57 = arith.constant 0 : index
    %c2_58 = arith.constant 2 : index
    %c1_59 = arith.constant 1 : index
    %c0_60 = arith.constant 0 : index
    %30 = vector.load %arg7[%c0_57, %c2_58, %c1_59, %c0_60] : memref<2x10x10x64xbf16, #tpu.memory_space<vmem>>, vector<2x8x8x64xbf16>
    %31 = vector.shape_cast %30 : vector<2x8x8x64xbf16> to vector<128x64xbf16>
    %c0_61 = arith.constant 0 : index
    %c448 = arith.constant 448 : index
    %32 = vector.load %arg8[%c0_61, %c448] : memref<128x576xbf16, #tpu.memory_space<vmem>>, vector<128x64xbf16>
    tpu.vector_store %arg8[%c0_61, %c448], %31 {strides = array<i32>} : memref<128x576xbf16, #tpu.memory_space<vmem>>, vector<128x64xbf16>,
    %c0_62 = arith.constant 0 : index
    %c2_63 = arith.constant 2 : index
    %c2_64 = arith.constant 2 : index
    %c0_65 = arith.constant 0 : index
    %33 = vector.load %arg7[%c0_62, %c2_63, %c2_64, %c0_65] : memref<2x10x10x64xbf16, #tpu.memory_space<vmem>>, vector<2x8x8x64xbf16>
    %34 = vector.shape_cast %33 : vector<2x8x8x64xbf16> to vector<128x64xbf16>
    %c0_66 = arith.constant 0 : index
    %c512 = arith.constant 512 : index
    %35 = vector.load %arg8[%c0_66, %c512] : memref<128x576xbf16, #tpu.memory_space<vmem>>, vector<128x64xbf16>
    tpu.vector_store %arg8[%c0_66, %c512], %34 {strides = array<i32>} : memref<128x576xbf16, #tpu.memory_space<vmem>>, vector<128x64xbf16>,
    %c0_67 = arith.constant 0 : index
    %c0_68 = arith.constant 0 : index
    %36 = vector.load %arg8[%c0_67, %c0_68] : memref<128x576xbf16, #tpu.memory_space<vmem>>, vector<128x576xbf16>
    %c0_69 = arith.constant 0 : index
    %c0_70 = arith.constant 0 : index
    %37 = vector.load %arg2[%c0_69, %c0_70] : memref<576x64xbf16, #tpu.memory_space<vmem>>, vector<576x64xbf16>
    %cst_71 = arith.constant dense<0.000000e+00> : vector<128x64xf32>
    %38 = tpu.matmul %36, %37, %cst_71 {dimension_numbers = #tpu.dot_dimension_numbers<[1], [0], [0], [1], [0, 0, 1, 1], [], []>} : vector<128x576xbf16>, vector<576x64xbf16>, vector<128x64xf32> -> vector<128x64xf32>
    %c0_72 = arith.constant 0 : index
    %c0_73 = arith.constant 0 : index
    %39 = vector.load %arg3[%c0_72, %c0_73] : memref<1x64xf32, #tpu.memory_space<vmem>>, vector<1x64xf32>
    %40 = vector.broadcast %39 : vector<1x64xf32> to vector<128x64xf32>
    %41 = arith.addf %38, %40 : vector<128x64xf32>
    %cst_74 = arith.constant 0.000000e+00 : f32
    %42 = vector.broadcast %cst_74 : f32 to vector<128x64xf32>
    %43 = arith.maximumf %41, %42 : vector<128x64xf32>
    %44 = vector.shape_cast %43 : vector<128x64xf32> to vector<2x8x8x64xf32>
    %45 = arith.truncf %44 : vector<2x8x8x64xf32> to vector<2x8x8x64xbf16>
    %c0_75 = arith.constant 0 : index
    %c1_76 = arith.constant 1 : index
    %c1_77 = arith.constant 1 : index
    %c0_78 = arith.constant 0 : index
    %46 = vector.load %arg7[%c0_75, %c1_76, %c1_77, %c0_78] : memref<2x10x10x64xbf16, #tpu.memory_space<vmem>>, vector<2x8x8x64xbf16>
    tpu.vector_store %arg7[%c0_75, %c1_76, %c1_77, %c0_78], %45 {strides = array<i32>} : memref<2x10x10x64xbf16, #tpu.memory_space<vmem>>, vector<2x8x8x64xbf16>,
    %c0_79 = arith.constant 0 : index
    %c0_80 = arith.constant 0 : index
    %c0_81 = arith.constant 0 : index
    %c0_82 = arith.constant 0 : index
    %47 = vector.load %arg7[%c0_79, %c0_80, %c0_81, %c0_82] : memref<2x10x10x64xbf16, #tpu.memory_space<vmem>>, vector<2x8x8x64xbf16>
    %48 = vector.shape_cast %47 : vector<2x8x8x64xbf16> to vector<128x64xbf16>
    %c0_83 = arith.constant 0 : index
    %c0_84 = arith.constant 0 : index
    %49 = vector.load %arg8[%c0_83, %c0_84] : memref<128x576xbf16, #tpu.memory_space<vmem>>, vector<128x64xbf16>
    tpu.vector_store %arg8[%c0_83, %c0_84], %48 {strides = array<i32>} : memref<128x576xbf16, #tpu.memory_space<vmem>>, vector<128x64xbf16>,
    %c0_85 = arith.constant 0 : index
    %c0_86 = arith.constant 0 : index
    %c1_87 = arith.constant 1 : index
    %c0_88 = arith.constant 0 : index
    %50 = vector.load %arg7[%c0_85, %c0_86, %c1_87, %c0_88] : memref<2x10x10x64xbf16, #tpu.memory_space<vmem>>, vector<2x8x8x64xbf16>
    %51 = vector.shape_cast %50 : vector<2x8x8x64xbf16> to vector<128x64xbf16>
    %c0_89 = arith.constant 0 : index
    %c64_90 = arith.constant 64 : index
    %52 = vector.load %arg8[%c0_89, %c64_90] : memref<128x576xbf16, #tpu.memory_space<vmem>>, vector<128x64xbf16>
    tpu.vector_store %arg8[%c0_89, %c64_90], %51 {strides = array<i32>} : memref<128x576xbf16, #tpu.memory_space<vmem>>, vector<128x64xbf16>,
    %c0_91 = arith.constant 0 : index
    %c0_92 = arith.constant 0 : index
    %c2_93 = arith.constant 2 : index
    %c0_94 = arith.constant 0 : index
    %53 = vector.load %arg7[%c0_91, %c0_92, %c2_93, %c0_94] : memref<2x10x10x64xbf16, #tpu.memory_space<vmem>>, vector<2x8x8x64xbf16>
    %54 = vector.shape_cast %53 : vector<2x8x8x64xbf16> to vector<128x64xbf16>
    %c0_95 = arith.constant 0 : index
    %c128_96 = arith.constant 128 : index
    %55 = vector.load %arg8[%c0_95, %c128_96] : memref<128x576xbf16, #tpu.memory_space<vmem>>, vector<128x64xbf16>
    tpu.vector_store %arg8[%c0_95, %c128_96], %54 {strides = array<i32>} : memref<128x576xbf16, #tpu.memory_space<vmem>>, vector<128x64xbf16>,
    %c0_97 = arith.constant 0 : index
    %c1_98 = arith.constant 1 : index
    %c0_99 = arith.constant 0 : index
    %c0_100 = arith.constant 0 : index
    %56 = vector.load %arg7[%c0_97, %c1_98, %c0_99, %c0_100] : memref<2x10x10x64xbf16, #tpu.memory_space<vmem>>, vector<2x8x8x64xbf16>
    %57 = vector.shape_cast %56 : vector<2x8x8x64xbf16> to vector<128x64xbf16>
    %c0_101 = arith.constant 0 : index
    %c192_102 = arith.constant 192 : index
    %58 = vector.load %arg8[%c0_101, %c192_102] : memref<128x576xbf16, #tpu.memory_space<vmem>>, vector<128x64xbf16>
    tpu.vector_store %arg8[%c0_101, %c192_102], %57 {strides = array<i32>} : memref<128x576xbf16, #tpu.memory_space<vmem>>, vector<128x64xbf16>,
    %c0_103 = arith.constant 0 : index
    %c1_104 = arith.constant 1 : index
    %c1_105 = arith.constant 1 : index
    %c0_106 = arith.constant 0 : index
    %59 = vector.load %arg7[%c0_103, %c1_104, %c1_105, %c0_106] : memref<2x10x10x64xbf16, #tpu.memory_space<vmem>>, vector<2x8x8x64xbf16>
    %60 = vector.shape_cast %59 : vector<2x8x8x64xbf16> to vector<128x64xbf16>
    %c0_107 = arith.constant 0 : index
    %c256_108 = arith.constant 256 : index
    %61 = vector.load %arg8[%c0_107, %c256_108] : memref<128x576xbf16, #tpu.memory_space<vmem>>, vector<128x64xbf16>
    tpu.vector_store %arg8[%c0_107, %c256_108], %60 {strides = array<i32>} : memref<128x576xbf16, #tpu.memory_space<vmem>>, vector<128x64xbf16>,
    %c0_109 = arith.constant 0 : index
    %c1_110 = arith.constant 1 : index
    %c2_111 = arith.constant 2 : index
    %c0_112 = arith.constant 0 : index
    %62 = vector.load %arg7[%c0_109, %c1_110, %c2_111, %c0_112] : memref<2x10x10x64xbf16, #tpu.memory_space<vmem>>, vector<2x8x8x64xbf16>
    %63 = vector.shape_cast %62 : vector<2x8x8x64xbf16> to vector<128x64xbf16>
    %c0_113 = arith.constant 0 : index
    %c320_114 = arith.constant 320 : index
    %64 = vector.load %arg8[%c0_113, %c320_114] : memref<128x576xbf16, #tpu.memory_space<vmem>>, vector<128x64xbf16>
    tpu.vector_store %arg8[%c0_113, %c320_114], %63 {strides = array<i32>} : memref<128x576xbf16, #tpu.memory_space<vmem>>, vector<128x64xbf16>,
    %c0_115 = arith.constant 0 : index
    %c2_116 = arith.constant 2 : index
    %c0_117 = arith.constant 0 : index
    %c0_118 = arith.constant 0 : index
    %65 = vector.load %arg7[%c0_115, %c2_116, %c0_117, %c0_118] : memref<2x10x10x64xbf16, #tpu.memory_space<vmem>>, vector<2x8x8x64xbf16>
    %66 = vector.shape_cast %65 : vector<2x8x8x64xbf16> to vector<128x64xbf16>
    %c0_119 = arith.constant 0 : index
    %c384_120 = arith.constant 384 : index
    %67 = vector.load %arg8[%c0_119, %c384_120] : memref<128x576xbf16, #tpu.memory_space<vmem>>, vector<128x64xbf16>
    tpu.vector_store %arg8[%c0_119, %c384_120], %66 {strides = array<i32>} : memref<128x576xbf16, #tpu.memory_space<vmem>>, vector<128x64xbf16>,
    %c0_121 = arith.constant 0 : index
    %c2_122 = arith.constant 2 : index
    %c1_123 = arith.constant 1 : index
    %c0_124 = arith.constant 0 : index
    %68 = vector.load %arg7[%c0_121, %c2_122, %c1_123, %c0_124] : memref<2x10x10x64xbf16, #tpu.memory_space<vmem>>, vector<2x8x8x64xbf16>
    %69 = vector.shape_cast %68 : vector<2x8x8x64xbf16> to vector<128x64xbf16>
    %c0_125 = arith.constant 0 : index
    %c448_126 = arith.constant 448 : index
    %70 = vector.load %arg8[%c0_125, %c448_126] : memref<128x576xbf16, #tpu.memory_space<vmem>>, vector<128x64xbf16>
    tpu.vector_store %arg8[%c0_125, %c448_126], %69 {strides = array<i32>} : memref<128x576xbf16, #tpu.memory_space<vmem>>, vector<128x64xbf16>,
    %c0_127 = arith.constant 0 : index
    %c2_128 = arith.constant 2 : index
    %c2_129 = arith.constant 2 : index
    %c0_130 = arith.constant 0 : index
    %71 = vector.load %arg7[%c0_127, %c2_128, %c2_129, %c0_130] : memref<2x10x10x64xbf16, #tpu.memory_space<vmem>>, vector<2x8x8x64xbf16>
    %72 = vector.shape_cast %71 : vector<2x8x8x64xbf16> to vector<128x64xbf16>
    %c0_131 = arith.constant 0 : index
    %c512_132 = arith.constant 512 : index
    %73 = vector.load %arg8[%c0_131, %c512_132] : memref<128x576xbf16, #tpu.memory_space<vmem>>, vector<128x64xbf16>
    tpu.vector_store %arg8[%c0_131, %c512_132], %72 {strides = array<i32>} : memref<128x576xbf16, #tpu.memory_space<vmem>>, vector<128x64xbf16>,
    %c0_133 = arith.constant 0 : index
    %c0_134 = arith.constant 0 : index
    %74 = vector.load %arg8[%c0_133, %c0_134] : memref<128x576xbf16, #tpu.memory_space<vmem>>, vector<128x576xbf16>
    %c0_135 = arith.constant 0 : index
    %c0_136 = arith.constant 0 : index
    %75 = vector.load %arg4[%c0_135, %c0_136] : memref<576x64xbf16, #tpu.memory_space<vmem>>, vector<576x64xbf16>
    %cst_137 = arith.constant dense<0.000000e+00> : vector<128x64xf32>
    %76 = tpu.matmul %74, %75, %cst_137 {dimension_numbers = #tpu.dot_dimension_numbers<[1], [0], [0], [1], [0, 0, 1, 1], [], []>} : vector<128x576xbf16>, vector<576x64xbf16>, vector<128x64xf32> -> vector<128x64xf32>
    %c0_138 = arith.constant 0 : index
    %c0_139 = arith.constant 0 : index
    %77 = vector.load %arg5[%c0_138, %c0_139] : memref<1x64xf32, #tpu.memory_space<vmem>>, vector<1x64xf32>
    %78 = vector.broadcast %77 : vector<1x64xf32> to vector<128x64xf32>
    %79 = arith.addf %76, %78 : vector<128x64xf32>
    %cst_140 = arith.constant 1.000000e+00 : f32
    %80 = vector.broadcast %cst_140 : f32 to vector<128x64xf32>
    %81 = arith.mulf %79, %80 : vector<128x64xf32>
    %c0_141 = arith.constant 0 : index
    %c0_142 = arith.constant 0 : index
    %c0_143 = arith.constant 0 : index
    %c0_144 = arith.constant 0 : index
    %82 = vector.load %arg1[%c0_141, %c0_142, %c0_143, %c0_144] : memref<2x8x8x64xf32, #tpu.memory_space<vmem>>, vector<2x8x8x64xf32>
    %83 = vector.shape_cast %82 : vector<2x8x8x64xf32> to vector<128x64xf32>
    %84 = arith.addf %81, %83 : vector<128x64xf32>
    %85 = vector.shape_cast %84 : vector<128x64xf32> to vector<16x8x64xf32>
    %86 = vector.extract_strided_slice %85 {offsets = [0, 0, 0], sizes = [16, 1, 64], strides = [1, 1, 1]} : vector<16x8x64xf32> to vector<16x1x64xf32>
    %87 = vector.shape_cast %86 : vector<16x1x64xf32> to vector<16x64xf32>
    %c0_145 = arith.constant 0 : index
    %c0_146 = arith.constant 0 : index
    %88 = vector.load %arg6[%c0_145, %c0_146] : memref<16x512xf32, #tpu.memory_space<vmem>>, vector<16x64xf32>
    tpu.vector_store %arg6[%c0_145, %c0_146], %87 {strides = array<i32>} : memref<16x512xf32, #tpu.memory_space<vmem>>, vector<16x64xf32>,
    %89 = vector.extract_strided_slice %85 {offsets = [0, 1, 0], sizes = [16, 1, 64], strides = [1, 1, 1]} : vector<16x8x64xf32> to vector<16x1x64xf32>
    %90 = vector.shape_cast %89 : vector<16x1x64xf32> to vector<16x64xf32>
    %c0_147 = arith.constant 0 : index
    %c64_148 = arith.constant 64 : index
    %91 = vector.load %arg6[%c0_147, %c64_148] : memref<16x512xf32, #tpu.memory_space<vmem>>, vector<16x64xf32>
    tpu.vector_store %arg6[%c0_147, %c64_148], %90 {strides = array<i32>} : memref<16x512xf32, #tpu.memory_space<vmem>>, vector<16x64xf32>,
    %92 = vector.extract_strided_slice %85 {offsets = [0, 2, 0], sizes = [16, 1, 64], strides = [1, 1, 1]} : vector<16x8x64xf32> to vector<16x1x64xf32>
    %93 = vector.shape_cast %92 : vector<16x1x64xf32> to vector<16x64xf32>
    %c0_149 = arith.constant 0 : index
    %c128_150 = arith.constant 128 : index
    %94 = vector.load %arg6[%c0_149, %c128_150] : memref<16x512xf32, #tpu.memory_space<vmem>>, vector<16x64xf32>
    tpu.vector_store %arg6[%c0_149, %c128_150], %93 {strides = array<i32>} : memref<16x512xf32, #tpu.memory_space<vmem>>, vector<16x64xf32>,
    %95 = vector.extract_strided_slice %85 {offsets = [0, 3, 0], sizes = [16, 1, 64], strides = [1, 1, 1]} : vector<16x8x64xf32> to vector<16x1x64xf32>
    %96 = vector.shape_cast %95 : vector<16x1x64xf32> to vector<16x64xf32>
    %c0_151 = arith.constant 0 : index
    %c192_152 = arith.constant 192 : index
    %97 = vector.load %arg6[%c0_151, %c192_152] : memref<16x512xf32, #tpu.memory_space<vmem>>, vector<16x64xf32>
    tpu.vector_store %arg6[%c0_151, %c192_152], %96 {strides = array<i32>} : memref<16x512xf32, #tpu.memory_space<vmem>>, vector<16x64xf32>,
    %98 = vector.extract_strided_slice %85 {offsets = [0, 4, 0], sizes = [16, 1, 64], strides = [1, 1, 1]} : vector<16x8x64xf32> to vector<16x1x64xf32>
    %99 = vector.shape_cast %98 : vector<16x1x64xf32> to vector<16x64xf32>
    %c0_153 = arith.constant 0 : index
    %c256_154 = arith.constant 256 : index
    %100 = vector.load %arg6[%c0_153, %c256_154] : memref<16x512xf32, #tpu.memory_space<vmem>>, vector<16x64xf32>
    tpu.vector_store %arg6[%c0_153, %c256_154], %99 {strides = array<i32>} : memref<16x512xf32, #tpu.memory_space<vmem>>, vector<16x64xf32>,
    %101 = vector.extract_strided_slice %85 {offsets = [0, 5, 0], sizes = [16, 1, 64], strides = [1, 1, 1]} : vector<16x8x64xf32> to vector<16x1x64xf32>
    %102 = vector.shape_cast %101 : vector<16x1x64xf32> to vector<16x64xf32>
    %c0_155 = arith.constant 0 : index
    %c320_156 = arith.constant 320 : index
    %103 = vector.load %arg6[%c0_155, %c320_156] : memref<16x512xf32, #tpu.memory_space<vmem>>, vector<16x64xf32>
    tpu.vector_store %arg6[%c0_155, %c320_156], %102 {strides = array<i32>} : memref<16x512xf32, #tpu.memory_space<vmem>>, vector<16x64xf32>,
    %104 = vector.extract_strided_slice %85 {offsets = [0, 6, 0], sizes = [16, 1, 64], strides = [1, 1, 1]} : vector<16x8x64xf32> to vector<16x1x64xf32>
    %105 = vector.shape_cast %104 : vector<16x1x64xf32> to vector<16x64xf32>
    %c0_157 = arith.constant 0 : index
    %c384_158 = arith.constant 384 : index
    %106 = vector.load %arg6[%c0_157, %c384_158] : memref<16x512xf32, #tpu.memory_space<vmem>>, vector<16x64xf32>
    tpu.vector_store %arg6[%c0_157, %c384_158], %105 {strides = array<i32>} : memref<16x512xf32, #tpu.memory_space<vmem>>, vector<16x64xf32>,
    %107 = vector.extract_strided_slice %85 {offsets = [0, 7, 0], sizes = [16, 1, 64], strides = [1, 1, 1]} : vector<16x8x64xf32> to vector<16x1x64xf32>
    %108 = vector.shape_cast %107 : vector<16x1x64xf32> to vector<16x64xf32>
    %c0_159 = arith.constant 0 : index
    %c448_160 = arith.constant 448 : index
    %109 = vector.load %arg6[%c0_159, %c448_160] : memref<16x512xf32, #tpu.memory_space<vmem>>, vector<16x64xf32>
    tpu.vector_store %arg6[%c0_159, %c448_160], %108 {strides = array<i32>} : memref<16x512xf32, #tpu.memory_space<vmem>>, vector<16x64xf32>,
    return
  }
  func.func @transform_0(%arg0: i32) -> (i32, i32, i32, i32) {
    %c0_i32 = arith.constant 0 : i32
    %c0_i32_0 = arith.constant 0 : i32
    %c0_i32_1 = arith.constant 0 : i32
    %c0_i32_2 = arith.constant 0 : i32
    return %arg0, %c0_i32, %c0_i32_0, %c0_i32_1 : i32, i32, i32, i32
  }
  func.func @transform_1(%arg0: i32) -> (i32, i32) {
    %c0_i32 = arith.constant 0 : i32
    %c0_i32_0 = arith.constant 0 : i32
    %c0_i32_1 = arith.constant 0 : i32
    return %c0_i32, %c0_i32_0 : i32, i32
  }
  func.func @transform_2(%arg0: i32) -> (i32, i32) {
    %c0_i32 = arith.constant 0 : i32
    %c0_i32_0 = arith.constant 0 : i32
    %c0_i32_1 = arith.constant 0 : i32
    return %c0_i32, %c0_i32_0 : i32, i32
  }
  func.func @transform_3(%arg0: i32) -> (i32, i32) {
    %c0_i32 = arith.constant 0 : i32
    %c0_i32_0 = arith.constant 0 : i32
    %c0_i32_1 = arith.constant 0 : i32
    return %c0_i32, %c0_i32_0 : i32, i32
  }
  func.func @transform_4(%arg0: i32) -> (i32, i32) {
    %c0_i32 = arith.constant 0 : i32
    %c0_i32_0 = arith.constant 0 : i32
    %c0_i32_1 = arith.constant 0 : i32
    return %c0_i32, %c0_i32_0 : i32, i32
  }
  func.func @transform_5(%arg0: i32) -> (i32, i32) {
    %c0_i32 = arith.constant 0 : i32
    %c0_i32_0 = arith.constant 0 : i32
    return %arg0, %c0_i32 : i32, i32
  }
}

</mosaic_0001>

<bundles_post_ra>
// kernel: tpu_custom_call.1
= control target key start
LH: loop header
LB: loop body
LE: loop exit
PB: predicated region body
PF: predicated region fallthrough
CT: control target
= control target key end

     0   :  { %vm22_vm0 = vcmask 519168   ;;  %vm24_vm1 = vcmask 516096   ;;  %vm34_vm2 = vsmask.f32 256  ;;  %v39_v0 = vld [vmem:[#allocation2 + $0x8] sm:$0x1]  ;;  %s8675_s0 = inlined_call_operand.vmem [shape: f32[2,8,8,64], index: 0, kind: input, shape index: {}]   ;;  %s8676_s1 = inlined_call_operand.vmem [shape: bf16[576,64], index: 1, kind: input, shape index: {}]   ;;  %s8677_s2 = inlined_call_operand.vmem [shape: f32[1,64], index: 2, kind: input, shape index: {}]   ;;  %s8678_s3 = inlined_call_operand.vmem [shape: bf16[576,64], index: 3, kind: input, shape index: {}]   ;;  %s8679_s4 = inlined_call_operand.vmem [shape: f32[1,64], index: 4, kind: input, shape index: {}]   ;;  %s8680_s5 = inlined_call_operand.hbm [shape: f32[16,512], index: 5, kind: output, shape index: {}]  }
   0x1   :  { %vm6737_vm3 = vmand %vm24_vm1, %vm34_vm2  ;;  %v42_v2 = vld [vmem:[#allocation2 + $0x10] sm:$0x1]  ;;  %vm96_vm4 = vsmask.f32 7938  ;;  %v158_v3 = vld [vmem:[%s8675_s0] sm:$0xff]  ;;  %v6701_v14 = vmov 0  }
   0x2   :  { %v40_v4 = vsel %vm6737_vm3, 0, %v39_v0  ;;  %v43_v5 = vsel %vm6737_vm3, 0, %v42_v2  ;;  %v159_v6 = vld [vmem:[%s8675_s0 + $0x8] sm:$0xff]  ;;  %v6191_v7 = vpack.c.bf16 %v158_v3, %v158_v3  ;;  %v45_v8 = vld [vmem:[#allocation2 + $0x18] sm:$0x1]  ;;  %v160_v12 = vld [vmem:[%s8675_s0 + $0x10] sm:$0xff] }
   0x3   :  { %41 = vst [vmem:[#allocation2 + $0x8] sm:$0x1] %v40_v4  ;;  %44 = vst [vmem:[#allocation2 + $0x10] sm:$0x1] %v43_v5  ;;  %v6192_v9 = vpack.c.bf16 %v159_v6, %v159_v6  ;;  %v46_v10 = vsel %vm6737_vm3, 0, %v45_v8  ;;  %v161_v13 = vld [vmem:[%s8675_s0 + $0x18] sm:$0xff]  ;;  %v6193_v18 = vpack.c.bf16 %v160_v12, %v160_v12 }
   0x4   :  { %v48_v11 = vld [vmem:[#allocation2 + $0x20] sm:$0x1]  ;;  %23 = vst.msk [vmem:[#allocation2] sm:$0xf] %vm22_vm0, %v6701_v14  ;;  %26 = vst.msk [vmem:[#allocation2 + $0x50] sm:$0xf] %vm22_vm0, %v6701_v14  ;;  %v6194_v23 = vpack.c.bf16 %v161_v13, %v161_v13 }
   0x5   :  { %25 = vst.msk [vmem:[#allocation2 + $0x4] sm:$0x1] %vm24_vm1, %v6701_v14  ;;  %27 = vst.msk [vmem:[#allocation2 + $0x54] sm:$0x1] %vm24_vm1, %v6701_v14  ;;  %v239_v15 = vshrl.u32 %v6191_v7, 16  ;;  %v242_v16 = vshll.u32 %v6191_v7, 16 }
   0x6   :  { %29 = vst.msk [vmem:[#allocation2 + $0x48] sm:$0xf] %vm22_vm0, %v6701_v14  ;;  %31 = vst.msk [vmem:[#allocation2 + $0x98] sm:$0xf] %vm22_vm0, %v6701_v14  ;;  %v49_v17 = vsel %vm6737_vm3, 0, %v48_v11  ;;  %v247_v21 = vshrl.u32 %v6192_v9, 16 }
   0x7   :  { %30 = vst.msk [vmem:[#allocation2 + $0x4c] sm:$0x1] %vm24_vm1, %v6701_v14  ;;  %32 = vst.msk [vmem:[#allocation2 + $0x9c] sm:$0x1] %vm24_vm1, %v6701_v14  ;;  %v101_v20 = vld [vmem:[#allocation2 + $0xc] sm:$0x1] }
   0x8   :  { %47 = vst [vmem:[#allocation2 + $0x18] sm:$0x1] %v46_v10  ;;  %vm6771_vm5 = vmand %vm24_vm1, %vm96_vm4  ;;  %v250_v22 = vshll.u32 %v6192_v9, 16  ;;  %v104_v25 = vld [vmem:[#allocation2 + $0x14] sm:$0x1]  ;;  %v241_v26 = vrot.slane %v239_v15, 7 }
   0x9   :  { %50 = vst [vmem:[#allocation2 + $0x20] sm:$0x1] %v49_v17  ;;  %v102_v24 = vsel %vm6771_vm5, 0, %v101_v20  ;;  %v255_v27 = vshrl.u32 %v6193_v18, 16  ;;  %v258_v28 = vshll.u32 %v6193_v18, 16  ;;  %v6777_v29 = vrot.slane %v247_v21, 7  ;;  %vm6784_vm6 = vmand %vm22_vm0, %vm96_vm4 }
   0xa   :  { %103 = vst [vmem:[#allocation2 + $0xc] sm:$0x1] %v102_v24  ;;  %v263_v30 = vshrl.u32 %v6194_v23, 16  ;;  %v266_v31 = vshll.u32 %v6194_v23, 16  ;;  %v162_v32 = vld [vmem:[%s8675_s0 + $0x20] sm:$0xff]  ;;  %v244_v33 = vor.u32 %v242_v16, %v241_v26  ;;  %v105_v36 = vsel %vm6771_vm5, 0, %v104_v25 }
   0xb   :  { %v6788_v35 = vrot.slane %v255_v27, 7  ;;  %v107_v37 = vld [vmem:[#allocation2 + $0x1c] sm:$0x1]  ;;  %v163_v38 = vld [vmem:[%s8675_s0 + $0x28] sm:$0xff]  ;;  %v245_v39 = vrot.slane %v241_v26, 4  ;;  %v252_v40 = vor.u32 %v250_v22, %v6777_v29  ;;  %v164_v44 = vld [vmem:[%s8675_s0 + $0x30] sm:$0xff]  ;;  %v6195_v50 = vpack.c.bf16 %v162_v32, %v162_v32 }
   0xc   :  { %v6796_v41 = vrot.slane %v263_v30, 7  ;;  %106 = vst [vmem:[#allocation2 + $0x14] sm:$0x1] %v105_v36  ;;  %v108_v42 = vsel %vm6771_vm5, 0, %v107_v37  ;;  %v51_v43 = vld [vmem:[#allocation2 + $0x28] sm:$0x1]  ;;  %v6817_v61 = vpack.c.bf16 %v163_v38, %v163_v38  ;;  %v6823_v5 = vpack.c.bf16 %v164_v44, %v164_v44 }
   0xd   :  { %v253_v45 = vrot.slane %v6777_v29, 4  ;;  %v401_v46 = vld [vmem:[#allocation2 + $0x8] sm:$0xf]  ;;  %v407_v47 = vld [vmem:[#allocation2 + $0x10] sm:$0xf]  ;;  %v260_v48 = vor.u32 %v258_v28, %v6788_v35  ;;  %v52_v49 = vsel %vm6737_vm3, 0, %v51_v43 }
   0xe   :  { %109 = vst [vmem:[#allocation2 + $0x1c] sm:$0x1] %v108_v42  ;;  %v402_v51 = vsel %vm6784_vm6, %v244_v33, %v401_v46  ;;  %v408_v52 = vsel %vm6784_vm6, %v252_v40, %v407_v47  ;;  %v261_v53 = vrot.slane %v6788_v35, 4  ;;  %v268_v54 = vor.u32 %v266_v31, %v6796_v41  ;;  %v36_v56 = vld [vmem:[#allocation2] sm:$0x1]  ;;  %v165_v29 = vld [vmem:[%s8675_s0 + $0x38] sm:$0xff] }
   0xf   :  { %v413_v55 = vld [vmem:[#allocation2 + $0x18] sm:$0xf]  ;;  %53 = vst [vmem:[#allocation2 + $0x28] sm:$0x1] %v52_v49  ;;  %403 = vst [vmem:[#allocation2 + $0x8] sm:$0xf] %v402_v51  ;;  %v6859_v49 = vpack.c.bf16 %v165_v29, %v165_v29 }
  0x10   :  { %409 = vst [vmem:[#allocation2 + $0x10] sm:$0xf] %v408_v52  ;;  %v414_v57 = vsel %vm6784_vm6, %v260_v48, %v413_v55  ;;  %v419_v58 = vld [vmem:[#allocation2 + $0x20] sm:$0xf]  ;;  %v37_v59 = vsel %vm6737_vm3, 0, %v36_v56  ;;  %v271_v62 = vshrl.u32 %v6195_v50, 16 }
  0x11   :  { %v98_v60 = vld [vmem:[#allocation2 + $0x4] sm:$0x1]  ;;  %415 = vst [vmem:[#allocation2 + $0x18] sm:$0xf] %v414_v57  ;;  %v420_v63 = vsel %vm6784_vm6, %v268_v54, %v419_v58  ;;  %38 = vst [vmem:[#allocation2] sm:$0x1] %v37_v59 }
  0x12   :  { %v99_v0 = vsel %vm6771_vm5, 0, %v98_v60  ;;  %v404_v2 = vld [vmem:[#allocation2 + $0xc] sm:$0x1]  ;;  %v54_v3 = vld [vmem:[#allocation2 + $0x30] sm:$0x1]  ;;  %v274_v4 = vshll.u32 %v6195_v50, 16 }
  0x13   :  { %421 = vst [vmem:[#allocation2 + $0x20] sm:$0xf] %v420_v63  ;;  %100 = vst [vmem:[#allocation2 + $0x4] sm:$0x1] %v99_v0  ;;  %v405_v6 = vsel %vm6737_vm3, %v245_v39, %v404_v2  ;;  %v55_v7 = vsel %vm6737_vm3, 0, %v54_v3  ;;  %v6829_v8 = vrot.slane %v271_v62, 7 }
  0x14   :  { %v279_v9 = vshrl.u32 %v6817_v61, 16  ;;  %v110_v10 = vld [vmem:[#allocation2 + $0x24] sm:$0x1]  ;;  %406 = vst [vmem:[#allocation2 + $0xc] sm:$0x1] %v405_v6  ;;  %v269_v14 = vrot.slane %v6796_v41, 4 }
  0x15   :  { %56 = vst [vmem:[#allocation2 + $0x30] sm:$0x1] %v55_v7  ;;  %v111_v11 = vsel %vm6771_vm5, 0, %v110_v10  ;;  %v113_v12 = vld [vmem:[#allocation2 + $0x2c] sm:$0x1]  ;;  %v276_v16 = vor.u32 %v274_v4, %v6829_v8  ;;  %v282_v17 = vshll.u32 %v6817_v61, 16 }
  0x16   :  { %v57_v13 = vld [vmem:[#allocation2 + $0x38] sm:$0x1]  ;;  %vm602_vm7 = vsmask.f32 3328  ;;  %vm603_vm8 = vsmask.f32 7440 }
  0x17   :  { %v410_v15 = vld [vmem:[#allocation2 + $0x14] sm:$0x1]  ;;  %112 = vst [vmem:[#allocation2 + $0x24] sm:$0x1] %v111_v11  ;;  %v114_v18 = vsel %vm6771_vm5, 0, %v113_v12  ;;  %v277_v22 = vrot.slane %v6829_v8, 4  ;;  %vm6863_vm9 = vmor %vm602_vm7, %vm603_vm8 }
  0x18   :  { %v411_v20 = vsel %vm6737_vm3, %v253_v45, %v410_v15  ;;  %v416_v21 = vld [vmem:[#allocation2 + $0x1c] sm:$0x1]  ;;  %115 = vst [vmem:[#allocation2 + $0x2c] sm:$0x1] %v114_v18  ;;  %v58_v23 = vsel %vm6737_vm3, 0, %v57_v13  ;;  %v6846_v26 = vrot.slane %v279_v9, 7 }
  0x19   :  { %v60_v24 = vld [vmem:[#allocation2 + $0x40] sm:$0x1]  ;;  %412 = vst [vmem:[#allocation2 + $0x14] sm:$0x1] %v411_v20  ;;  %v417_v25 = vsel %vm6737_vm3, %v261_v53, %v416_v21  ;;  %v425_v27 = vld [vmem:[#allocation2 + $0x28] sm:$0xf] }
  0x1a   :  { %59 = vst [vmem:[#allocation2 + $0x38] sm:$0x1] %v58_v23  ;;  %v61_v28 = vsel %vm6737_vm3, 0, %v60_v24  ;;  %v287_v30 = vshrl.u32 %v6823_v5, 16  ;;  %v6556_v31 = vld [vmem:[#allocation2 + $0x8] ss:$8 sps:$4 sm:$0xff]   ;;  %v426_v32 = vsel %vm6784_vm6, %v276_v16, %v425_v27  ;;  %v284_v48 = vor.u32 %v282_v17, %v6846_v26 }
  0x1b   :  { %418 = vst [vmem:[#allocation2 + $0x1c] sm:$0x1] %v417_v25  ;;  %62 = vst [vmem:[#allocation2 + $0x40] sm:$0x1] %v61_v28  ;;  %v570_v33 = vld [vmem:[#allocation2] sm:$0xf] }
  0x1c   :  { %v572_v35 = vld [vmem:[#allocation2 + $0x8] sm:$0xf]  ;;  %427 = vst [vmem:[#allocation2 + $0x28] sm:$0xf] %v426_v32  ;;  %s6702_s9 = smov 64   ;;  %v606_v39 = vshrl.u32 %v570_v33, 16 }
  0x1d   :  { %1113 = vrot.lane.b32.xlu0 %v6556_v31, %s6702_s9  ;;  %v6557_v36 = vld [vmem:[#allocation2 + $0x18] ss:$8 sps:$4 sm:$0xff]   ;;  %v571_v37 = vld [vmem:[#allocation2 + $0x4] sm:$0x1]  ;;  %v573_v38 = vld [vmem:[#allocation2 + $0xc] sm:$0x1] }
  0x1e   :  { %v609_v40 = vshll.u32 %v570_v33, 16  ;;  %v615_v42 = vshll.u32 %v571_v37, 16  ;;  %v620_v43 = vshrl.u32 %v572_v35, 16  ;;  %1115 = vrot.lane.b32.xlu1 %v6557_v36, %s6702_s9  ;;  %v623_v44 = vshll.u32 %v572_v35, 16  ;;  %v574_v46 = vld [vmem:[#allocation2 + $0x10] sm:$0xf] }
  0x1f   :  { %v629_v45 = vshll.u32 %v573_v38, 16  ;;  %v576_v47 = vld [vmem:[#allocation2 + $0x18] sm:$0xf]  ;;  %v608_v50 = vrot.slane %v606_v39, 4  ;;  %v431_v54 = vld [vmem:[#allocation2 + $0x30] sm:$0xf] }
  0x20   :  { %v611_v51 = vrot.slane %v609_v40, 5  ;;  %v617_v52 = vrot.slane %v615_v42, 5  ;;  %v622_v53 = vrot.slane %v620_v43, 4  ;;  %v625_v55 = vrot.slane %v623_v44, 5  ;;  %v575_v57 = vld [vmem:[#allocation2 + $0x14] sm:$0x1] }
  0x21   :  { %v631_v56 = vrot.slane %v629_v45, 5  ;;  %v634_v58 = vshrl.u32 %v574_v46, 16  ;;  %v637_v59 = vshll.u32 %v574_v46, 16  ;;  %v643_v62 = vshll.u32 %v575_v57, 16  ;;  %v422_v13 = vld [vmem:[#allocation2 + $0x24] sm:$0x1] }
  0x22   :  { %v612_v60 = vor.u32 %v611_v51, %v608_v50  ;;  %v577_v61 = vld [vmem:[#allocation2 + $0x1c] sm:$0x1]  ;;  %v648_v63 = vshrl.u32 %v576_v47, 16  ;;  %v651_v0 = vshll.u32 %v576_v47, 16  ;;  %v626_v3 = vor.u32 %v625_v55, %v622_v53  ;;  %v428_v20 = vld [vmem:[#allocation2 + $0x2c] sm:$0x1] }
  0x23   :  { %v636_v4 = vrot.slane %v634_v58, 4  ;;  %v639_v6 = vrot.slane %v637_v59, 5  ;;  %v657_v7 = vshll.u32 %v577_v61, 16  ;;  %v645_v10 = vrot.slane %v643_v62, 5  ;;  %v578_v21 = vld [vmem:[#allocation2 + $0x20] sm:$0xf] }
  0x24   :  { %v613_v9 = vrot.slane %v612_v60, 4  ;;  %v650_v11 = vrot.slane %v648_v63, 4  ;;  %v653_v12 = vrot.slane %v651_v0, 5  ;;  %v627_v15 = vrot.slane %v626_v3, 4  ;;  %v580_v28 = vld [vmem:[#allocation2 + $0x28] sm:$0xf] }
  0x25   :  { %v640_v16 = vor.u32 %v639_v6, %v636_v4  ;;  %v659_v17 = vrot.slane %v657_v7, 5  ;;  %v432_v18 = vsel %vm6784_vm6, %v284_v48, %v431_v54  ;;  %v423_v25 = vsel %vm6737_vm3, %v269_v14, %v422_v13  ;;  %v6564_v8 = vld [vmem:[%s8676_s1 + $0x40] sm:$0xff]   ;;  %v116_v40 = vld [vmem:[#allocation2 + $0x34] sm:$0x1]  ;;  %v6566_v48 = vld [vmem:[%s8676_s1 + $0x48] sm:$0xff]  }
  0x26   :  { %v618_v23 = vsel %vm6863_vm9, %v613_v9, %v617_v52  ;;  %v654_v24 = vor.u32 %v653_v12, %v650_v11  ;;  %433 = vst [vmem:[#allocation2 + $0x30] sm:$0xf] %v432_v18  ;;  %v429_v27 = vsel %vm6737_vm3, %v277_v22, %v428_v20  ;;  %v632_v29 = vsel %vm6863_vm9, %v627_v15, %v631_v56  ;;  %v6565_v42 = vld [vmem:[%s8676_s1] sm:$0xff]   ;;  %v119_v54 = vld [vmem:[#allocation2 + $0x3c] sm:$0x1] }
  0x27   :  { %v641_v31 = vrot.slane %v640_v16, 4  ;;  %424 = vst [vmem:[#allocation2 + $0x24] sm:$0x1] %v423_v25  ;;  %430 = vst [vmem:[#allocation2 + $0x2c] sm:$0x1] %v429_v27  ;;  %v662_v32 = vshrl.u32 %v578_v21, 16  ;;  %v5853_v35 = vcombine.low %v618_v23, %v632_v29  ;;  %6223 = vmatprep.subr.bf16.mxu0 %v6564_v8 }
  0x28   :  { %v665_v33 = vshll.u32 %v578_v21, 16  ;;  %v655_v36 = vrot.slane %v654_v24, 4  ;;  %v676_v41 = vshrl.u32 %v580_v28, 16  ;;  %v679_v37 = vshll.u32 %v580_v28, 16  ;;  %v166_v47 = vld [vmem:[%s8675_s0 + $0x40] sm:$0xff]  ;;  %6224 = vmatpush3.bf16.msra.mxu0 %v6565_v42 }
  0x29   :  { %v646_v14 = vsel %vm6863_vm9, %v641_v31, %v645_v10  ;;  %v664_v22 = vrot.slane %v662_v32, 4  ;;  %v6888_v39 = vrot.slane %v287_v30, 7  ;;  %853 = vrot.lane.b32.xlu0 %v5853_v35, %s6702_s9  ;;  %v290_v46 = vshll.u32 %v6823_v5, 16  ;;  %v167_v30 = vld [vmem:[%s8675_s0 + $0x48] sm:$0xff]  ;;  %v437_v5 = vld [vmem:[#allocation2 + $0x38] sm:$0xf]  ;;  %6225 = vmatprep.subr.bf16.mxu0 %v6566_v48 }
  0x2a   :  { %v667_v38 = vrot.slane %v665_v33, 5  ;;  %v660_v43 = vsel %vm6863_vm9, %v655_v36, %v659_v17  ;;  %v678_v44 = vrot.slane %v676_v41, 4  ;;  %v681_v45 = vrot.slane %v679_v37, 5  ;;  %v443_v58 = vld [vmem:[#allocation2 + $0x40] sm:$0xf]  ;;  %v6567_v17 = vld [vmem:[%s8676_s1 + $0x8] sm:$0xff]  }
  0x2b   :  { %v5854_v50 = vcombine.low %v646_v14, %v660_v43  ;;  %v285_v51 = vrot.slane %v6846_v26, 4  ;;  %v295_v53 = vshrl.u32 %v6859_v49, 16  ;;  %v292_v56 = vor.u32 %v290_v46, %v6888_v39  ;;  %v69_v60 = vld [vmem:[#allocation2 + $0x58] sm:$0x1]  ;;  %v72_v61 = vld [vmem:[#allocation2 + $0x60] sm:$0x1] }
  0x2c   :  { %v668_v52 = vor.u32 %v667_v38, %v664_v22  ;;  %v682_v55 = vor.u32 %v681_v45, %v678_v44  ;;  %v298_v57 = vshll.u32 %v6859_v49, 16  ;;  %v117_v59 = vsel %vm6771_vm5, 0, %v116_v40  ;;  %v66_v29 = vld [vmem:[#allocation2 + $0x50] sm:$0x1]  ;;  %6226 = vmatpush3.bf16.msra.mxu0 %v6567_v17  ;;  %v128_v41 = vld [vmem:[#allocation2 + $0x54] sm:$0x1] }
  0x2d   :  { %855 = vrot.lane.b32.xlu1 %v5854_v50, %s6702_s9  ;;  %v6558_v62 = vld [vmem:[#allocation2 + $0x28] ss:$8 sps:$4 sm:$0xff]   ;;  %v293_v63 = vrot.slane %v6888_v39, 4  ;;  %v6914_v0 = vrot.slane %v295_v53, 7  ;;  %118 = vst [vmem:[#allocation2 + $0x34] sm:$0x1] %v117_v59  ;;  %v6199_v3 = vpack.c.bf16 %v166_v47, %v166_v47  ;;  %v438_v49 = vsel %vm6784_vm6, %v292_v56, %v437_v5 }
  0x2e   :  { %v579_v4 = vld [vmem:[#allocation2 + $0x24] sm:$0x1]  ;;  %v581_v6 = vld [vmem:[#allocation2 + $0x2c] sm:$0x1]  ;;  %v669_v7 = vrot.slane %v668_v52, 4  ;;  %v120_v9 = vsel %vm6771_vm5, 0, %v119_v54  ;;  %v6200_v10 = vpack.c.bf16 %v167_v30, %v167_v30  ;;  %1117 = vrot.lane.b32.xlu0 %v6558_v62, %s6702_s9 }
  0x2f   :  { %v671_v11 = vshll.u32 %v579_v4, 16  ;;  %v683_v12 = vrot.slane %v682_v55, 4  ;;  %v685_v13 = vshll.u32 %v581_v6, 16  ;;  %v300_v15 = vor.u32 %v298_v57, %v6914_v0  ;;  %439 = vst [vmem:[#allocation2 + $0x38] sm:$0xf] %v438_v49  ;;  %v6568_v31 = vld [vmem:[%s8676_s1 + $0x50] sm:$0xff]  }
  0x30   :  { %121 = vst [vmem:[#allocation2 + $0x3c] sm:$0x1] %v120_v9  ;;  %v582_v16 = vld [vmem:[#allocation2 + $0x30] sm:$0xf]  ;;  %v70_v21 = vsel %vm6737_vm3, 0, %v69_v60  ;;  %v73_v23 = vsel %vm6737_vm3, 0, %v72_v61  ;;  %6227 = vmatprep.subr.bf16.mxu0 %v6568_v31 }
  0x31   :  { %v690_v18 = vshrl.u32 %v582_v16, 16  ;;  %v693_v20 = vshll.u32 %v582_v16, 16  ;;  %v673_v24 = vrot.slane %v671_v11, 5  ;;  %v687_v25 = vrot.slane %v685_v13, 5  ;;  %71 = vst [vmem:[#allocation2 + $0x58] sm:$0x1] %v70_v21 }
  0x32   :  { %v444_v27 = vsel %vm6784_vm6, %v300_v15, %v443_v58  ;;  %74 = vst [vmem:[#allocation2 + $0x60] sm:$0x1] %v73_v23  ;;  %v303_v28 = vshrl.u32 %v6199_v3, 16  ;;  %v306_v35 = vshll.u32 %v6199_v3, 16  ;;  %v311_v36 = vshrl.u32 %v6200_v10, 16  ;;  %v168_v38 = vld [vmem:[%s8675_s0 + $0x50] sm:$0xff] }
  0x33   :  { %445 = vst [vmem:[#allocation2 + $0x40] sm:$0xf] %v444_v27  ;;  %v692_v32 = vrot.slane %v690_v18, 4  ;;  %v695_v33 = vrot.slane %v693_v20, 5  ;;  %v674_v37 = vsel %vm6863_vm9, %v669_v7, %v673_v24  ;;  %v688_v8 = vsel %vm6863_vm9, %v683_v12, %v687_v25  ;;  %v169_v40 = vld [vmem:[%s8675_s0 + $0x58] sm:$0xff]  ;;  %v170_v5 = vld [vmem:[%s8675_s0 + $0x60] sm:$0xff] }
  0x34   :  { %v6938_v14 = vrot.slane %v303_v28, 7  ;;  %v314_v22 = vshll.u32 %v6200_v10, 16  ;;  %v5855_v42 = vcombine.low %v674_v37, %v688_v8  ;;  %v434_v43 = vld [vmem:[#allocation2 + $0x34] sm:$0x1]  ;;  %v6946_v45 = vrot.slane %v311_v36, 7  ;;  %v6570_v27 = vld [vmem:[%s8676_s1 + $0x58] sm:$0xff]  }
  0x35   :  { %v696_v44 = vor.u32 %v695_v33, %v692_v32  ;;  %v67_v46 = vsel %vm6737_vm3, 0, %v66_v29  ;;  %v131_v47 = vld [vmem:[#allocation2 + $0x5c] sm:$0x1]  ;;  %v435_v30 = vsel %vm6737_vm3, %v285_v51, %v434_v43  ;;  %v129_v50 = vsel %vm6771_vm5, 0, %v128_v41  ;;  %v75_v52 = vld [vmem:[#allocation2 + $0x68] sm:$0x1] }
  0x36   :  { %v308_v48 = vor.u32 %v306_v35, %v6938_v14  ;;  %68 = vst [vmem:[#allocation2 + $0x50] sm:$0x1] %v67_v46  ;;  %v78_v53 = vld [vmem:[#allocation2 + $0x70] sm:$0x1]  ;;  %857 = vrot.lane.b32.xlu1 %v5855_v42, %s6702_s9  ;;  %436 = vst [vmem:[#allocation2 + $0x34] sm:$0x1] %v435_v30  ;;  %v316_v55 = vor.u32 %v314_v22, %v6946_v45  ;;  %v6201_v51 = vpack.c.bf16 %v168_v38, %v168_v38 }
  0x37   :  { %v440_v54 = vld [vmem:[#allocation2 + $0x3c] sm:$0x1]  ;;  %v584_v26 = vld [vmem:[#allocation2 + $0x38] sm:$0xf]  ;;  %130 = vst [vmem:[#allocation2 + $0x54] sm:$0x1] %v129_v50  ;;  %v6962_v56 = vpack.c.bf16 %v169_v40, %v169_v40 }
  0x38   :  { %v134_v57 = vld [vmem:[#allocation2 + $0x64] sm:$0x1]  ;;  %v441_v58 = vsel %vm6737_vm3, %v293_v63, %v440_v54  ;;  %v704_v59 = vshrl.u32 %v584_v26, 16  ;;  %v707_v60 = vshll.u32 %v584_v26, 16  ;;  %v309_v61 = vrot.slane %v6938_v14, 4  ;;  %v6569_v6 = vld [vmem:[%s8676_s1 + $0x10] sm:$0xff]  }
  0x39   :  { %v137_v62 = vld [vmem:[#allocation2 + $0x6c] sm:$0x1]  ;;  %v81_v3 = vld [vmem:[#allocation2 + $0x78] sm:$0x1]  ;;  %v84_v4 = vld [vmem:[#allocation2 + $0x80] sm:$0x1]  ;;  %v6976_v63 = vpack.c.bf16 %v170_v5, %v170_v5  ;;  %6228 = vmatpush3.bf16.msra.mxu0 %v6569_v6 }
  0x3a   :  { %442 = vst [vmem:[#allocation2 + $0x3c] sm:$0x1] %v441_v58  ;;  %v6972_v7 = vrot.slane %v696_v44, 4  ;;  %v449_v49 = vld [vmem:[#allocation2 + $0x58] sm:$0xf]  ;;  %v132_v39 = vsel %vm6771_vm5, 0, %v131_v47  ;;  %6229 = vmatprep.subr.bf16.mxu0 %v6570_v27 }
  0x3b   :  { %v455_v9 = vld [vmem:[#allocation2 + $0x60] sm:$0xf]  ;;  %v706_v11 = vrot.slane %v704_v59, 4  ;;  %v709_v12 = vrot.slane %v707_v60, 5  ;;  %v450_v13 = vsel %vm6784_vm6, %v308_v48, %v449_v49  ;;  %133 = vst [vmem:[#allocation2 + $0x5c] sm:$0x1] %v132_v39 }
  0x3c   :  { %v6559_v10 = vld [vmem:[#allocation2 + $0x38] ss:$8 sps:$4 sm:$0xff]   ;;  %v456_v15 = vsel %vm6784_vm6, %v316_v55, %v455_v9  ;;  %v317_v16 = vrot.slane %v6946_v45, 4  ;;  %451 = vst [vmem:[#allocation2 + $0x58] sm:$0xf] %v450_v13  ;;  %v76_v17 = vsel %vm6737_vm3, 0, %v75_v52 }
  0x3d   :  { %457 = vst [vmem:[#allocation2 + $0x60] sm:$0xf] %v456_v15  ;;  %v79_v18 = vsel %vm6737_vm3, 0, %v78_v53  ;;  %v319_v20 = vshrl.u32 %v6201_v51, 16  ;;  %1119 = vrot.lane.b32.xlu0 %v6559_v10, %s6702_s9  ;;  %v710_v21 = vor.u32 %v709_v12, %v706_v11  ;;  %77 = vst [vmem:[#allocation2 + $0x68] sm:$0x1] %v76_v17 }
  0x3e   :  { %80 = vst [vmem:[#allocation2 + $0x70] sm:$0x1] %v79_v18  ;;  %v322_v23 = vshll.u32 %v6201_v51, 16  ;;  %v327_v24 = vshrl.u32 %v6962_v56, 16  ;;  %v135_v25 = vsel %vm6771_vm5, 0, %v134_v57  ;;  %v138_v31 = vsel %vm6771_vm5, 0, %v137_v62 }
  0x3f   :  { %v586_v28 = vld [vmem:[#allocation2 + $0x50] sm:$0xf]  ;;  %v6994_v29 = vrot.slane %v319_v20, 7  ;;  %136 = vst [vmem:[#allocation2 + $0x64] sm:$0x1] %v135_v25  ;;  %v82_v32 = vsel %vm6737_vm3, 0, %v81_v3 }
  0x40   :  { %v85_v33 = vsel %vm6737_vm3, 0, %v84_v4  ;;  %v583_v35 = vld [vmem:[#allocation2 + $0x34] sm:$0x1]  ;;  %v718_v41 = vshrl.u32 %v586_v28, 16  ;;  %v330_v37 = vshll.u32 %v6962_v56, 16  ;;  %v711_v22 = vrot.slane %v710_v21, 4 }
  0x41   :  { %v587_v36 = vld [vmem:[#allocation2 + $0x54] sm:$0x1]  ;;  %139 = vst [vmem:[#allocation2 + $0x6c] sm:$0x1] %v138_v31  ;;  %83 = vst [vmem:[#allocation2 + $0x78] sm:$0x1] %v82_v32  ;;  %v324_v47 = vor.u32 %v322_v23, %v6994_v29 }
  0x42   :  { %86 = vst [vmem:[#allocation2 + $0x80] sm:$0x1] %v85_v33  ;;  %v699_v8 = vshll.u32 %v583_v35, 16  ;;  %v721_v38 = vshll.u32 %v586_v28, 16  ;;  %v727_v40 = vshll.u32 %v587_v36, 16  ;;  %v171_v42 = vld [vmem:[%s8675_s0 + $0x68] sm:$0xff] }
  0x43   :  { %v6571_v43 = vld [vmem:[%s8676_s1 + $0x18] sm:$0xff]   ;;  %v720_v46 = vrot.slane %v718_v41, 4  ;;  %v325_v30 = vrot.slane %v6994_v29, 4  ;;  %v7011_v48 = vrot.slane %v327_v24, 7  ;;  %v172_v50 = vld [vmem:[%s8675_s0 + $0x70] sm:$0xff]  ;;  %v335_v26 = vshrl.u32 %v6976_v63, 16 }
  0x44   :  { %v585_v44 = vld [vmem:[#allocation2 + $0x3c] sm:$0x1]  ;;  %v701_v52 = vrot.slane %v699_v8, 5  ;;  %v723_v54 = vrot.slane %v721_v38, 5  ;;  %6230 = vmatpush3.bf16.msra.mxu0 %v6571_v43  ;;  %v6560_v55 = vld [vmem:[#allocation2 + $0x58] ss:$8 sps:$4 sm:$0xff]   ;;  %v7027_v3 = vpack.c.bf16 %v171_v42, %v171_v42  ;;  %v7032_v39 = vpack.c.bf16 %v172_v50, %v172_v50 }
  0x45   :  { %v713_v53 = vshll.u32 %v585_v44, 16  ;;  %v452_v5 = vld [vmem:[#allocation2 + $0x5c] sm:$0x1]  ;;  %v332_v56 = vor.u32 %v330_v37, %v7011_v48  ;;  %v588_v59 = vld [vmem:[#allocation2 + $0x58] sm:$0xf]  ;;  %v7025_v60 = vrot.slane %v727_v40, 5  ;;  %1121 = vrot.lane.b32.xlu0 %v6560_v55, %s6702_s9 }
  0x46   :  { %v453_v51 = vsel %vm6737_vm3, %v309_v61, %v452_v5  ;;  %v702_v57 = vsel %vm6863_vm9, %v6972_v7, %v701_v52  ;;  %v461_v62 = vld [vmem:[#allocation2 + $0x68] sm:$0xf]  ;;  %v732_v14 = vshrl.u32 %v588_v59, 16  ;;  %v735_v4 = vshll.u32 %v588_v59, 16  ;;  %v467_v6 = vld [vmem:[#allocation2 + $0x70] sm:$0xf] }
  0x47   :  { %v715_v58 = vrot.slane %v713_v53, 5  ;;  %454 = vst [vmem:[#allocation2 + $0x5c] sm:$0x1] %v453_v51  ;;  %v462_v61 = vsel %vm6784_vm6, %v324_v47, %v461_v62  ;;  %v458_v49 = vld [vmem:[#allocation2 + $0x64] sm:$0x1]  ;;  %v724_v10 = vor.u32 %v723_v54, %v720_v46  ;;  %v468_v11 = vsel %vm6784_vm6, %v332_v56, %v467_v6  ;;  %v6574_v41 = vld [vmem:[%s8676_s1 + $0x68] sm:$0xff]  }
  0x48   :  { %v140_v9 = vld [vmem:[#allocation2 + $0x74] sm:$0x1]  ;;  %463 = vst [vmem:[#allocation2 + $0x68] sm:$0xf] %v462_v61  ;;  %v459_v12 = vsel %vm6737_vm3, %v317_v16, %v458_v49  ;;  %v464_v13 = vld [vmem:[#allocation2 + $0x6c] sm:$0x1] }
  0x49   :  { %v716_v7 = vsel %vm6863_vm9, %v711_v22, %v715_v58  ;;  %v590_v15 = vld [vmem:[#allocation2 + $0x60] sm:$0xf]  ;;  %v734_v20 = vrot.slane %v732_v14, 4  ;;  %v737_v21 = vrot.slane %v735_v4, 5  ;;  %469 = vst [vmem:[#allocation2 + $0x70] sm:$0xf] %v468_v11  ;;  %v465_v23 = vsel %vm6737_vm3, %v325_v30, %v464_v13 }
  0x4a   :  { %v6572_v17 = vld [vmem:[%s8676_s1 + $0x60] sm:$0xff]   ;;  %v5856_v18 = vcombine.low %v702_v57, %v716_v7  ;;  %460 = vst [vmem:[#allocation2 + $0x64] sm:$0x1] %v459_v12  ;;  %v143_v24 = vld [vmem:[#allocation2 + $0x7c] sm:$0x1]  ;;  %v333_v45 = vrot.slane %v7011_v48, 4 }
  0x4b   :  { %v87_v25 = vld [vmem:[#allocation2 + $0x88] sm:$0x1]  ;;  %466 = vst [vmem:[#allocation2 + $0x6c] sm:$0x1] %v465_v23  ;;  %v746_v16 = vshrl.u32 %v590_v15, 16  ;;  %v749_v27 = vshll.u32 %v590_v15, 16  ;;  %6231 = vmatprep.subr.bf16.mxu0 %v6572_v17  ;;  %v738_v31 = vor.u32 %v737_v21, %v734_v20 }
  0x4c   :  { %v7048_v28 = vrot.slane %v335_v26, 7  ;;  %v6573_v29 = vld [vmem:[%s8676_s1 + $0x20] sm:$0xff]   ;;  %859 = vrot.lane.b32.xlu1 %v5856_v18, %s6702_s9  ;;  %v338_v32 = vshll.u32 %v6976_v63, 16  ;;  %v343_v33 = vshrl.u32 %v7027_v3, 16  ;;  %v346_v35 = vshll.u32 %v7027_v3, 16  ;;  %v173_v63 = vld [vmem:[%s8675_s0 + $0x78] sm:$0xff] }
  0x4d   :  { %v90_v36 = vld [vmem:[#allocation2 + $0x90] sm:$0x1]  ;;  %v725_v37 = vrot.slane %v724_v10, 4  ;;  %v748_v8 = vrot.slane %v746_v16, 4  ;;  %v751_v22 = vrot.slane %v749_v27, 5  ;;  %v141_v40 = vsel %vm6771_vm5, 0, %v140_v9  ;;  %6232 = vmatpush3.bf16.msra.mxu0 %v6573_v29 }
  0x4e   :  { %v473_v38 = vld [vmem:[#allocation2 + $0x78] sm:$0xf]  ;;  %v589_v42 = vld [vmem:[#allocation2 + $0x5c] sm:$0x1]  ;;  %v739_v43 = vrot.slane %v738_v31, 4  ;;  %v340_v44 = vor.u32 %v338_v32, %v7048_v28  ;;  %v7066_v46 = vrot.slane %v343_v33, 7  ;;  %6233 = vmatprep.subr.bf16.mxu0 %v6574_v41  ;;  %v7092_v7 = vpack.c.bf16 %v173_v63, %v173_v63 }
  0x4f   :  { %142 = vst [vmem:[#allocation2 + $0x74] sm:$0x1] %v141_v40  ;;  %v144_v47 = vsel %vm6771_vm5, 0, %v143_v24  ;;  %v6575_v30 = vld [vmem:[%s8676_s1 + $0x28] sm:$0xff]   ;;  %v741_v50 = vshll.u32 %v589_v42, 16  ;;  %v752_v52 = vor.u32 %v751_v22, %v748_v8  ;;  %v88_v5 = vsel %vm6737_vm3, 0, %v87_v25 }
  0x50   :  { %v479_v53 = vld [vmem:[#allocation2 + $0x80] sm:$0xf]  ;;  %145 = vst [vmem:[#allocation2 + $0x7c] sm:$0x1] %v144_v47  ;;  %v91_v54 = vsel %vm6737_vm3, 0, %v90_v36  ;;  %v6576_v26 = vld [vmem:[%s8676_s1 + $0x70] sm:$0xff]   ;;  %v348_v56 = vor.u32 %v346_v35, %v7066_v46  ;;  %v474_v57 = vsel %vm6784_vm6, %v340_v44, %v473_v38  ;;  %v730_v59 = vsel %vm6863_vm9, %v725_v37, %v7025_v60 }
  0x51   :  { %v592_v55 = vld [vmem:[#allocation2 + $0x68] sm:$0xf]  ;;  %v341_v51 = vrot.slane %v7048_v28, 4  ;;  %89 = vst [vmem:[#allocation2 + $0x88] sm:$0x1] %v88_v5  ;;  %v351_v58 = vshrl.u32 %v7032_v39, 16  ;;  %6234 = vmatpush3.bf16.msra.mxu0 %v6575_v30 }
  0x52   :  { %92 = vst [vmem:[#allocation2 + $0x90] sm:$0x1] %v91_v54  ;;  %v743_v62 = vrot.slane %v741_v50, 5  ;;  %v6561_v3 = vld [vmem:[#allocation2 + $0x68] ss:$8 sps:$4 sm:$0xff]   ;;  %v7088_v14 = vrot.slane %v752_v52, 4  ;;  %v480_v9 = vsel %vm6784_vm6, %v348_v56, %v479_v53  ;;  %6235 = vmatprep.subr.bf16.mxu0 %v6576_v26 }
  0x53   :  { %475 = vst [vmem:[#allocation2 + $0x78] sm:$0xf] %v474_v57  ;;  %v591_v4 = vld [vmem:[#allocation2 + $0x64] sm:$0x1]  ;;  %v593_v61 = vld [vmem:[#allocation2 + $0x6c] sm:$0x1]  ;;  %1123 = vrot.lane.b32.xlu0 %v6561_v3, %s6702_s9 }
  0x54   :  { %v760_v6 = vshrl.u32 %v592_v55, 16  ;;  %v763_v49 = vshll.u32 %v592_v55, 16  ;;  %v744_v10 = vsel %vm6863_vm9, %v739_v43, %v743_v62  ;;  %v755_v60 = vshll.u32 %v591_v4, 16  ;;  %481 = vst [vmem:[#allocation2 + $0x80] sm:$0xf] %v480_v9  ;;  %v6578_v15 = vld [vmem:[%s8676_s1 + $0x30] sm:$0xff]  }
  0x55   :  { %v769_v11 = vshll.u32 %v593_v61, 16  ;;  %v594_v12 = vld [vmem:[#allocation2 + $0x70] sm:$0xf]  ;;  %v7097_v13 = vrot.slane %v351_v58, 7  ;;  %v5857_v17 = vcombine.low %v730_v59, %v744_v10  ;;  %v6580_v23 = vld [vmem:[%s8676_s1 + $0x78] sm:$0xff]   ;;  %v354_v27 = vshll.u32 %v7032_v39, 16  ;;  %6236 = vmatpush3.bf16.msra.mxu0 %v6578_v15 }
  0x56   :  { %v762_v18 = vrot.slane %v760_v6, 4  ;;  %v765_v20 = vrot.slane %v763_v49, 5  ;;  %v774_v21 = vshrl.u32 %v594_v12, 16  ;;  %v757_v24 = vrot.slane %v755_v60, 5  ;;  %v470_v25 = vld [vmem:[#allocation2 + $0x74] sm:$0x1]  ;;  %6237 = vmatprep.subr.bf16.mxu0 %v6580_v23 }
  0x57   :  { %v777_v16 = vshll.u32 %v594_v12, 16  ;;  %861 = vrot.lane.b32.xlu1 %v5857_v17, %s6702_s9  ;;  %v771_v29 = vrot.slane %v769_v11, 5  ;;  %v471_v31 = vsel %vm6737_vm3, %v333_v45, %v470_v25  ;;  %v476_v32 = vld [vmem:[#allocation2 + $0x7c] sm:$0x1]  ;;  %v146_v35 = vld [vmem:[#allocation2 + $0x84] sm:$0x1]  ;;  %v356_v37 = vor.u32 %v354_v27, %v7097_v13 }
  0x58   :  { %v766_v28 = vor.u32 %v765_v20, %v762_v18  ;;  %v776_v33 = vrot.slane %v774_v21, 4  ;;  %v349_v36 = vrot.slane %v7066_v46, 4  ;;  %472 = vst [vmem:[#allocation2 + $0x74] sm:$0x1] %v471_v31  ;;  %v477_v39 = vsel %vm6737_vm3, %v341_v51, %v476_v32  ;;  %v485_v8 = vld [vmem:[#allocation2 + $0x88] sm:$0xf] }
  0x59   :  { %v779_v41 = vrot.slane %v777_v16, 5  ;;  %v149_v22 = vld [vmem:[#allocation2 + $0x8c] sm:$0x1]  ;;  %v6581_v48 = vld [vmem:[%s8676_s1 + $0x38] sm:$0xff]   ;;  %v758_v45 = vsel %vm6863_vm9, %v7088_v14, %v757_v24  ;;  %478 = vst [vmem:[#allocation2 + $0x7c] sm:$0x1] %v477_v39  ;;  %v486_v51 = vsel %vm6784_vm6, %v356_v37, %v485_v8 }
  0x5a   :  { %v767_v38 = vrot.slane %v766_v28, 4  ;;  %v596_v40 = vld [vmem:[#allocation2 + $0x78] sm:$0xf]  ;;  %v359_v63 = vshrl.u32 %v7092_v7, 16  ;;  %v1698_v42 = vld [vmem:[#allocation2 + $0x10] sm:$0xf]  ;;  %6238 = vmatpush3.bf16.msra.mxu0 %v6581_v48 }
  0x5b   :  { %v780_v43 = vor.u32 %v779_v41, %v776_v33  ;;  %v788_v44 = vshrl.u32 %v596_v40, 16  ;;  %v791_v47 = vshll.u32 %v596_v40, 16  ;;  %v362_v30 = vshll.u32 %v7092_v7, 16  ;;  %v491_v50 = vld [vmem:[#allocation2 + $0x90] sm:$0xf]  ;;  %v6583_v5 = vld [vmem:[%s8676_s1 + $0xc0] sm:$0xff]  }
  0x5c   :  { %v1699_v52 = vld [vmem:[#allocation2 + $0x14] sm:$0x1]  ;;  %v7123_v53 = vld [vmem:[#allocation2 + $0x18] sm:$0xf]  ;;  %v772_v54 = vsel %vm6863_vm9, %v767_v38, %v771_v29  ;;  %v7130_v55 = vrot.slane %v359_v63, 7  ;;  %v147_v56 = vsel %vm6771_vm5, 0, %v146_v35  ;;  %6287 = vmatprep.subr.bf16.mxu1 %v6583_v5 }
  0x5d   :  { %v6562_v26 = vld [vmem:[#allocation2 + $0x78] ss:$8 sps:$4 sm:$0xff]   ;;  %v5858_v57 = vcombine.low %v758_v45, %v772_v54  ;;  %v790_v58 = vrot.slane %v788_v44, 4  ;;  %v793_v59 = vrot.slane %v791_v47, 5  ;;  %v357_v62 = vrot.slane %v7097_v13, 4  ;;  %v6587_v15 = vld [vmem:[%s8676_s1 + $0xc8] sm:$0xff]  }
  0x5e   :  { %487 = vst [vmem:[#allocation2 + $0x88] sm:$0xf] %v486_v51  ;;  %148 = vst [vmem:[#allocation2 + $0x84] sm:$0x1] %v147_v56  ;;  %v598_v3 = vld [vmem:[#allocation2 + $0x80] sm:$0xf]  ;;  %1125 = vrot.lane.b32.xlu0 %v6562_v26, %s6702_s9  ;;  %v364_v61 = vor.u32 %v362_v30, %v7130_v55 }
  0x5f   :  { %v6584_v14 = vld [vmem:[%s8676_s1 + $0x80] sm:$0xff]   ;;  %v781_v4 = vrot.slane %v780_v43, 4  ;;  %v150_v6 = vsel %vm6771_vm5, 0, %v149_v22  ;;  %v802_v49 = vshrl.u32 %v598_v3, 16  ;;  %vm950_vm10 = vcmask 1042432   ;;  %863 = vrot.lane.b32.xlu1 %v5858_v57, %s6702_s9  ;;  %v6588_v24 = vld [vmem:[%s8676_s1 + $0x88] sm:$0xff]  }
  0x60   :  { %v7147_v9 = vld [vmem:[%s8676_s1 + $0x100] sm:$0xff]   ;;  %v794_v7 = vor.u32 %v793_v59, %v790_v58  ;;  %151 = vst [vmem:[#allocation2 + $0x8c] sm:$0x1] %v150_v6  ;;  %v805_v10 = vshll.u32 %v598_v3, 16  ;;  %v1701_v60 = vld [vmem:[#allocation2 + $0x1c] sm:$0x1]  ;;  %6288 = vmatpush3.bf16.msra.mxu1 %v6584_v14  ;;  %v492_v18 = vsel %vm6784_vm6, %v364_v61, %v491_v50 }
  0x61   :  { %v1731_v11 = vshrl.u32 %v1698_v42, 16  ;;  %v1734_v12 = vshll.u32 %v1698_v42, 16  ;;  %v595_v17 = vld [vmem:[#allocation2 + $0x74] sm:$0x1]  ;;  %v804_v20 = vrot.slane %v802_v49, 4  ;;  %v1740_v21 = vshll.u32 %v1699_v52, 16  ;;  %6503 = vmatprep.subr.bf16.mxu0 %v7147_v9  ;;  %6289 = vmatprep.subr.bf16.mxu1 %v6587_v15 }
  0x62   :  { %v1745_v23 = vshrl.u32 %v7123_v53, 16  ;;  %v597_v25 = vld [vmem:[#allocation2 + $0x7c] sm:$0x1]  ;;  %v783_v16 = vshll.u32 %v595_v17, 16  ;;  %v795_v27 = vrot.slane %v794_v7, 4  ;;  %v807_v28 = vrot.slane %v805_v10, 5 }
  0x63   :  { %493 = vst [vmem:[#allocation2 + $0x90] sm:$0xf] %v492_v18  ;;  %v1733_v29 = vrot.slane %v1731_v11, 4  ;;  %v797_v31 = vshll.u32 %v597_v25, 16  ;;  %v1736_v32 = vrot.slane %v1734_v12, 5  ;;  %v7160_v33 = vrot.slane %v1740_v21, 5 }
  0x64   :  { %v1747_v35 = vrot.slane %v1745_v23, 4  ;;  %v785_v39 = vrot.slane %v783_v16, 5  ;;  %v808_v41 = vor.u32 %v807_v28, %v804_v20  ;;  %v1748_v37 = vshll.u32 %v7123_v53, 16  ;;  %6290 = vmatpush3.bf16.msra.mxu1 %v6588_v24  ;;  %v6590_v22 = vld [vmem:[%s8676_s1 + $0xd0] sm:$0xff]   ;;  %v1441_v40 = vld [vmem:[#allocation2 + $0x8] sm:$0xe] }
  0x65   :  { %v1754_v8 = vshll.u32 %v1701_v60, 16  ;;  %v799_v48 = vrot.slane %v797_v31, 5  ;;  %v482_v45 = vld [vmem:[#allocation2 + $0x84] sm:$0x1]  ;;  %v1737_v38 = vor.u32 %v1736_v32, %v1733_v29  ;;  %vm951_vm11 = vcmask 1046532   ;;  %6291 = vmatprep.subr.bf16.mxu1 %v6590_v22  ;;  %v6591_v46 = vld [vmem:[%s8676_s1 + $0x90] sm:$0xff]  }
  0x66   :  { %v1442_v63 = vld [vmem:[#allocation2 + $0xc] sm:$0x1]  ;;  %v1443_v42 = vld [vmem:[#allocation2 + $0x10] sm:$0xe]  ;;  %v786_v43 = vsel %vm6863_vm9, %v781_v4, %v785_v39  ;;  %v483_v44 = vsel %vm6737_vm3, %v349_v36, %v482_v45  ;;  %v600_v47 = vld [vmem:[#allocation2 + $0x88] sm:$0xf] }
  0x67   :  { %v7172_v30 = vrot.slane %v808_v41, 4  ;;  %v1750_v50 = vrot.slane %v1748_v37, 5  ;;  %v1444_v52 = vld [vmem:[#allocation2 + $0x14] sm:$0x1]  ;;  %v1702_v53 = vld [vmem:[#allocation2 + $0x20] sm:$0xf]  ;;  %v800_v5 = vsel %vm6863_vm9, %v795_v27, %v799_v48  ;;  %vm7192_vm12 = vmor %vm950_vm10, %vm951_vm11 }
  0x68   :  { %484 = vst [vmem:[#allocation2 + $0x84] sm:$0x1] %v483_v44  ;;  %v488_v54 = vld [vmem:[#allocation2 + $0x8c] sm:$0x1]  ;;  %v816_v26 = vshrl.u32 %v600_v47, 16  ;;  %v819_v51 = vshll.u32 %v600_v47, 16  ;;  %v5859_v36 = vcombine.low %v786_v43, %v800_v5  ;;  %6292 = vmatpush3.bf16.msra.mxu1 %v6591_v46 }
  0x69   :  { %v1738_v56 = vrot.slane %v1737_v38, 4  ;;  %v489_v57 = vsel %vm6737_vm3, %v357_v62, %v488_v54  ;;  %v1751_v58 = vor.u32 %v1750_v50, %v1747_v35  ;;  %v1756_v59 = vrot.slane %v1754_v8, 5  ;;  %v1703_v3 = vld [vmem:[#allocation2 + $0x24] sm:$0x1]  ;;  %v1704_v14 = vld [vmem:[#allocation2 + $0x28] sm:$0xf] }
  0x6a   :  { %v6593_v4 = vld [vmem:[%s8676_s1 + $0xd8] sm:$0xff]   ;;  %v6563_v61 = vld [vmem:[#allocation2 + $0x88] ss:$8 sps:$4 sm:$0xff]   ;;  %490 = vst [vmem:[#allocation2 + $0x8c] sm:$0x1] %v489_v57  ;;  %v818_v6 = vrot.slane %v816_v26, 4  ;;  %865 = vrot.lane.b32.xlu1 %v5859_v36, %s6702_s9 }
  0x6b   :  { %v821_v49 = vrot.slane %v819_v51, 5  ;;  %v1743_v7 = vsel %vm6863_vm9, %v1738_v56, %v7160_v33  ;;  %v1752_v13 = vrot.slane %v1751_v58, 4  ;;  %v5901_v10 = vrot.slane %v1441_v40, 9  ;;  %v1705_v12 = vld [vmem:[#allocation2 + $0x2c] sm:$0x1]  ;;  %6293 = vmatprep.subr.bf16.mxu1 %v6593_v4  ;;  %1127 = vrot.lane.b32.xlu0 %v6563_v61, %s6702_s9  ;;  %v6594_v23 = vld [vmem:[%s8676_s1 + $0x98] sm:$0xff]  }
  0x6c   :  { %v1507_v60 = vrot.slane %v1442_v63, 5  ;;  %v5902_v11 = vrot.slane %v1443_v42, 9  ;;  %v1511_v17 = vrot.slane %v1444_v52, 5  ;;  %v1759_v18 = vshrl.u32 %v1702_v53, 16  ;;  %v1445_v21 = vld [vmem:[#allocation2 + $0x18] sm:$0xe]  ;;  %6294 = vmatpush3.bf16.msra.mxu1 %v6594_v23 }
  0x6d   :  { %v822_v15 = vor.u32 %v821_v49, %v818_v6  ;;  %v1762_v20 = vshll.u32 %v1702_v53, 16  ;;  %v1757_v24 = vsel %vm6863_vm9, %v1752_v13, %v1756_v59  ;;  %v1768_v25 = vshll.u32 %v1703_v3, 16  ;;  %v1446_v27 = vld [vmem:[#allocation2 + $0x1c] sm:$0x1]  ;;  %v1447_v28 = vld [vmem:[#allocation2 + $0x20] sm:$0xe] }
  0x6e   :  { %v1773_v16 = vshrl.u32 %v1704_v14, 16  ;;  %v5933_v31 = vcombine.low %v1743_v7, %v1757_v24  ;;  %v7204_v32 = vsel %vm7192_vm12, %v5901_v10, %v1507_v60  ;;  %v1761_v33 = vrot.slane %v1759_v18, 4  ;;  %v1448_v35 = vld [vmem:[#allocation2 + $0x24] sm:$0x1]  ;;  %v1706_v39 = vld [vmem:[#allocation2 + $0x30] sm:$0xf] }
  0x6f   :  { %v823_v29 = vrot.slane %v822_v15, 4  ;;  %v599_v41 = vld [vmem:[#allocation2 + $0x84] sm:$0x1]  ;;  %v7208_v37 = vsel %vm7192_vm12, %v5902_v11, %v1511_v17  ;;  %v1764_v8 = vrot.slane %v1762_v20, 5  ;;  %v1770_v22 = vrot.slane %v1768_v25, 5  ;;  %v6601_v24 = vld [vmem:[%s8676_s1 + $0xa8] sm:$0xff]  }
  0x70   :  { %v1775_v48 = vrot.slane %v1773_v16, 4  ;;  %v6596_v45 = vld [vmem:[%s8676_s1 + $0xe0] sm:$0xff]   ;;  %v811_v38 = vshll.u32 %v599_v41, 16  ;;  %1978 = vrot.lane.b32.xlu0 %v5933_v31, %s6702_s9  ;;  %v1776_v40 = vshll.u32 %v1704_v14, 16  ;;  %v1782_v63 = vshll.u32 %v1705_v12, 16 }
  0x71   :  { %v5903_v42 = vrot.slane %v1445_v21, 9  ;;  %v1707_v43 = vld [vmem:[#allocation2 + $0x34] sm:$0x1]  ;;  %v601_v44 = vld [vmem:[#allocation2 + $0x8c] sm:$0x1]  ;;  %v1765_v47 = vor.u32 %v1764_v8, %v1761_v33  ;;  %v1515_v50 = vrot.slane %v1446_v27, 5  ;;  %6295 = vmatprep.subr.bf16.mxu1 %v6596_v45  ;;  %v5917_v51 = vcombine.low %v7204_v32, %v7208_v37 }
  0x72   :  { %v5904_v52 = vrot.slane %v1447_v28, 9  ;;  %v1519_v53 = vrot.slane %v1448_v35, 5  ;;  %v6597_v5 = vld [vmem:[%s8676_s1 + $0xa0] sm:$0xff]   ;;  %v813_v54 = vrot.slane %v811_v38, 5  ;;  %v825_v26 = vshll.u32 %v601_v44, 16  ;;  %v6603_v33 = vld [vmem:[%s8676_s1 + $0xf0] sm:$0xff]  }
  0x73   :  { %v1778_v56 = vrot.slane %v1776_v40, 5  ;;  %v1708_v46 = vld [vmem:[#allocation2 + $0x38] sm:$0xf]  ;;  %v1766_v36 = vrot.slane %v1765_v47, 4  ;;  %v1784_v57 = vrot.slane %v1782_v63, 5  ;;  %v7221_v58 = vsel %vm7192_vm12, %v5903_v42, %v1515_v50  ;;  %6296 = vmatpush3.bf16.msra.mxu1 %v6597_v5 }
  0x74   :  { %v1709_v59 = vld [vmem:[#allocation2 + $0x3c] sm:$0x1]  ;;  %v1787_v3 = vshrl.u32 %v1706_v39, 16  ;;  %v814_v14 = vsel %vm6863_vm9, %v7172_v30, %v813_v54  ;;  %v827_v4 = vrot.slane %v825_v26, 5  ;;  %v7228_v6 = vsel %vm7192_vm12, %v5904_v52, %v1519_v53  ;;  %v1449_v49 = vld [vmem:[#allocation2 + $0x28] sm:$0xe] }
  0x75   :  { %v1779_v61 = vor.u32 %v1778_v56, %v1775_v48  ;;  %v1450_v7 = vld [vmem:[#allocation2 + $0x2c] sm:$0x1]  ;;  %v1771_v13 = vsel %vm6863_vm9, %v1766_v36, %v1770_v22  ;;  %v1790_v60 = vshll.u32 %v1706_v39, 16  ;;  %v1796_v11 = vshll.u32 %v1707_v43, 16  ;;  %v1451_v12 = vld [vmem:[#allocation2 + $0x30] sm:$0xe] }
  0x76   :  { %v1789_v10 = vrot.slane %v1787_v3, 4  ;;  %v1452_v15 = vld [vmem:[#allocation2 + $0x34] sm:$0x1]  ;;  %v6600_v30 = vld [vmem:[%s8676_s1 + $0xe8] sm:$0xff]   ;;  %v828_v17 = vsel %vm6863_vm9, %v823_v29, %v827_v4  ;;  %v1801_v20 = vshrl.u32 %v1708_v46, 16  ;;  %v1804_v21 = vshll.u32 %v1708_v46, 16 }
  0x77   :  { %v1780_v18 = vrot.slane %v1779_v61, 4  ;;  %v63_v23 = vld [vmem:[#allocation2 + $0x48] sm:$0x1]  ;;  %v5860_v25 = vcombine.low %v814_v14, %v828_v17  ;;  %v1792_v16 = vrot.slane %v1790_v60, 5  ;;  %v1798_v27 = vrot.slane %v1796_v11, 5  ;;  %6297 = vmatprep.subr.bf16.mxu1 %v6600_v30  ;;  %v6604_v22 = vld [vmem:[%s8676_s1 + $0xb0] sm:$0xff]  }
  0x78   :  { %v1810_v28 = vshll.u32 %v1709_v59, 16  ;;  %v122_v31 = vld [vmem:[#allocation2 + $0x44] sm:$0x1]  ;;  %v1803_v35 = vrot.slane %v1801_v20, 4  ;;  %v1806_v39 = vrot.slane %v1804_v21, 5  ;;  %v5905_v41 = vrot.slane %v1449_v49, 9  ;;  %6298 = vmatpush3.bf16.msra.mxu1 %v6601_v24 }
  0x79   :  { %v1785_v29 = vsel %vm6863_vm9, %v1780_v18, %v1784_v57  ;;  %v125_v8 = vld [vmem:[#allocation2 + $0x4c] sm:$0x1]  ;;  %867 = vrot.lane.b32.xlu1 %v5860_v25, %s6702_s9  ;;  %v1793_v45 = vor.u32 %v1792_v16, %v1789_v10  ;;  %v1523_v40 = vrot.slane %v1450_v7, 5  ;;  %v1710_v63 = vld [vmem:[#allocation2 + $0x40] sm:$0xf]  ;;  %6299 = vmatprep.subr.bf16.mxu1 %v6603_v33  ;;  %v5906_v43 = vrot.slane %v1451_v12, 9 }
  0x7a   :  { %v5934_v48 = vcombine.low %v1771_v13, %v1785_v29  ;;  %v1812_v38 = vrot.slane %v1810_v28, 5  ;;  %v1807_v42 = vor.u32 %v1806_v39, %v1803_v35  ;;  %v1527_v44 = vrot.slane %v1452_v15, 5  ;;  %v6605_v50 = vld [vmem:[%s8676_s1 + $0xf8] sm:$0xff]   ;;  %v1714_v57 = vld [vmem:[#allocation2 + $0x60] sm:$0xf] }
  0x7b   :  { %v64_v47 = vsel %vm6737_vm3, 0, %v63_v23  ;;  %v1794_v52 = vrot.slane %v1793_v45, 4  ;;  %v1524_v53 = vsel %vm7192_vm12, %v5905_v41, %v1523_v40  ;;  %v123_v5 = vsel %vm6771_vm5, 0, %v122_v31  ;;  %v6606_v59 = vld [vmem:[%s8676_s1 + $0xb8] sm:$0xff]   ;;  %v1715_v61 = vld [vmem:[#allocation2 + $0x64] sm:$0x1] }
  0x7c   :  { %1980 = vrot.lane.b32.xlu0 %v5934_v48, %s6702_s9  ;;  %65 = vst [vmem:[#allocation2 + $0x48] sm:$0x1] %v64_v47  ;;  %v126_v54 = vsel %vm6771_vm5, 0, %v125_v8  ;;  %v1808_v26 = vrot.slane %v1807_v42, 4  ;;  %v1528_v56 = vsel %vm7192_vm12, %v5906_v43, %v1527_v44  ;;  %124 = vst [vmem:[#allocation2 + $0x44] sm:$0x1] %v123_v5  ;;  %6300 = vmatpush3.bf16.msra.mxu1 %v6604_v22 }
  0x7d   :  { %127 = vst [vmem:[#allocation2 + $0x4c] sm:$0x1] %v126_v54  ;;  %v1815_v46 = vshrl.u32 %v1710_v63, 16  ;;  %v1818_v36 = vshll.u32 %v1710_v63, 16  ;;  %1593 = vrot.lane.b32.xlu1 %v5917_v51, %s6702_s9  ;;  %v5918_v3 = vcombine.low %v7221_v58, %v7228_v6  ;;  %v1799_v14 = vsel %vm6863_vm9, %v1794_v52, %v1798_v27  ;;  %v1453_v4 = vld [vmem:[#allocation2 + $0x38] sm:$0xe]  ;;  %6301 = vmatprep.subr.bf16.mxu1 %v6605_v50 }
  0x7e   :  { %v1716_v49 = vld [vmem:[#allocation2 + $0x68] sm:$0xf]  ;;  %v301_v7 = vrot.slane %v6914_v0, 4  ;;  %v1813_v13 = vsel %vm6863_vm9, %v1808_v26, %v1812_v38  ;;  %v5919_v10 = vcombine.low %v1524_v53, %v1528_v56  ;;  %v1454_v11 = vld [vmem:[#allocation2 + $0x3c] sm:$0x1]  ;;  %v1843_v12 = vshrl.u32 %v1714_v57, 16 }
  0x7f   :  { %v1817_v60 = vrot.slane %v1815_v46, 4  ;;  %v1717_v32 = vld [vmem:[#allocation2 + $0x6c] sm:$0x1]  ;;  %v5935_v37 = vcombine.low %v1799_v14, %v1813_v13  ;;  %v1820_v51 = vrot.slane %v1818_v36, 5  ;;  %v1846_v58 = vshll.u32 %v1714_v57, 16 }
  0x80   :  { %v1457_v6 = vld [vmem:[#allocation2 + $0x58] sm:$0xe]  ;;  %v5907_v15 = vrot.slane %v1453_v4, 9  ;;  %v1852_v30 = vshll.u32 %v1715_v61, 16  ;;  %v1857_v17 = vshrl.u32 %v1716_v49, 16  ;;  %v1860_v18 = vshll.u32 %v1716_v49, 16  ;;  %6302 = vmatpush3.bf16.msra.mxu1 %v6606_v59 }
  0x81   :  { %v1458_v20 = vld [vmem:[#allocation2 + $0x5c] sm:$0x1]  ;;  %1595 = vrot.lane.b32.xlu1 %v5918_v3, %s6702_s9  ;;  %1982 = vrot.lane.b32.xlu0 %v5935_v37, %s6702_s9  ;;  %v7279_v0 = vld [vmem:[#allocation2 + $0x40] sm:$0xe]  ;;  %v1531_v21 = vrot.slane %v1454_v11, 5  ;;  %v1845_v23 = vrot.slane %v1843_v12, 4  ;;  %v1821_v8 = vor.u32 %v1820_v51, %v1817_v60 }
  0x82   :  { %v1848_v24 = vrot.slane %v1846_v58, 5  ;;  %v1866_v25 = vshll.u32 %v1717_v32, 16  ;;  %v1459_v16 = vld [vmem:[#allocation2 + $0x60] sm:$0xe]  ;;  %v1460_v27 = vld [vmem:[#allocation2 + $0x64] sm:$0x1] }
  0x83   :  { %v1712_v28 = vld [vmem:[#allocation2 + $0x48] sm:$0xf]  ;;  %v1854_v31 = vrot.slane %v1852_v30, 5  ;;  %v1859_v33 = vrot.slane %v1857_v17, 4  ;;  %v1862_v29 = vrot.slane %v1860_v18, 5  ;;  %v5909_v35 = vrot.slane %v1457_v6, 9 }
  0x84   :  { %v446_v39 = vld [vmem:[#allocation2 + $0x44] sm:$0x1]  ;;  %v1713_v41 = vld [vmem:[#allocation2 + $0x4c] sm:$0x1]  ;;  %v1829_v22 = vshrl.u32 %v1712_v28, 16  ;;  %v1832_v48 = vshll.u32 %v1712_v28, 16  ;;  %v1849_v45 = vor.u32 %v1848_v24, %v1845_v23  ;;  %v1532_v59 = vsel %vm7192_vm12, %v5907_v15, %v1531_v21 }
  0x85   :  { %v447_v38 = vsel %vm6737_vm3, %v301_v7, %v446_v39  ;;  %v1838_v40 = vshll.u32 %v1713_v41, 16  ;;  %v1863_v63 = vor.u32 %v1862_v29, %v1859_v33  ;;  %v1868_v42 = vrot.slane %v1866_v25, 5  ;;  %v1718_v43 = vld [vmem:[#allocation2 + $0x70] sm:$0xf]  ;;  %1597 = vrot.lane.b32.xlu1 %v5919_v10, %s6702_s9  ;;  %v1719_v53 = vld [vmem:[#allocation2 + $0x74] sm:$0x1] }
  0x86   :  { %448 = vst [vmem:[#allocation2 + $0x44] sm:$0x1] %v447_v38  ;;  %v1831_v44 = vrot.slane %v1829_v22, 4  ;;  %v1834_v47 = vrot.slane %v1832_v48, 5  ;;  %v1850_v50 = vrot.slane %v1849_v45, 4  ;;  %v1539_v52 = vrot.slane %v1458_v20, 5 }
  0x87   :  { %v5908_v5 = vrot.slane %v7279_v0, 9  ;;  %v1864_v54 = vrot.slane %v1863_v63, 4  ;;  %v5910_v26 = vrot.slane %v1459_v16, 9  ;;  %v1543_v56 = vrot.slane %v1460_v27, 5  ;;  %v1720_v46 = vld [vmem:[#allocation2 + $0x78] sm:$0xf] }
  0x88   :  { %v1822_v36 = vrot.slane %v1821_v8, 4  ;;  %v1835_v57 = vor.u32 %v1834_v47, %v1831_v44  ;;  %v1721_v3 = vld [vmem:[#allocation2 + $0x7c] sm:$0x1]  ;;  %v1871_v14 = vshrl.u32 %v1718_v43, 16  ;;  %v1461_v4 = vld [vmem:[#allocation2 + $0x68] sm:$0xe]  ;;  %v1855_v49 = vsel %vm6863_vm9, %v1850_v50, %v1854_v31 }
  0x89   :  { %v1840_v61 = vrot.slane %v1838_v40, 5  ;;  %v1874_v7 = vshll.u32 %v1718_v43, 16  ;;  %v1880_v13 = vshll.u32 %v1719_v53, 16  ;;  %v1462_v10 = vld [vmem:[#allocation2 + $0x6c] sm:$0x1]  ;;  %v1869_v11 = vsel %vm6863_vm9, %v1864_v54, %v1868_v42 }
  0x8a   :  { %v1836_v60 = vrot.slane %v1835_v57, 4  ;;  %v7293_v32 = vsel %vm7192_vm12, %v5909_v35, %v1539_v52  ;;  %v1873_v37 = vrot.slane %v1871_v14, 4  ;;  %v1463_v51 = vld [vmem:[#allocation2 + $0x70] sm:$0xe]  ;;  %v7297_v12 = vsel %vm7192_vm12, %v5910_v26, %v1543_v56  ;;  %v1464_v30 = vld [vmem:[#allocation2 + $0x74] sm:$0x1] }
  0x8b   :  { %v1876_v58 = vrot.slane %v1874_v7, 5  ;;  %v1885_v6 = vshrl.u32 %v1720_v46, 16  ;;  %v1888_v15 = vshll.u32 %v1720_v46, 16  ;;  %v7299_v17 = vrot.slane %v1880_v13, 5  ;;  %v1722_v21 = vld [vmem:[#allocation2 + $0x80] sm:$0xf] }
  0x8c   :  { %v1894_v18 = vshll.u32 %v1721_v3, 16  ;;  %v5911_v20 = vrot.slane %v1461_v4, 9  ;;  %v1547_v0 = vrot.slane %v1462_v10, 5  ;;  %v7301_v25 = vcombine.low %v1855_v49, %v1869_v11  ;;  %v1723_v39 = vld [vmem:[#allocation2 + $0x84] sm:$0x1] }
  0x8d   :  { %v1711_v23 = vld [vmem:[#allocation2 + $0x44] sm:$0x1]  ;;  %v1877_v16 = vor.u32 %v1876_v58, %v1873_v37  ;;  %v1887_v27 = vrot.slane %v1885_v6, 4  ;;  %v1890_v28 = vrot.slane %v1888_v15, 5  ;;  %v1841_v33 = vsel %vm6863_vm9, %v1836_v60, %v1840_v61  ;;  %v1724_v41 = vld [vmem:[#allocation2 + $0x88] sm:$0xf] }
  0x8e   :  { %v1456_v24 = vld [vmem:[#allocation2 + $0x44] sm:$0x1]  ;;  %v1824_v31 = vshll.u32 %v1711_v23, 16  ;;  %v1896_v35 = vrot.slane %v1894_v18, 5  ;;  %v5912_v48 = vrot.slane %v1463_v51, 9  ;;  %v1551_v45 = vrot.slane %v1464_v30, 5 }
  0x8f   :  { %v1535_v29 = vrot.slane %v1456_v24, 5  ;;  %v1878_v8 = vrot.slane %v1877_v16, 4  ;;  %v1891_v22 = vor.u32 %v1890_v28, %v1887_v27  ;;  %v1725_v38 = vld [vmem:[#allocation2 + $0x8c] sm:$0x1]  ;;  %v1899_v42 = vshrl.u32 %v1722_v21, 16 }
  0x90   :  { %v1826_v40 = vrot.slane %v1824_v31, 5  ;;  %v1902_v43 = vshll.u32 %v1722_v21, 16  ;;  %v1465_v44 = vld [vmem:[#allocation2 + $0x78] sm:$0xe]  ;;  %v1548_v52 = vsel %vm7192_vm12, %v5911_v20, %v1547_v0  ;;  %v1552_v53 = vsel %vm7192_vm12, %v5912_v48, %v1551_v45  ;;  %v1466_v54 = vld [vmem:[#allocation2 + $0x7c] sm:$0x1] }
  0x91   :  { %v1536_v63 = vsel %vm7192_vm12, %v5908_v5, %v1535_v29  ;;  %v1892_v50 = vrot.slane %v1891_v22, 4  ;;  %v1467_v26 = vld [vmem:[#allocation2 + $0x80] sm:$0xe]  ;;  %v5921_v46 = vcombine.low %v7293_v32, %v7297_v12  ;;  %v1901_v5 = vrot.slane %v1899_v42, 4  ;;  %v1468_v3 = vld [vmem:[#allocation2 + $0x84] sm:$0x1] }
  0x92   :  { %v5920_v47 = vcombine.low %v1532_v59, %v1536_v63  ;;  %v1827_v56 = vsel %vm6863_vm9, %v1822_v36, %v1826_v40  ;;  %v1904_v57 = vrot.slane %v1902_v43, 5  ;;  %v93_v14 = vld [vmem:[#allocation2 + $0x98] sm:$0x1]  ;;  %v152_v59 = vld [vmem:[#allocation2 + $0x94] sm:$0x1]  ;;  %v1883_v61 = vsel %vm6863_vm9, %v1878_v8, %v7299_v17 }
  0x93   :  { %v5936_v4 = vcombine.low %v1827_v56, %v1841_v33  ;;  %v1908_v49 = vshll.u32 %v1723_v39, 16  ;;  %v1913_v7 = vshrl.u32 %v1724_v41, 16  ;;  %v155_v13 = vld [vmem:[#allocation2 + $0x9c] sm:$0x1]  ;;  %v1726_v10 = vld [vmem:[#allocation2 + $0x90] sm:$0xf]  ;;  %v5922_v36 = vcombine.low %v1548_v52, %v1552_v53 }
  0x94   :  { %1599 = vrot.lane.b32.xlu1 %v5920_v47, %s6702_s9  ;;  %v1905_v60 = vor.u32 %v1904_v57, %v1901_v5  ;;  %v1916_v11 = vshll.u32 %v1724_v41, 16  ;;  %v1922_v32 = vshll.u32 %v1725_v38, 16  ;;  %v1897_v37 = vsel %vm6863_vm9, %v1892_v50, %v1896_v35  ;;  %v7322_v6 = vld [vmem:[#allocation2 + $0x88] sm:$0xe]  ;;  %v7324_v20 = vld [vmem:[#allocation2 + $0x8c] sm:$0x1]  ;;  %v1114_v57 = vpop.permute.xlu0 %1113 }
  0x95   :  { %1984 = vrot.lane.b32.xlu0 %v5936_v4, %s6702_s9  ;;  %v1915_v51 = vrot.slane %v1913_v7, 4  ;;  %v5913_v12 = vrot.slane %v1465_v44, 9  ;;  %v1555_v58 = vrot.slane %v1466_v54, 5  ;;  %v1910_v30 = vrot.slane %v1908_v49, 5  ;;  %v7340_v41 = vld [vmem:[#allocation2 + $0x90] sm:$0xe] }
  0x96   :  { %v1906_v15 = vrot.slane %v1905_v60, 4  ;;  %v1918_v17 = vrot.slane %v1916_v11, 5  ;;  %v5914_v18 = vrot.slane %v1467_v26, 9  ;;  %v1924_v0 = vrot.slane %v1922_v32, 5  ;;  %v887_v26 = vld [vmem:[#allocation2 + $0x4] sm:$0x1] }
  0x97   :  { %v1559_v21 = vrot.slane %v1468_v3, 5  ;;  %v94_v23 = vsel %vm6737_vm3, 0, %v93_v14  ;;  %v153_v24 = vsel %vm6771_vm5, 0, %v152_v59  ;;  %v1556_v27 = vsel %vm7192_vm12, %v5913_v12, %v1555_v58  ;;  %v886_v3 = vld [vmem:[#allocation2] sm:$0xe] }
  0x98   :  { %1601 = vrot.lane.b32.xlu1 %v5921_v46, %s6702_s9  ;;  %v1919_v16 = vor.u32 %v1918_v17, %v1915_v51  ;;  %95 = vst [vmem:[#allocation2 + $0x98] sm:$0x1] %v94_v23  ;;  %154 = vst [vmem:[#allocation2 + $0x94] sm:$0x1] %v153_v24  ;;  %v156_v28 = vsel %vm6771_vm5, 0, %v155_v13  ;;  %v1927_v31 = vshrl.u32 %v1726_v10, 16  ;;  %v5938_v29 = vcombine.low %v1883_v61, %v1897_v37  ;;  %v1116_v17 = vpop.permute.xlu1 %1115 }
  0x99   :  { %v365_v33 = vrot.slane %v7130_v55, 4  ;;  %1986 = vrot.lane.b32.xlu0 %v7301_v25, %s6702_s9  ;;  %v1560_v35 = vsel %vm7192_vm12, %v5914_v18, %v1559_v21  ;;  %157 = vst [vmem:[#allocation2 + $0x9c] sm:$0x1] %v156_v28  ;;  %v1930_v39 = vshll.u32 %v1726_v10, 16  ;;  %v1911_v8 = vsel %vm6863_vm9, %v1906_v15, %v1910_v30  ;;  %v889_v46 = vld [vmem:[#allocation2 + $0xc] sm:$0x1] }
  0x9a   :  { %v1920_v22 = vrot.slane %v1919_v16, 4  ;;  %v1929_v19 = vrot.slane %v1927_v31, 4  ;;  %v5915_v48 = vrot.slane %v7322_v6, 9  ;;  %v5923_v55 = vcombine.low %v1556_v27, %v1560_v35  ;;  %v888_v61 = vld [vmem:[#allocation2 + $0x8] sm:$0xe] }
  0x9b   :  { %v1932_v45 = vrot.slane %v1930_v39, 5  ;;  %v1563_v25 = vrot.slane %v7324_v20, 5  ;;  %v5916_v42 = vrot.slane %v7340_v41, 9  ;;  %vm561_vm13 = vcmask 523264   ;;  %v891_v60 = vld [vmem:[#allocation2 + $0x14] sm:$0x1] }
  0x9c   :  { %1603 = vrot.lane.b32.xlu1 %v5922_v36, %s6702_s9  ;;  %v1925_v38 = vsel %vm6863_vm9, %v1920_v22, %v1924_v0  ;;  %vm877_vm14 = vcmask 1048064   ;;  %v955_v5 = vrot.slane %v887_v26, 5  ;;  %v959_v4 = vrot.slane %v889_v46, 5  ;;  %v893_v11 = vld [vmem:[#allocation2 + $0x1c] sm:$0x1]  ;;  %v854_v0 = vpop.permute.xlu0 %853 }
  0x9d   :  { %1988 = vrot.lane.b32.xlu0 %v5938_v29, %s6702_s9  ;;  %v5939_v40 = vcombine.low %v1911_v8, %v1925_v38  ;;  %v1933_v63 = vor.u32 %v1932_v45, %v1929_v19  ;;  %v5861_v49 = vrot.slane %v886_v3, 9  ;;  %v5862_v13 = vrot.slane %v888_v61, 9  ;;  %v890_v32 = vld [vmem:[#allocation2 + $0x10] sm:$0xe]  ;;  %v892_v58 = vld [vmem:[#allocation2 + $0x18] sm:$0xe] }
  0x9e   :  { %v963_v51 = vrot.slane %v891_v60, 5  ;;  %v967_v12 = vrot.slane %v893_v11, 5  ;;  %v5863_v6 = vrot.slane %v890_v32, 9  ;;  %v5864_v18 = vrot.slane %v892_v58, 9  ;;  %v6577_v21 = vld [vmem:[#allocation2] ss:$8 sps:$4 sm:$0xff]  }
  0x9f   :  { %v494_v43 = vld [vmem:[#allocation2 + $0x94] sm:$0x1]  ;;  %v1728_v44 = vld [vmem:[#allocation2 + $0x98] sm:$0xf]  ;;  %v7352_v47 = vrot.slane %v1933_v63, 4  ;;  %v956_v36 = vsel %vm7192_vm12, %v5861_v49, %v955_v5  ;;  %v960_v37 = vsel %vm7192_vm12, %v5862_v13, %v959_v4  ;;  %v1564_v28 = vsel %vm7192_vm12, %v5915_v48, %v1563_v25  ;;  %562 = vst.msk [vmem:[#allocation3] sm:$0xff] %vm561_vm13, %v6577_v21  ;;  %v856_v19 = vpop.permute.xlu1 %855 }
  0xa0   :  { %1605 = vrot.lane.b32.xlu1 %v5923_v55, %s6702_s9  ;;  %v495_v50 = vsel %vm6737_vm3, %v365_v33, %v494_v43  ;;  %v1729_v52 = vld [vmem:[#allocation2 + $0x9c] sm:$0x1]  ;;  %v1941_v53 = vshrl.u32 %v1728_v44, 16  ;;  %v1944_v54 = vshll.u32 %v1728_v44, 16  ;;  %v5877_v30 = vcombine.low %v956_v36, %v960_v37  ;;  %878 = vst.msk [vmem:[#allocation3] sm:$0xff] %vm877_vm14, %v854_v0  ;;  %v6608_v13 = vld [vmem:[%s8676_s1 + $0x110] sm:$0xff]  }
  0xa1   :  { %1990 = vrot.lane.b32.xlu0 %v5939_v40, %s6702_s9  ;;  %496 = vst [vmem:[#allocation2 + $0x94] sm:$0x1] %v495_v50  ;;  %v1950_v56 = vshll.u32 %v1729_v52, 16  ;;  %v964_v20 = vsel %vm7192_vm12, %v5863_v6, %v963_v51  ;;  %v968_v16 = vsel %vm7192_vm12, %v5864_v18, %v967_v12  ;;  %v6579_v29 = vld [vmem:[#allocation2 + $0x10] ss:$8 sps:$4 sm:$0xff]  }
  0xa2   :  { %v1943_v14 = vrot.slane %v1941_v53, 4  ;;  %v1946_v59 = vrot.slane %v1944_v54, 5  ;;  %1049 = vst.msk [vmem:[#allocation3 + $0x8] sm:$0xff] %vm561_vm13, %v5877_v30  ;;  %v5878_v33 = vcombine.low %v964_v20, %v968_v16  ;;  %v894_v8 = vld [vmem:[#allocation2 + $0x20] sm:$0xe]  ;;  %563 = vst.msk [vmem:[#allocation3 + $0x28] sm:$0xff] %vm561_vm13, %v6579_v29 }
  0xa3   :  { %v1952_v7 = vrot.slane %v1950_v56, 5  ;;  %1137 = vst.msk [vmem:[#allocation3 + $0x8] sm:$0xff] %vm877_vm14, %v1114_v57  ;;  %v895_v48 = vld [vmem:[#allocation2 + $0x24] sm:$0x1]  ;;  %v896_v55 = vld [vmem:[#allocation2 + $0x28] sm:$0xe]  ;;  %v1118_v57 = vpop.permute.xlu0 %1117 }
  0xa4   :  { %v1947_v10 = vor.u32 %v1946_v59, %v1943_v14  ;;  %1050 = vst.msk [vmem:[#allocation3 + $0x30] sm:$0xff] %vm561_vm13, %v5878_v33  ;;  %v897_v45 = vld [vmem:[#allocation2 + $0x2c] sm:$0x1]  ;;  %v5865_v38 = vrot.slane %v894_v8, 9  ;;  %v971_v40 = vrot.slane %v895_v48, 5  ;;  %v5866_v63 = vrot.slane %v896_v55, 9 }
  0xa5   :  { %1138 = vst.msk [vmem:[#allocation3 + $0x30] sm:$0xff] %vm877_vm14, %v1116_v17  ;;  %879 = vst.msk [vmem:[#allocation3 + $0x28] sm:$0xff] %vm877_vm14, %v856_v19  ;;  %v975_v43 = vrot.slane %v897_v45, 5  ;;  %v6582_v50 = vld [vmem:[#allocation2 + $0x20] ss:$8 sps:$4 sm:$0xff]   ;;  %v6611_v18 = vld [vmem:[%s8676_s1 + $0x118] sm:$0xff]  }
  0xa6   :  { %v1948_v15 = vrot.slane %v1947_v10, 4  ;;  %v972_v44 = vsel %vm7192_vm12, %v5865_v38, %v971_v40  ;;  %564 = vst.msk [vmem:[#allocation3 + $0x50] sm:$0xff] %vm561_vm13, %v6582_v50  ;;  %v898_v56 = vld [vmem:[#allocation2 + $0x30] sm:$0xe]  ;;  %v899_v46 = vld [vmem:[#allocation2 + $0x34] sm:$0x1] }
  0xa7   :  { %v976_v52 = vsel %vm7192_vm12, %v5866_v63, %v975_v43  ;;  %v900_v5 = vld [vmem:[#allocation2 + $0x38] sm:$0xe]  ;;  %v901_v3 = vld [vmem:[#allocation2 + $0x3c] sm:$0x1]  ;;  %v5867_v14 = vrot.slane %v898_v56, 9  ;;  %v979_v59 = vrot.slane %v899_v46, 5 }
  0xa8   :  { %v1727_v23 = vld [vmem:[#allocation2 + $0x94] sm:$0x1]  ;;  %v1953_v39 = vsel %vm6863_vm9, %v1948_v15, %v1952_v7  ;;  %v5879_v54 = vcombine.low %v972_v44, %v976_v52  ;;  %v858_v26 = vpop.permute.xlu1 %857  ;;  %v5868_v4 = vrot.slane %v900_v5, 9  ;;  %v2178_v61 = vld [vmem:[#allocation3] sm:$0xff]  ;;  %v983_v49 = vrot.slane %v901_v3, 5 }
  0xa9   :  { %v1472_v24 = vld [vmem:[#allocation2 + $0x94] sm:$0x1]  ;;  %v1936_v27 = vshll.u32 %v1727_v23, 16  ;;  %880 = vst.msk [vmem:[#allocation3 + $0x50] sm:$0xff] %vm877_vm14, %v858_v26  ;;  %v980_v10 = vsel %vm7192_vm12, %v5867_v14, %v979_v59  ;;  %v6586_v36 = vld [vmem:[#allocation2 + $0x30] ss:$8 sps:$4 sm:$0xff]  }
  0xaa   :  { %v1567_v31 = vrot.slane %v1472_v24, 5  ;;  %v2179_v53 = vld [vmem:[#allocation3 + $0x8] sm:$0xff]  ;;  %1051 = vst.msk [vmem:[#allocation3 + $0x58] sm:$0xff] %vm561_vm13, %v5879_v54  ;;  %v984_v60 = vsel %vm7192_vm12, %v5868_v4, %v983_v49  ;;  %v902_v11 = vld [vmem:[#allocation2 + $0x50] sm:$0xe]  ;;  %565 = vst.msk [vmem:[#allocation3 + $0x78] sm:$0xff] %vm561_vm13, %v6586_v36 }
  0xab   :  { %v1938_v35 = vrot.slane %v1936_v27, 5  ;;  %2569 = vmatprep.mubr.bf16.mxu0 %v2179_v53  ;;  %1139 = vst.msk [vmem:[#allocation3 + $0x58] sm:$0xff] %vm877_vm14, %v1118_v57  ;;  %v5880_v32 = vcombine.low %v980_v10, %v984_v60  ;;  %v903_v37 = vld [vmem:[#allocation2 + $0x54] sm:$0x1]  ;;  %v904_v51 = vld [vmem:[#allocation2 + $0x58] sm:$0xe] }
  0xac   :  { %v1568_v41 = vsel %vm7192_vm12, %v5916_v42, %v1567_v31  ;;  %2570 = vmatmul.mubr.bf16.vlgmr.msra.gmra.mrb[0].mxu0 %v2178_v61  ;;  %v2184_v7 = vld [vmem:[#allocation3 + $0x30] sm:$0xff]  ;;  %v905_v12 = vld [vmem:[#allocation2 + $0x5c] sm:$0x1]  ;;  %v5869_v58 = vrot.slane %v902_v11, 9  ;;  %v987_v6 = vrot.slane %v903_v37, 5  ;;  %v5870_v15 = vrot.slane %v904_v51, 9 }
  0xad   :  { %v5924_v22 = vcombine.low %v1564_v28, %v1568_v41  ;;  %v1939_v25 = vsel %vm6863_vm9, %v7352_v47, %v1938_v35  ;;  %v6598_v47 = vld [vmem:[%s8676_s1 + $0x108] sm:$0xff]   ;;  %6504 = vmatpush3.bf16.msra.mxu0 %v7147_v9  ;;  %2577 = vmatprep.mubr.bf16.mxu0 %v2184_v7  ;;  %v991_v30 = vrot.slane %v905_v12, 5  ;;  %1052 = vst.msk [vmem:[#allocation3 + $0x80] sm:$0xff] %vm561_vm13, %v5880_v32  ;;  %v6589_v9 = vld [vmem:[#allocation2 + $0x50] ss:$8 sps:$4 sm:$0xff]  }
  0xae   :  { %v5940_v42 = vcombine.low %v1939_v25, %v1953_v39  ;;  %6505 = vmatprep.subr.bf16.mxu0 %v6598_v47  ;;  %v988_v20 = vsel %vm7192_vm12, %v5869_v58, %v987_v6  ;;  %566 = vst.msk [vmem:[#allocation3 + $0xa0] sm:$0xff] %vm561_vm13, %v6589_v9  ;;  %v906_v23 = vld [vmem:[#allocation2 + $0x60] sm:$0xe]  ;;  %v907_v24 = vld [vmem:[#allocation2 + $0x64] sm:$0x1]  ;;  %v2183_v29 = vld [vmem:[#allocation3 + $0x28] sm:$0xff] }
  0xaf   :  { %1607 = vrot.lane.b32.xlu1 %v5924_v22, %s6702_s9  ;;  %v1120_v17 = vpop.permute.xlu0 %1119  ;;  %v992_v0 = vsel %vm7192_vm12, %v5870_v15, %v991_v30  ;;  %v908_v16 = vld [vmem:[#allocation2 + $0x68] sm:$0xe]  ;;  %v909_v27 = vld [vmem:[#allocation2 + $0x6c] sm:$0x1]  ;;  %v5871_v28 = vrot.slane %v906_v23, 9  ;;  %v995_v31 = vrot.slane %v907_v24, 5 }
  0xb0   :  { %1992 = vrot.lane.b32.xlu0 %v5940_v42, %s6702_s9  ;;  %1140 = vst.msk [vmem:[#allocation3 + $0x80] sm:$0xff] %vm877_vm14, %v1120_v17  ;;  %v5881_v21 = vcombine.low %v988_v20, %v992_v0  ;;  %v5872_v33 = vrot.slane %v908_v16, 9  ;;  %v999_v35 = vrot.slane %v909_v27, 5  ;;  %v6592_v8 = vld [vmem:[#allocation2 + $0x60] ss:$8 sps:$4 sm:$0xff]   ;;  %v2188_v14 = vld [vmem:[#allocation3 + $0x50] sm:$0xff] }
  0xb1   :  { %6506 = vmatpush3.bf16.msra.mxu0 %v6598_v47  ;;  %v996_v41 = vsel %vm7192_vm12, %v5871_v28, %v995_v31  ;;  %v910_v48 = vld [vmem:[#allocation2 + $0x70] sm:$0xe]  ;;  %567 = vst.msk [vmem:[#allocation3 + $0xc8] sm:$0xff] %vm561_vm13, %v6592_v8  ;;  %v911_v45 = vld [vmem:[#allocation2 + $0x74] sm:$0x1] }
  0xb2   :  { %6507 = vmatprep.subr.bf16.mxu0 %v6608_v13  ;;  %1053 = vst.msk [vmem:[#allocation3 + $0xa8] sm:$0xff] %vm561_vm13, %v5881_v21  ;;  %v2189_v39 = vld [vmem:[#allocation3 + $0x58] sm:$0xff]  ;;  %v1000_v19 = vsel %vm7192_vm12, %v5872_v33, %v999_v35  ;;  %v5873_v40 = vrot.slane %v910_v48, 9  ;;  %v1003_v63 = vrot.slane %v911_v45, 5  ;;  %v914_v54 = vld [vmem:[#allocation2 + $0x80] sm:$0xe] }
  0xb3   :  { %v5882_v55 = vcombine.low %v996_v41, %v1000_v19  ;;  %v912_v25 = vld [vmem:[#allocation2 + $0x78] sm:$0xe]  ;;  %v913_v38 = vld [vmem:[#allocation2 + $0x7c] sm:$0x1]  ;;  %v915_v26 = vld [vmem:[#allocation2 + $0x84] sm:$0x1] }
  0xb4   :  { %2578 = vmatmul.mubr.bf16.gmra.mrb[4].mxu0 %v2183_v29  ;;  %v5874_v42 = vrot.slane %v912_v25, 9  ;;  %v1007_v43 = vrot.slane %v913_v38, 5  ;;  %v6595_v44 = vld [vmem:[#allocation2 + $0x70] ss:$8 sps:$4 sm:$0xff]   ;;  %v1004_v52 = vsel %vm7192_vm12, %v5873_v40, %v1003_v63  ;;  %v916_v56 = vld [vmem:[#allocation2 + $0x88] sm:$0xe] }
  0xb5   :  { %2585 = vmatprep.mubr.bf16.mxu0 %v2189_v39  ;;  %6508 = vmatpush3.bf16.msra.mxu0 %v6608_v13  ;;  %1054 = vst.msk [vmem:[#allocation3 + $0xd0] sm:$0xff] %vm561_vm13, %v5882_v55  ;;  %568 = vst.msk [vmem:[#allocation3 + $0xf0] sm:$0xff] %vm561_vm13, %v6595_v44  ;;  %v917_v46 = vld [vmem:[#allocation2 + $0x8c] sm:$0x1]  ;;  %v5875_v5 = vrot.slane %v914_v54, 9  ;;  %v1011_v57 = vrot.slane %v915_v26, 5 }
  0xb6   :  { %6509 = vmatprep.subr.bf16.mxu0 %v6611_v18  ;;  %v1008_v53 = vsel %vm7192_vm12, %v5874_v42, %v1007_v43  ;;  %v5876_v3 = vrot.slane %v916_v56, 9  ;;  %v1015_v59 = vrot.slane %v917_v46, 5  ;;  %v6599_v49 = vld [vmem:[#allocation2 + $0x80] ss:$8 sps:$4 sm:$0xff]   ;;  %v6602_v36 = vld [vmem:[#allocation2 + $0x10] ss:$8 sps:$4 sm:$0xff]  }
  0xb7   :  { %v1122_v22 = vpop.permute.xlu0 %1121  ;;  %v5883_v47 = vcombine.low %v1004_v52, %v1008_v53  ;;  %v2194_v4 = vld [vmem:[#allocation3 + $0x80] sm:$0xff]  ;;  %v1012_v61 = vsel %vm7192_vm12, %v5875_v5, %v1011_v57  ;;  %569 = vst.msk [vmem:[#allocation3 + $0x118] sm:$0xff] %vm561_vm13, %v6599_v49  ;;  %v1145_v60 = vld [vmem:[#allocation2 + $0x8] sm:$0xf]  ;;  %v1146_v11 = vld [vmem:[#allocation2 + $0xc] sm:$0x1] }
  0xb8   :  { %1141 = vst.msk [vmem:[#allocation3 + $0xa8] sm:$0xff] %vm877_vm14, %v1122_v22  ;;  %v1016_v7 = vsel %vm7192_vm12, %v5876_v3, %v1015_v59  ;;  %v1147_v32 = vld [vmem:[#allocation2 + $0x10] sm:$0xf]  ;;  %v1148_v37 = vld [vmem:[#allocation2 + $0x14] sm:$0x1]  ;;  %v1178_v51 = vshrl.u32 %v1145_v60, 16 }
  0xb9   :  { %6510 = vmatpush3.bf16.msra.mxu0 %v6611_v18  ;;  %1055 = vst.msk [vmem:[#allocation3 + $0xf8] sm:$0xff] %vm561_vm13, %v5883_v47  ;;  %v5884_v13 = vcombine.low %v1012_v61, %v1016_v7  ;;  %v1181_v12 = vshll.u32 %v1145_v60, 16  ;;  %1690 = vst.msk [vmem:[#allocation3 + $0x18] sm:$0xff] %vm561_vm13, %v6602_v36  ;;  %v1187_v58 = vshll.u32 %v1146_v11, 16  ;;  %v1192_v6 = vshrl.u32 %v1147_v32, 16 }
  0xba   :  { %v1195_v15 = vshll.u32 %v1147_v32, 16  ;;  %v1201_v30 = vshll.u32 %v1148_v37, 16  ;;  %v1180_v9 = vrot.slane %v1178_v51, 4  ;;  %v6607_v31 = vld [vmem:[#allocation2 + $0x20] ss:$8 sps:$4 sm:$0xff]  }
  0xbb   :  { %1056 = vst.msk [vmem:[#allocation3 + $0x120] sm:$0xff] %vm561_vm13, %v5884_v13  ;;  %v1183_v18 = vrot.slane %v1181_v12, 5  ;;  %v1189_v20 = vrot.slane %v1187_v58, 5  ;;  %v1194_v0 = vrot.slane %v1192_v6, 4  ;;  %v1149_v35 = vld [vmem:[#allocation2 + $0x18] sm:$0xf] }
  0xbc   :  { %2586 = vmatmul.mubr.bf16.gmra.mrb[8].mxu0 %v2188_v14  ;;  %v1197_v21 = vrot.slane %v1195_v15, 5  ;;  %v1203_v24 = vrot.slane %v1201_v30, 5  ;;  %v1150_v39 = vld [vmem:[#allocation2 + $0x1c] sm:$0x1]  ;;  %1691 = vst.msk [vmem:[#allocation3 + $0x40] sm:$0xff] %vm561_vm13, %v6607_v31  ;;  %v1206_v48 = vshrl.u32 %v1149_v35, 16 }
  0xbd   :  { %2593 = vmatprep.mubr.bf16.mxu0 %v2194_v4  ;;  %v1184_v23 = vor.u32 %v1183_v18, %v1180_v9  ;;  %v1151_v22 = vld [vmem:[#allocation2 + $0x20] sm:$0xf]  ;;  %v1152_v19 = vld [vmem:[#allocation2 + $0x24] sm:$0x1]  ;;  %v1209_v55 = vshll.u32 %v1149_v35, 16  ;;  %v1215_v38 = vshll.u32 %v1150_v39, 16 }
  0xbe   :  { %v860_v50 = vpop.permute.xlu1 %859  ;;  %v1198_v27 = vor.u32 %v1197_v21, %v1194_v0  ;;  %v1220_v40 = vshrl.u32 %v1151_v22, 16  ;;  %v1223_v63 = vshll.u32 %v1151_v22, 16  ;;  %v1208_v43 = vrot.slane %v1206_v48, 4  ;;  %v6609_v5 = vld [vmem:[#allocation2 + $0x30] ss:$8 sps:$4 sm:$0xff]  }
  0xbf   :  { %881 = vst.msk [vmem:[#allocation3 + $0x78] sm:$0xff] %vm877_vm14, %v860_v50  ;;  %v1185_v28 = vrot.slane %v1184_v23, 4  ;;  %v2199_v33 = vld [vmem:[#allocation3 + $0xa8] sm:$0xff]  ;;  %v1211_v44 = vrot.slane %v1209_v55, 5  ;;  %v1229_v50 = vshll.u32 %v1152_v19, 16  ;;  %v1217_v56 = vrot.slane %v1215_v38, 5 }
  0xc0   :  { %v1199_v29 = vrot.slane %v1198_v27, 4  ;;  %v1222_v53 = vrot.slane %v1220_v40, 4  ;;  %v1225_v47 = vrot.slane %v1223_v63, 5  ;;  %v1153_v3 = vld [vmem:[#allocation2 + $0x28] sm:$0xf]  ;;  %1692 = vst.msk [vmem:[#allocation3 + $0x68] sm:$0xff] %vm561_vm13, %v6609_v5 }
  0xc1   :  { %v1190_v8 = vsel %vm6863_vm9, %v1185_v28, %v1189_v20  ;;  %v1212_v26 = vor.u32 %v1211_v44, %v1208_v43  ;;  %v1231_v46 = vrot.slane %v1229_v50, 5  ;;  %v1154_v14 = vld [vmem:[#allocation2 + $0x2c] sm:$0x1]  ;;  %v1155_v59 = vld [vmem:[#allocation2 + $0x30] sm:$0xf]  ;;  %v1234_v49 = vshrl.u32 %v1153_v3, 16 }
  0xc2   :  { %v1204_v25 = vsel %vm6863_vm9, %v1199_v29, %v1203_v24  ;;  %v1226_v57 = vor.u32 %v1225_v47, %v1222_v53  ;;  %v1156_v61 = vld [vmem:[#allocation2 + $0x34] sm:$0x1]  ;;  %v1237_v7 = vshll.u32 %v1153_v3, 16  ;;  %v1243_v13 = vshll.u32 %v1154_v14, 16  ;;  %v6610_v9 = vld [vmem:[#allocation2 + $0x40] ss:$8 sps:$4 sm:$0xff]  }
  0xc3   :  { %v5893_v42 = vcombine.low %v1190_v8, %v1204_v25  ;;  %v1213_v4 = vrot.slane %v1212_v26, 4  ;;  %v1248_v36 = vshrl.u32 %v1155_v59, 16  ;;  %v1251_v60 = vshll.u32 %v1155_v59, 16  ;;  %v1157_v0 = vld [vmem:[#allocation2 + $0x38] sm:$0xf]  ;;  %1693 = vst.msk [vmem:[#allocation3 + $0x90] sm:$0xff] %vm561_vm13, %v6610_v9 }
  0xc4   :  { %v1257_v11 = vshll.u32 %v1156_v61, 16  ;;  %v1236_v37 = vrot.slane %v1234_v49, 4  ;;  %v1239_v51 = vrot.slane %v1237_v7, 5  ;;  %v1245_v12 = vrot.slane %v1243_v13, 5  ;;  %v1158_v21 = vld [vmem:[#allocation2 + $0x3c] sm:$0x1] }
  0xc5   :  { %v1124_v10 = vpop.permute.xlu0 %1123  ;;  %1433 = vst.msk [vmem:[#allocation3 + $0x10] sm:$0xff] %vm561_vm13, %v5893_v42  ;;  %v1218_v32 = vsel %vm6863_vm9, %v1213_v4, %v1217_v56  ;;  %v1250_v6 = vrot.slane %v1248_v36, 4  ;;  %v1253_v15 = vrot.slane %v1251_v60, 5  ;;  %v1159_v23 = vld [vmem:[#allocation2 + $0x40] sm:$0xf]  ;;  %v1262_v28 = vshrl.u32 %v1157_v0, 16 }
  0xc6   :  { %1142 = vst.msk [vmem:[#allocation3 + $0xd0] sm:$0xff] %vm877_vm14, %v1124_v10  ;;  %v2193_v16 = vld [vmem:[#allocation3 + $0x78] sm:$0xff]  ;;  %v1227_v10 = vrot.slane %v1226_v57, 4  ;;  %v1259_v30 = vrot.slane %v1257_v11, 5  ;;  %v1240_v20 = vor.u32 %v1239_v51, %v1236_v37  ;;  %v1160_v27 = vld [vmem:[#allocation2 + $0x44] sm:$0x1] }
  0xc7   :  { %2594 = vmatmul.mubr.bf16.gmra.mrb[12].mxu0 %v2193_v16  ;;  %v1254_v16 = vor.u32 %v1253_v15, %v1250_v6  ;;  %v1265_v31 = vshll.u32 %v1157_v0, 16  ;;  %v1279_v8 = vshll.u32 %v1159_v23, 16  ;;  %v1285_v22 = vshll.u32 %v1160_v27, 16  ;;  %v6612_v44 = vld [vmem:[#allocation2 + $0x60] ss:$8 sps:$4 sm:$0xff]  }
  0xc8   :  { %2601 = vmatprep.mubr.bf16.mxu0 %v2199_v33  ;;  %v1232_v58 = vsel %vm6863_vm9, %v1227_v10, %v1231_v46  ;;  %v1271_v33 = vshll.u32 %v1158_v21, 16  ;;  %v1241_v39 = vrot.slane %v1240_v20, 4  ;;  %v1264_v48 = vrot.slane %v1262_v28, 4  ;;  %v1161_v50 = vld [vmem:[#allocation2 + $0x58] sm:$0xf]  ;;  %1694 = vst.msk [vmem:[#allocation3 + $0xb8] sm:$0xff] %vm561_vm13, %v6612_v44 }
  0xc9   :  { %v862_v17 = vpop.permute.xlu1 %861  ;;  %v5894_v18 = vcombine.low %v1218_v32, %v1232_v58  ;;  %v1255_v19 = vrot.slane %v1254_v16, 4  ;;  %v1267_v55 = vrot.slane %v1265_v31, 5  ;;  %v1281_v40 = vrot.slane %v1279_v8, 5  ;;  %v1163_v26 = vld [vmem:[#allocation2 + $0x60] sm:$0xf] }
  0xca   :  { %882 = vst.msk [vmem:[#allocation3 + $0xa0] sm:$0xff] %vm877_vm14, %v862_v17  ;;  %v1246_v25 = vsel %vm6863_vm9, %v1241_v39, %v1245_v12  ;;  %v1287_v63 = vrot.slane %v1285_v22, 5  ;;  %v1164_v56 = vld [vmem:[#allocation2 + $0x64] sm:$0x1]  ;;  %v1290_v5 = vshrl.u32 %v1161_v50, 16  ;;  %v1293_v57 = vshll.u32 %v1161_v50, 16 }
  0xcb   :  { %1434 = vst.msk [vmem:[#allocation3 + $0x38] sm:$0xff] %vm561_vm13, %v5894_v18  ;;  %v1260_v42 = vsel %vm6863_vm9, %v1255_v19, %v1259_v30  ;;  %v1268_v43 = vor.u32 %v1267_v55, %v1264_v48  ;;  %v1304_v59 = vshrl.u32 %v1163_v26, 16  ;;  %v1307_v4 = vshll.u32 %v1163_v26, 16  ;;  %v6613_v60 = vld [vmem:[#allocation2 + $0x70] ss:$8 sps:$4 sm:$0xff]  }
  0xcc   :  { %v5895_v53 = vcombine.low %v1246_v25, %v1260_v42  ;;  %v1313_v61 = vshll.u32 %v1164_v56, 16  ;;  %v1292_v13 = vrot.slane %v1290_v5, 4  ;;  %v1295_v10 = vrot.slane %v1293_v57, 5  ;;  %v1165_v58 = vld [vmem:[#allocation2 + $0x68] sm:$0xf]  ;;  %1695 = vst.msk [vmem:[#allocation3 + $0xe0] sm:$0xff] %vm561_vm13, %v6613_v60 }
  0xcd   :  { %v2204_v54 = vld [vmem:[#allocation3 + $0xd0] sm:$0xff]  ;;  %v1269_v46 = vrot.slane %v1268_v43, 4  ;;  %v1306_v32 = vrot.slane %v1304_v59, 4  ;;  %v1309_v37 = vrot.slane %v1307_v4, 5  ;;  %v1166_v30 = vld [vmem:[#allocation2 + $0x6c] sm:$0x1] }
  0xce   :  { %1435 = vst.msk [vmem:[#allocation3 + $0x60] sm:$0xff] %vm561_vm13, %v5895_v53  ;;  %v1315_v51 = vrot.slane %v1313_v61, 5  ;;  %v1296_v15 = vor.u32 %v1295_v10, %v1292_v13  ;;  %v1168_v9 = vld [vmem:[#allocation2 + $0x74] sm:$0x1]  ;;  %v1318_v20 = vshrl.u32 %v1165_v58, 16  ;;  %v1321_v0 = vshll.u32 %v1165_v58, 16 }
  0xcf   :  { %v1310_v18 = vor.u32 %v1309_v37, %v1306_v32  ;;  %v1327_v21 = vshll.u32 %v1166_v30, 16  ;;  %v1341_v28 = vshll.u32 %v1168_v9, 16  ;;  %v2011_v31 = vld [vmem:[#allocation2 + $0x14] sm:$0x1]  ;;  %v2014_v43 = vld [vmem:[#allocation2 + $0x20] sm:$0xe] }
  0xd0   :  { %v1126_v41 = vpop.permute.xlu0 %1125  ;;  %v1323_v39 = vrot.slane %v1321_v0, 5  ;;  %v2076_v42 = vrot.slane %v2011_v31, 5  ;;  %v2016_v26 = vld [vmem:[#allocation2 + $0x28] sm:$0xe]  ;;  %v2017_v5 = vld [vmem:[#allocation2 + $0x2c] sm:$0x1] }
  0xd1   :  { %v864_v45 = vpop.permute.xlu1 %863  ;;  %1143 = vst.msk [vmem:[#allocation3 + $0xf8] sm:$0xff] %vm877_vm14, %v1126_v41  ;;  %v2198_v52 = vld [vmem:[#allocation3 + $0xa0] sm:$0xff]  ;;  %v1276_v41 = vshrl.u32 %v1159_v23, 16  ;;  %v2010_v23 = vld [vmem:[#allocation2 + $0x10] sm:$0xe]  ;;  %v1343_v55 = vrot.slane %v1341_v28, 5 }
  0xd2   :  { %883 = vst.msk [vmem:[#allocation3 + $0xc8] sm:$0xff] %vm877_vm14, %v864_v45  ;;  %2602 = vmatmul.mubr.bf16.gmra.mrb[16].mxu0 %v2198_v52  ;;  %v1273_v45 = vrot.slane %v1271_v33, 5  ;;  %v5943_v57 = vrot.slane %v2014_v43, 9  ;;  %v5944_v61 = vrot.slane %v2016_v26, 9  ;;  %v1169_v60 = vld [vmem:[#allocation2 + $0x78] sm:$0xf] }
  0xd3   :  { %2609 = vmatprep.mubr.bf16.mxu0 %v2204_v54  ;;  %v1278_v38 = vrot.slane %v1276_v41, 4  ;;  %v1162_v54 = vld [vmem:[#allocation2 + $0x5c] sm:$0x1]  ;;  %v1329_v41 = vrot.slane %v1327_v21, 5  ;;  %v1349_v30 = vshll.u32 %v1169_v60, 16 }
  0xd4   :  { %v1299_v3 = vshll.u32 %v1162_v54, 16  ;;  %v1274_v49 = vsel %vm6863_vm9, %v1269_v46, %v1273_v45  ;;  %v2012_v45 = vld [vmem:[#allocation2 + $0x18] sm:$0xe]  ;;  %v2015_v54 = vld [vmem:[#allocation2 + $0x24] sm:$0x1] }
  0xd5   :  { %v1282_v47 = vor.u32 %v1281_v40, %v1278_v38  ;;  %v2013_v40 = vld [vmem:[#allocation2 + $0x1c] sm:$0x1]  ;;  %v5942_v53 = vrot.slane %v2012_v45, 9  ;;  %v2019_v9 = vld [vmem:[#allocation2 + $0x34] sm:$0x1]  ;;  %v1351_v28 = vrot.slane %v1349_v30, 5 }
  0xd6   :  { %v1301_v36 = vrot.slane %v1299_v3, 5  ;;  %v2084_v3 = vrot.slane %v2015_v54, 5  ;;  %v1170_v37 = vld [vmem:[#allocation2 + $0x7c] sm:$0x1]  ;;  %v2020_v31 = vld [vmem:[#allocation2 + $0x38] sm:$0xe] }
  0xd7   :  { %v1283_v14 = vrot.slane %v1282_v47, 4  ;;  %v2080_v47 = vrot.slane %v2013_v40, 5  ;;  %v1355_v21 = vshll.u32 %v1170_v37, 16  ;;  %v2022_v45 = vld [vmem:[#allocation2 + $0x40] sm:$0xe] }
  0xd8   :  { %v2209_v29 = vld [vmem:[#allocation3 + $0xf8] sm:$0xff]  ;;  %v2085_v10 = vsel %vm7192_vm12, %v5943_v57, %v2084_v3  ;;  %v2024_v43 = vld [vmem:[#allocation2 + $0x48] sm:$0xe]  ;;  %v1174_v37 = vld [vmem:[#allocation2 + $0x8c] sm:$0x1] }
  0xd9   :  { %v2203_v17 = vld [vmem:[#allocation3 + $0xc8] sm:$0xff]  ;;  %v1288_v11 = vsel %vm6863_vm9, %v1283_v14, %v1287_v63  ;;  %v5941_v63 = vrot.slane %v2010_v23, 9  ;;  %v2081_v4 = vsel %vm7192_vm12, %v5942_v53, %v2080_v47  ;;  %v5947_v53 = vrot.slane %v2022_v45, 9 }
  0xda   :  { %2610 = vmatmul.mubr.bf16.gmra.mrb[20].mxu0 %v2203_v17  ;;  %v5896_v6 = vcombine.low %v1274_v49, %v1288_v11  ;;  %v1167_v17 = vld [vmem:[#allocation2 + $0x70] sm:$0xf]  ;;  %v2088_v49 = vrot.slane %v2017_v5, 5 }
  0xdb   :  { %2617 = vmatprep.mubr.bf16.mxu0 %v2209_v29  ;;  %v1332_v16 = vshrl.u32 %v1167_v17, 16  ;;  %v1335_v27 = vshll.u32 %v1167_v17, 16  ;;  %v1311_v29 = vrot.slane %v1310_v18, 4  ;;  %v2077_v46 = vsel %vm7192_vm12, %v5941_v63, %v2076_v42  ;;  %v2018_v17 = vld [vmem:[#allocation2 + $0x30] sm:$0xe] }
  0xdc   :  { %v866_v24 = vpop.permute.xlu1 %865  ;;  %1436 = vst.msk [vmem:[#allocation3 + $0x88] sm:$0xff] %vm561_vm13, %v5896_v6  ;;  %v5957_v13 = vcombine.low %v2077_v46, %v2081_v4  ;;  %v2089_v32 = vsel %vm7192_vm12, %v5944_v61, %v2088_v49  ;;  %v2023_v42 = vld [vmem:[#allocation2 + $0x44] sm:$0x1]  ;;  %v5948_v46 = vrot.slane %v2024_v43, 9  ;;  %v1173_v4 = vld [vmem:[#allocation2 + $0x88] sm:$0xf] }
  0xdd   :  { %884 = vst.msk [vmem:[#allocation3 + $0xf0] sm:$0xff] %vm877_vm14, %v866_v24  ;;  %v1128_v35 = vpop.permute.xlu0 %1127  ;;  %v1297_v24 = vrot.slane %v1296_v15, 4  ;;  %v1334_v19 = vrot.slane %v1332_v16, 4  ;;  %v1337_v48 = vrot.slane %v1335_v27, 5  ;;  %v1316_v25 = vsel %vm6863_vm9, %v1311_v29, %v1315_v51  ;;  %v1171_v51 = vld [vmem:[#allocation2 + $0x80] sm:$0xf] }
  0xde   :  { %1144 = vst.msk [vmem:[#allocation3 + $0x120] sm:$0xff] %vm877_vm14, %v1128_v35  ;;  %v1320_v35 = vrot.slane %v1318_v20, 4  ;;  %v5958_v6 = vcombine.low %v2085_v10, %v2089_v32  ;;  %v1346_v15 = vshrl.u32 %v1169_v60, 16  ;;  %v1360_v23 = vshrl.u32 %v1171_v51, 16 }
  0xdf   :  { %v1302_v22 = vsel %vm6863_vm9, %v1297_v24, %v1301_v36  ;;  %v6614_v36 = vld [vmem:[#allocation2 + $0x80] ss:$8 sps:$4 sm:$0xff]   ;;  %2170 = vst.msk [vmem:[#allocation3 + $0x20] sm:$0xff] %vm561_vm13, %v5957_v13  ;;  %v1363_v24 = vshll.u32 %v1171_v51, 16  ;;  %v1357_v29 = vrot.slane %v1355_v21, 5  ;;  %v2100_v47 = vrot.slane %v2023_v42, 5 }
  0xe0   :  { %v1324_v38 = vor.u32 %v1323_v39, %v1320_v35  ;;  %v5897_v50 = vcombine.low %v1302_v22, %v1316_v25  ;;  %1696 = vst.msk [vmem:[#allocation3 + $0x108] sm:$0xff] %vm561_vm13, %v6614_v36  ;;  %2171 = vst.msk [vmem:[#allocation3 + $0x48] sm:$0xff] %vm561_vm13, %v5958_v6  ;;  %v1348_v27 = vrot.slane %v1346_v15, 4  ;;  %v1362_v35 = vrot.slane %v1360_v23, 4  ;;  %v1175_v51 = vld [vmem:[#allocation2 + $0x90] sm:$0xf] }
  0xe1   :  { %v1365_v39 = vrot.slane %v1363_v24, 5  ;;  %v1374_v10 = vshrl.u32 %v1173_v4, 16  ;;  %v1377_v36 = vshll.u32 %v1173_v4, 16  ;;  %v1383_v15 = vshll.u32 %v1174_v37, 16 }
  0xe2   :  { %v1979_v52 = vpop.permute.xlu0 %1978  ;;  %v1325_v56 = vrot.slane %v1324_v38, 4  ;;  %1437 = vst.msk [vmem:[#allocation3 + $0xb0] sm:$0xff] %vm561_vm13, %v5897_v50  ;;  %v1352_v22 = vor.u32 %v1351_v28, %v1348_v27  ;;  %v1388_v30 = vshrl.u32 %v1175_v51, 16 }
  0xe3   :  { %2002 = vst.msk [vmem:[#allocation3 + $0x18] sm:$0xff] %vm877_vm14, %v1979_v52  ;;  %v1338_v52 = vor.u32 %v1337_v48, %v1334_v19  ;;  %v5945_v19 = vrot.slane %v2018_v17, 9  ;;  %v2092_v48 = vrot.slane %v2019_v9, 5  ;;  %v1366_v40 = vor.u32 %v1365_v39, %v1362_v35  ;;  %v2026_v17 = vld [vmem:[#allocation2 + $0x60] sm:$0xe] }
  0xe4   :  { %v2208_v7 = vld [vmem:[#allocation3 + $0xf0] sm:$0xff]  ;;  %v1379_v6 = vrot.slane %v1377_v36, 5  ;;  %v1391_v9 = vshll.u32 %v1175_v51, 16  ;;  %v1385_v23 = vrot.slane %v1383_v15, 5  ;;  %v1390_v24 = vrot.slane %v1388_v30, 4 }
  0xe5   :  { %v2214_v12 = vld [vmem:[#allocation3 + $0x120] sm:$0xff]  ;;  %2618 = vmatmul.mubr.bf16.gmra.mrb[24].mxu0 %v2208_v7  ;;  %v1339_v59 = vrot.slane %v1338_v52, 4  ;;  %v1330_v7 = vsel %vm6863_vm9, %v1325_v56, %v1329_v41  ;;  %v2093_v50 = vsel %vm7192_vm12, %v5945_v19, %v2092_v48  ;;  %v2025_v52 = vld [vmem:[#allocation2 + $0x4c] sm:$0x1]  ;;  %v1367_v26 = vrot.slane %v1366_v40, 4 }
  0xe6   :  { %2625 = vmatprep.mubr.bf16.mxu0 %v2214_v12  ;;  %v1172_v12 = vld [vmem:[#allocation2 + $0x84] sm:$0x1]  ;;  %v2104_v5 = vrot.slane %v2025_v52, 5  ;;  %v5949_v27 = vrot.slane %v2026_v17, 9  ;;  %v1393_v28 = vrot.slane %v1391_v9, 5 }
  0xe7   :  { %v1344_v11 = vsel %vm6863_vm9, %v1339_v59, %v1343_v55  ;;  %v1369_v16 = vshll.u32 %v1172_v12, 16  ;;  %v5946_v55 = vrot.slane %v2020_v31, 9  ;;  %v2182_v54 = vld [vmem:[#allocation3 + $0x20] sm:$0xff]  ;;  %v6615_v59 = vld [vmem:[#allocation2 + $0x90] ss:$8 sps:$4 sm:$0xff]   ;;  %v2187_v49 = vld [vmem:[#allocation3 + $0x48] sm:$0xff] }
  0xe8   :  { %v5898_v58 = vcombine.low %v1330_v7, %v1344_v11  ;;  %v2105_v13 = vsel %vm7192_vm12, %v5948_v46, %v2104_v5  ;;  %1697 = vst.msk [vmem:[#allocation3 + $0x130] sm:$0xff] %vm561_vm13, %v6615_v59  ;;  %v1176_v12 = vld [vmem:[#allocation2 + $0x94] sm:$0x1]  ;;  %v2030_v35 = vld [vmem:[#allocation2 + $0x70] sm:$0xe]  ;;  %v1394_v19 = vor.u32 %v1393_v28, %v1390_v24 }
  0xe9   :  { %v1371_v41 = vrot.slane %v1369_v16, 5  ;;  %v2029_v16 = vld [vmem:[#allocation2 + $0x6c] sm:$0x1]  ;;  %v5951_v45 = vrot.slane %v2030_v35, 9  ;;  %v2035_v52 = vld [vmem:[#allocation2 + $0x84] sm:$0x1] }
  0xea   :  { %v2181_v33 = vld [vmem:[#allocation3 + $0x18] sm:$0xff]  ;;  %1438 = vst.msk [vmem:[#allocation3 + $0xd8] sm:$0xff] %vm561_vm13, %v5898_v58  ;;  %v1376_v58 = vrot.slane %v1374_v10, 4  ;;  %v2037_v46 = vld [vmem:[#allocation2 + $0x8c] sm:$0x1] }
  0xeb   :  { %v868_v8 = vpop.permute.xlu1 %867  ;;  %2666 = vmatprep.mubr.bf16.mxu1 %v2181_v33  ;;  %v2021_v33 = vld [vmem:[#allocation2 + $0x3c] sm:$0x1]  ;;  %v1372_v7 = vsel %vm6863_vm9, %v1367_v26, %v1371_v41  ;;  %v2112_v41 = vrot.slane %v2029_v16, 5  ;;  %v2128_v4 = vrot.slane %v2037_v46, 5  ;;  %v2039_v10 = vld [vmem:[#allocation2 + $0x94] sm:$0x1] }
  0xec   :  { %885 = vst.msk [vmem:[#allocation3 + $0x118] sm:$0xff] %vm877_vm14, %v868_v8  ;;  %v2096_v63 = vrot.slane %v2021_v33, 5  ;;  %v1380_v21 = vor.u32 %v1379_v6, %v1376_v58  ;;  %v2040_v36 = vld [vmem:[#allocation2 + $0x98] sm:$0xe]  ;;  %v2132_v6 = vrot.slane %v2039_v10, 5 }
  0xed   :  { %v5956_v15 = vrot.slane %v2040_v36, 9 }
  0xee   :  { %v1981_v44 = vpop.permute.xlu0 %1980  ;;  %v2097_v56 = vsel %vm7192_vm12, %v5946_v55, %v2096_v63  ;;  %v1381_v39 = vrot.slane %v1380_v21, 4  ;;  %v2033_v55 = vld [vmem:[#allocation2 + $0x7c] sm:$0x1] }
  0xef   :  { %2003 = vst.msk [vmem:[#allocation3 + $0x40] sm:$0xff] %vm877_vm14, %v1981_v44  ;;  %v1594_v14 = vpop.permute.xlu1 %1593  ;;  %v1353_v44 = vrot.slane %v1352_v22, 4  ;;  %v5959_v3 = vcombine.low %v2093_v50, %v2097_v56  ;;  %v2032_v22 = vld [vmem:[#allocation2 + $0x78] sm:$0xe]  ;;  %v2120_v50 = vrot.slane %v2033_v55, 5 }
  0xf0   :  { %1617 = vst.msk [vmem:[#allocation3 + $0x10] sm:$0xff] %vm877_vm14, %v1594_v14  ;;  %v2101_v14 = vsel %vm7192_vm12, %v5947_v53, %v2100_v47  ;;  %v1386_v42 = vsel %vm6863_vm9, %v1381_v39, %v1385_v23  ;;  %v1395_v47 = vrot.slane %v1394_v19, 4  ;;  %v2036_v56 = vld [vmem:[#allocation2 + $0x88] sm:$0xe] }
  0xf1   :  { %v1358_v57 = vsel %vm6863_vm9, %v1353_v44, %v1357_v29  ;;  %2172 = vst.msk [vmem:[#allocation3 + $0x70] sm:$0xff] %vm561_vm13, %v5959_v3  ;;  %v5960_v32 = vcombine.low %v2101_v14, %v2105_v13  ;;  %v5952_v44 = vrot.slane %v2032_v22, 9  ;;  %v2124_v14 = vrot.slane %v2035_v52, 5 }
  0xf2   :  { %v5899_v11 = vcombine.low %v1358_v57, %v1372_v7  ;;  %v5954_v59 = vrot.slane %v2036_v56, 9 }
  0xf3   :  { %v1596_v18 = vpop.permute.xlu1 %1595  ;;  %v1983_v20 = vpop.permute.xlu0 %1982  ;;  %v2213_v0 = vld [vmem:[#allocation3 + $0x118] sm:$0xff]  ;;  %2173 = vst.msk [vmem:[#allocation3 + $0x98] sm:$0xff] %vm561_vm13, %v5960_v32  ;;  %v2121_v3 = vsel %vm7192_vm12, %v5952_v44, %v2120_v50 }
  0xf4   :  { %1618 = vst.msk [vmem:[#allocation3 + $0x38] sm:$0xff] %vm877_vm14, %v1596_v18  ;;  %2004 = vst.msk [vmem:[#allocation3 + $0x68] sm:$0xff] %vm877_vm14, %v1983_v20  ;;  %2626 = vmatmul.mubr.bf16.gmra.mrb[28].mxu0 %v2213_v0  ;;  %v1397_v18 = vshll.u32 %v1176_v12, 16  ;;  %v2027_v20 = vld [vmem:[#allocation2 + $0x64] sm:$0x1]  ;;  %v2129_v37 = vsel %vm7192_vm12, %v5954_v59, %v2128_v4 }
  0xf5   :  { %6511 = vmatprep.mubr.msk.bf16.mxu0 %vm561_vm13, %v2182_v54  ;;  %1439 = vst.msk [vmem:[#allocation3 + $0x100] sm:$0xff] %vm561_vm13, %v5899_v11  ;;  %v2028_v0 = vld [vmem:[#allocation2 + $0x68] sm:$0xe]  ;;  %v2108_v33 = vrot.slane %v2027_v20, 5 }
  0xf6   :  { %v2186_v8 = vld [vmem:[#allocation3 + $0x40] sm:$0xff]  ;;  %v1399_v31 = vrot.slane %v1397_v18, 5  ;;  %v5950_v29 = vrot.slane %v2028_v0, 9 }
  0xf7   :  { %v2180_v25 = vld [vmem:[#allocation3 + $0x10] sm:$0xff]  ;;  %v1598_v38 = vpop.permute.xlu1 %1597  ;;  %v2109_v48 = vsel %vm7192_vm12, %v5949_v27, %v2108_v33 }
  0xf8   :  { %2667 = vmatmul.mubr.bf16.vlgmr.msra.gmra.mrb[0].mxu1 %v2180_v25  ;;  %1619 = vst.msk [vmem:[#allocation3 + $0x60] sm:$0xff] %vm877_vm14, %v1598_v38  ;;  %v2034_v38 = vld [vmem:[#allocation2 + $0x80] sm:$0xe]  ;;  %v2192_v63 = vld [vmem:[#allocation3 + $0x70] sm:$0xff]  ;;  %v2113_v43 = vsel %vm7192_vm12, %v5950_v29, %v2112_v41  ;;  %v1400_v7 = vsel %vm6863_vm9, %v1395_v47, %v1399_v31 }
  0xf9   :  { %2674 = vmatprep.mubr.bf16.mxu1 %v2186_v8  ;;  %v2031_v8 = vld [vmem:[#allocation2 + $0x74] sm:$0x1]  ;;  %v5961_v54 = vcombine.low %v2109_v48, %v2113_v43  ;;  %v5953_v5 = vrot.slane %v2034_v38, 9  ;;  %v5900_v11 = vcombine.low %v1386_v42, %v1400_v7 }
  0xfa   :  { %v2116_v25 = vrot.slane %v2031_v8, 5  ;;  %v2197_v57 = vld [vmem:[#allocation3 + $0x98] sm:$0xff] }
  0xfb   :  { %v2185_v61 = vld [vmem:[#allocation3 + $0x38] sm:$0xff]  ;;  %v2191_v60 = vld [vmem:[#allocation3 + $0x68] sm:$0xff]  ;;  %2174 = vst.msk [vmem:[#allocation3 + $0xc0] sm:$0xff] %vm561_vm13, %v5961_v54  ;;  %v2125_v32 = vsel %vm7192_vm12, %v5953_v5, %v2124_v14  ;;  %1440 = vst.msk [vmem:[#allocation3 + $0x128] sm:$0xff] %vm561_vm13, %v5900_v11 }
  0xfc   :  { %6512 = vmatmul.mubr.msk.bf16.vlgmr.msra.gmra.mrb[32].mxu0 %vm561_vm13, %v2187_v49  ;;  %v2117_v26 = vsel %vm7192_vm12, %v5951_v45, %v2116_v25  ;;  %v5963_v58 = vcombine.low %v2125_v32, %v2129_v37 }
  0xfd   :  { %6515 = vmatprep.mubr.msk.bf16.mxu0 %vm561_vm13, %v2192_v63  ;;  %v5962_v13 = vcombine.low %v2117_v26, %v2121_v3 }
  0xfe   :  { %2176 = vst.msk [vmem:[#allocation3 + $0x110] sm:$0xff] %vm561_vm13, %v5963_v58 }
  0xff   :  { %v2190_v40 = vld [vmem:[#allocation3 + $0x60] sm:$0xff]  ;;  %2175 = vst.msk [vmem:[#allocation3 + $0xe8] sm:$0xff] %vm561_vm13, %v5962_v13 }
 0x100   :  { %2675 = vmatmul.mubr.bf16.gmra.mrb[4].mxu1 %v2185_v61  ;;  %v2038_v61 = vld [vmem:[#allocation2 + $0x90] sm:$0xe] }
 0x101   :  { %2682 = vmatprep.mubr.bf16.mxu1 %v2191_v60  ;;  %v2041_v60 = vld [vmem:[#allocation2 + $0x9c] sm:$0x1]  ;;  %v5955_v51 = vrot.slane %v2038_v61, 9 }
 0x102   :  { %v2136_v30 = vrot.slane %v2041_v60, 5  ;;  %v2202_v23 = vld [vmem:[#allocation3 + $0xc0] sm:$0xff] }
 0x103   :  { %v2133_v9 = vsel %vm7192_vm12, %v5955_v51, %v2132_v6 }
 0x104   :  { %6516 = vmatmul.mubr.msk.bf16.gmra.mrb[36].mxu0 %vm561_vm13, %v2197_v57  ;;  %v2137_v18 = vsel %vm7192_vm12, %v5956_v15, %v2136_v30 }
 0x105   :  { %v5964_v20 = vcombine.low %v2133_v9, %v2137_v18  ;;  %6519 = vmatprep.mubr.msk.bf16.mxu0 %vm561_vm13, %v2202_v23  ;;  %v2212_v31 = vld [vmem:[#allocation3 + $0x110] sm:$0xff] }
 0x106   :  { %v1600_v53 = vpop.permute.xlu1 %1599  ;;  %v2207_v27 = vld [vmem:[#allocation3 + $0xe8] sm:$0xff] }
 0x107   :  { %1620 = vst.msk [vmem:[#allocation3 + $0x88] sm:$0xff] %vm877_vm14, %v1600_v53  ;;  %v1985_v49 = vpop.permute.xlu0 %1984 }
 0x108   :  { %2005 = vst.msk [vmem:[#allocation3 + $0x90] sm:$0xff] %vm877_vm14, %v1985_v49  ;;  %2683 = vmatmul.mubr.bf16.gmra.mrb[8].mxu1 %v2190_v40 }
 0x109   :  { %2177 = vst.msk [vmem:[#allocation3 + $0x138] sm:$0xff] %vm561_vm13, %v5964_v20 }
 0x10a   :  { %v1602_v12 = vpop.permute.xlu1 %1601 }
 0x10b   :  { %1621 = vst.msk [vmem:[#allocation3 + $0xb0] sm:$0xff] %vm877_vm14, %v1602_v12  ;;  %v1987_v17 = vpop.permute.xlu0 %1986 }
 0x10c   :  { %2006 = vst.msk [vmem:[#allocation3 + $0xb8] sm:$0xff] %vm877_vm14, %v1987_v17  ;;  %6520 = vmatmul.mubr.msk.bf16.gmra.mrb[40].mxu0 %vm561_vm13, %v2207_v27 }
 0x10d   :  { %6523 = vmatprep.mubr.msk.bf16.mxu0 %vm561_vm13, %v2212_v31 }
 0x10e   :  { %v2195_v0 = vld [vmem:[#allocation3 + $0x88] sm:$0xff]  ;;  %v1604_v21 = vpop.permute.xlu1 %1603 }
 0x10f   :  { %1622 = vst.msk [vmem:[#allocation3 + $0xd8] sm:$0xff] %vm877_vm14, %v1604_v21  ;;  %v2196_v24 = vld [vmem:[#allocation3 + $0x90] sm:$0xff]  ;;  %v1989_v16 = vpop.permute.xlu0 %1988 }
 0x110   :  { %2690 = vmatprep.mubr.bf16.mxu1 %v2196_v24  ;;  %2007 = vst.msk [vmem:[#allocation3 + $0xe0] sm:$0xff] %vm877_vm14, %v1989_v16  ;;  %v2217_v39 = vld [vmem:[#allocation3 + $0x138] sm:$0xff] }
 0x111   :  { %2691 = vmatmul.mubr.bf16.gmra.mrb[12].mxu1 %v2195_v0 }
 0x112   :  { %v1606_v28 = vpop.permute.xlu1 %1605  ;;  %v2200_v35 = vld [vmem:[#allocation3 + $0xb0] sm:$0xff] }
 0x113   :  { %1623 = vst.msk [vmem:[#allocation3 + $0x100] sm:$0xff] %vm877_vm14, %v1606_v28  ;;  %v2201_v33 = vld [vmem:[#allocation3 + $0xb8] sm:$0xff]  ;;  %v1991_v29 = vpop.permute.xlu0 %1990 }
 0x114   :  { %2698 = vmatprep.mubr.bf16.mxu1 %v2201_v33  ;;  %2008 = vst.msk [vmem:[#allocation3 + $0x108] sm:$0xff] %vm877_vm14, %v1991_v29  ;;  %6524 = vmatmul.mubr.msk.bf16.gmra.mrb[44].mxu0 %vm561_vm13, %v2217_v39 }
 0x116   :  { %v2205_v8 = vld [vmem:[#allocation3 + $0xd8] sm:$0xff] }
 0x117   :  { %v2206_v41 = vld [vmem:[#allocation3 + $0xe0] sm:$0xff] }
 0x119   :  { %2699 = vmatmul.mubr.bf16.gmra.mrb[16].mxu1 %v2200_v35 }
 0x11a   :  { %2706 = vmatprep.mubr.bf16.mxu1 %v2206_v41  ;;  %v2210_v55 = vld [vmem:[#allocation3 + $0x100] sm:$0xff] }
 0x11b   :  { %v2211_v22 = vld [vmem:[#allocation3 + $0x108] sm:$0xff] }
 0x121   :  { %v1608_v19 = vpop.permute.xlu1 %1607  ;;  %2707 = vmatmul.mubr.bf16.gmra.mrb[20].mxu1 %v2205_v8 }
 0x122   :  { %1624 = vst.msk [vmem:[#allocation3 + $0x128] sm:$0xff] %vm877_vm14, %v1608_v19  ;;  %v1993_v48 = vpop.permute.xlu0 %1992  ;;  %2714 = vmatprep.mubr.bf16.mxu1 %v2211_v22 }
 0x123   :  { %2009 = vst.msk [vmem:[#allocation3 + $0x130] sm:$0xff] %vm877_vm14, %v1993_v48 }
 0x124   :  { %10 = vsyncpa [#allocation5], 0  ;;  %v3236_v23 = vld [vmem:[#allocation2] sm:$0xf]  ;;  %v3252_v27 = vld [vmem:[#allocation2 + $0x50] sm:$0xf] }
 0x125   :  { %v3269_v24 = vshrl.u32 %v3236_v23, 16  ;;  %v3272_v16 = vshll.u32 %v3236_v23, 16  ;;  %v4370_v28 = vld [vmem:[#allocation2 + $0x48] sm:$0xf]  ;;  %v3381_v29 = vshrl.u32 %v3252_v27, 16  ;;  %v3384_v35 = vshll.u32 %v3252_v27, 16 }
 0x126   :  { %v3237_v41 = vld [vmem:[#allocation2 + $0x4] sm:$0x1]  ;;  %v4487_v22 = vshrl.u32 %v4370_v28, 16  ;;  %v4490_v19 = vshll.u32 %v4370_v28, 16  ;;  %v6657_v1 = vld [vmem:[%s8678_s3 + $0xa8] sm:$0xff]   ;;  %vm5535_vm15 = vcmask 1041409  }
 0x127   :  { %v3271_v31 = vrot.slane %v3269_v24, 4  ;;  %v3274_v33 = vrot.slane %v3272_v16, 5  ;;  %vm5538_vm0 = vcmask 1042434   ;;  %vm5541_vm1 = vcmask 1043459  }
 0x128   :  { %vm5547_vm2 = vcmask 1045509   ;;  %vm5550_vm4 = vcmask 1046534   ;;  %vm5553_vm5 = vcmask 1047559  }
 0x129   :  { %2715 = vmatmul.mubr.bf16.gmra.mrb[24].mxu1 %v2210_v55  ;;  %v2215_v25 = vld [vmem:[#allocation3 + $0x128] sm:$0xff] }
 0x12a   :  { %v2216_v45 = vld [vmem:[#allocation3 + $0x130] sm:$0xff] }
 0x12b   :  { %2722 = vmatprep.mubr.bf16.mxu1 %v2216_v45  ;;  %v7587_v45 = vld [vmem:[%s8677_s2] ss:$0 sm:$0xff] }
 0x131   :  { %2723 = vmatmul.mubr.bf16.gmra.mrb[28].mxu1 %v2215_v25 }
 0x17f   :  { %v6239_v38 = vpop.f32.mrb[0].mxu0 }
 0x180   :  { %v6240_v40 = vpop.f32.mrb[1].mxu0 }
 0x181   :  { %v7554_v63 = vadd.f32 %v6240_v40, %v6239_v38  ;;  %v6242_v42 = vpop.f32.mrb[2].mxu0  ;;  %v3275_v38 = vor.u32 %v3274_v33, %v3271_v31  ;;  %v3278_v40 = vshll.u32 %v3237_v41, 16 }
 0x182   :  { %v6243_v43 = vpop.f32.mrb[3].mxu0 }
 0x183   :  { %v7556_v44 = vadd.f32 %v6243_v43, %v6242_v42  ;;  %v3383_v42 = vrot.slane %v3381_v29, 4  ;;  %v3386_v43 = vrot.slane %v3384_v35, 5 }
 0x187   :  { %v6245_v50 = vpop.f32.mrb[4].mxu0 }
 0x188   :  { %v6246_v52 = vpop.f32.mrb[5].mxu0 }
 0x189   :  { %v7558_v53 = vadd.f32 %v6246_v52, %v6245_v50  ;;  %v6248_v47 = vpop.f32.mrb[6].mxu0 }
 0x18a   :  { %v6249_v54 = vpop.f32.mrb[7].mxu0 }
 0x18b   :  { %v7560_v26 = vadd.f32 %v6249_v54, %v6248_v47  ;;  %v3253_v47 = vld [vmem:[#allocation2 + $0x54] sm:$0x1]  ;;  %v2580_v23 = vadd.f32 %v7558_v53, %v7587_v45 }
 0x18d   :  { %v2583_v28 = vadd.f32 %v7560_v26, %v7587_v45 }
 0x18f   :  { %v6251_v56 = vpop.f32.mrb[8].mxu0 }
 0x190   :  { %v6252_v46 = vpop.f32.mrb[9].mxu0 }
 0x191   :  { %v7562_v5 = vadd.f32 %v6252_v46, %v6251_v56  ;;  %v6254_v57 = vpop.f32.mrb[10].mxu0  ;;  %v4489_v56 = vrot.slane %v4487_v22, 4  ;;  %v4492_v46 = vrot.slane %v4490_v19, 5 }
 0x192   :  { %v6255_v3 = vpop.f32.mrb[11].mxu0 }
 0x193   :  { %v7564_v14 = vadd.f32 %v6255_v3, %v6254_v57  ;;  %v2572_v57 = vadd.f32 %v7554_v63, %v7587_v45  ;;  %v7613_v31 = vadd.f32 %v7562_v5, %v7587_v45 }
 0x195   :  { %v7617_v35 = vadd.f32 %v7564_v14, %v7587_v45  ;;  %v7633_v14 = vld [vmem:[#allocation2 + $0x4] sm:$0x1] }
 0x19a   :  { %v6257_v59 = vpop.f32.mrb[12].mxu0 }
 0x19b   :  { %v6258_v4 = vpop.f32.mrb[13].mxu0 }
 0x19c   :  { %v7566_v61 = vadd.f32 %v6258_v4, %v6257_v59  ;;  %v6260_v49 = vpop.f32.mrb[14].mxu0  ;;  %v4371_v4 = vld [vmem:[#allocation2 + $0x4c] sm:$0x1] }
 0x19d   :  { %v6261_v7 = vpop.f32.mrb[15].mxu0 }
 0x19e   :  { %v7568_v13 = vadd.f32 %v6261_v7, %v6260_v49  ;;  %v7593_v7 = vrot.slane %v3275_v38, 4  ;;  %v7631_v38 = vld [vmem:[#allocation2] sm:$0xe] }
 0x1a0   :  { %v7629_v26 = vadd.f32 %v7568_v13, %v7587_v45 }
 0x1a5   :  { %v6263_v10 = vpop.f32.mrb[16].mxu0 }
 0x1a6   :  { %v6264_v36 = vpop.f32.mrb[17].mxu0 }
 0x1a7   :  { %v7570_v60 = vadd.f32 %v6264_v36, %v6263_v10  ;;  %v6266_v11 = vpop.f32.mrb[18].mxu0  ;;  %v7595_v10 = vrot.slane %v3278_v40, 5  ;;  %v3387_v36 = vor.u32 %v3386_v43, %v3383_v42 }
 0x1a8   :  { %v6267_v32 = vpop.f32.mrb[19].mxu0 }
 0x1a9   :  { %v7572_v37 = vadd.f32 %v6267_v32, %v6266_v11  ;;  %v3390_v11 = vshll.u32 %v3253_v47, 16  ;;  %v2575_v32 = vadd.f32 %v7556_v44, %v7587_v45  ;;  %v3281_v16 = vsel %vm6863_vm9, %v7593_v7, %v7595_v10  ;;  %v6642_v7 = vld [vmem:[%s8678_s3 + $0x78] sm:$0xff]   ;;  %v6646_v10 = vld [vmem:[%s8678_s3 + $0x90] sm:$0xff]  }
 0x1aa   :  { %v7605_v27 = vrot.slane %v3387_v36, 4 }
 0x1ab   :  { %v7607_v44 = vrot.slane %v3390_v11, 5  ;;  %v7641_v40 = vadd.f32 %v7572_v37, %v7587_v45  ;;  %v3068_v37 = vld [vmem:[#allocation2 + $0x8] sm:$0xf]  ;;  %v4386_v11 = vld [vmem:[#allocation2 + $0x98] sm:$0xf] }
 0x1ad   :  { %v6269_v51 = vpop.f32.mrb[20].mxu0  ;;  %v3393_v43 = vsel %vm6863_vm9, %v7605_v27, %v7607_v44 }
 0x1ae   :  { %v6270_v12 = vpop.f32.mrb[21].mxu0 }
 0x1af   :  { %v7574_v58 = vadd.f32 %v6270_v12, %v6269_v51  ;;  %v6272_v6 = vpop.f32.mrb[22].mxu0 }
 0x1b0   :  { %v6273_v15 = vpop.f32.mrb[23].mxu0 }
 0x1b1   :  { %v7576_v30 = vadd.f32 %v6273_v15, %v6272_v6  ;;  %v7645_v13 = vadd.f32 %v7574_v58, %v7587_v45  ;;  %v3614_v58 = vrot.slane %v7633_v14, 5 }
 0x1b3   :  { %v7653_v47 = vadd.f32 %v7576_v30, %v7587_v45 }
 0x1b8   :  { %v6275_v17 = vpop.f32.mrb[24].mxu0 }
 0x1b9   :  { %v6276_v9 = vpop.f32.mrb[25].mxu0 }
 0x1ba   :  { %v7578_v18 = vadd.f32 %v6276_v9, %v6275_v17  ;;  %v6278_v20 = vpop.f32.mrb[26].mxu0  ;;  %v4493_v17 = vor.u32 %v4492_v46, %v4489_v56  ;;  %v4496_v9 = vshll.u32 %v4371_v4, 16  ;;  %v3071_v46 = vld [vmem:[#allocation2 + $0xc] sm:$0x1] }
 0x1bb   :  { %v6279_v0 = vpop.f32.mrb[27].mxu0 }
 0x1bc   :  { %v7580_v21 = vadd.f32 %v6279_v0, %v6278_v20  ;;  %v7625_v22 = vrot.slane %v4496_v9, 5  ;;  %v4602_v9 = vshll.u32 %v4386_v11, 16 }
 0x1c7   :  { %v6281_v39 = vpop.f32.mrb[28].mxu0 }
 0x1c8   :  { %v6282_v8 = vpop.f32.mrb[29].mxu0 }
 0x1c9   :  { %v7582_v48 = vadd.f32 %v6282_v8, %v6281_v39  ;;  %v6284_v55 = vpop.f32.mrb[30].mxu0  ;;  %v7621_v39 = vadd.f32 %v7566_v61, %v7587_v45  ;;  %v7623_v8 = vrot.slane %v4493_v17, 4  ;;  %v7637_v61 = vadd.f32 %v7570_v60, %v7587_v45 }
 0x1ca   :  { %v6285_v25 = vpop.f32.mrb[31].mxu0  ;;  %v4599_v17 = vshrl.u32 %v4386_v11, 16 }
 0x1cb   :  { %v6303_v50 = vpop.f32.mrb[0].mxu1  ;;  %v7589_v52 = vadd.f32 %v6285_v25, %v6284_v55  ;;  %v4499_v30 = vsel %vm6863_vm9, %v7623_v8, %v7625_v22 }
 0x1cc   :  { %v6304_v54 = vpop.f32.mrb[1].mxu1 }
 0x1cd   :  { %v6305_v3 = vadd.f32 %v6304_v54, %v6303_v50  ;;  %v6306_v59 = vpop.f32.mrb[2].mxu1 }
 0x1ce   :  { %v6307_v49 = vpop.f32.mrb[3].mxu1 }
 0x1cf   :  { %v6308_v51 = vadd.f32 %v6307_v49, %v6306_v59  ;;  %v6513_v12 = vpop.f32.mrb[32].mxu0  ;;  %v2669_v6 = vadd.f32 %v6305_v3, %v2572_v57  ;;  %v6042_v3 = vrot.slane %v7631_v38, 9  ;;  %v6640_v38 = vld [vmem:[%s8678_s3 + $0xc8] sm:$0xff]  }
 0x1d0   :  { %v2765_v15 = vpop.f32.mrb[33].mxu0 }
 0x1d1   :  { %v2766_v63 = vadd.f32 %v2765_v15, %v2669_v6  ;;  %v6514_v20 = vpop.f32.mrb[34].mxu0  ;;  %v2672_v0 = vadd.f32 %v6308_v51, %v2575_v32  ;;  %v4387_v32 = vld [vmem:[#allocation2 + $0x9c] sm:$0x1] }
 0x1d2   :  { %v2768_v24 = vpop.f32.mrb[35].mxu0 }
 0x1d3   :  { %v6309_v33 = vpop.f32.mrb[4].mxu1  ;;  %v2828_v29 = vmax.f32 %v2766_v63, 0.0  ;;  %v2769_v53 = vadd.f32 %v2768_v24, %v2672_v0 }
 0x1d4   :  { %v6310_v41 = vpop.f32.mrb[5].mxu1 }
 0x1d5   :  { %v6311_v5 = vadd.f32 %v6310_v41, %v6309_v33  ;;  %v6312_v19 = vpop.f32.mrb[6].mxu1  ;;  %v6207_v55 = vpack.c.bf16 %v2828_v29, %v2828_v29  ;;  %v2829_v25 = vmax.f32 %v2769_v53, 0.0 }
 0x1d6   :  { %v6313_v42 = vpop.f32.mrb[7].mxu1 }
 0x1d7   :  { %v6314_v50 = vadd.f32 %v6313_v42, %v6312_v19  ;;  %v2677_v60 = vadd.f32 %v6311_v5, %v2580_v23  ;;  %v2909_v54 = vshrl.u32 %v6207_v55, 16  ;;  %v2912_v56 = vshll.u32 %v6207_v55, 16  ;;  %v7657_v36 = vpop.f32.mrb[36].mxu0 }
 0x1d8   :  { %v6208_v57 = vpack.c.bf16 %v2829_v25, %v2829_v25  ;;  %v2781_v15 = vpop.f32.mrb[37].mxu0  ;;  %v4601_v5 = vrot.slane %v4599_v17, 4  ;;  %v4604_v19 = vrot.slane %v4602_v9, 5  ;;  %v4608_v55 = vshll.u32 %v4387_v32, 16 }
 0x1d9   :  { %v2774_v59 = vadd.f32 %v6513_v12, %v2677_v60  ;;  %v2911_v4 = vrot.slane %v2909_v54, 7  ;;  %v2680_v49 = vadd.f32 %v6314_v50, %v2583_v28  ;;  %v3074_v28 = vld [vmem:[#allocation2 + $0x10] sm:$0xf]  ;;  %v7663_v33 = vpop.f32.mrb[38].mxu0 }
 0x1da   :  { %v2917_v51 = vshrl.u32 %v6208_v57, 16  ;;  %v2920_v6 = vshll.u32 %v6208_v57, 16  ;;  %v2784_v41 = vpop.f32.mrb[39].mxu0  ;;  %v6625_v57 = vld [vmem:[%s8678_s3] sm:$0xff]   ;;  %v4605_v32 = vor.u32 %v4604_v19, %v4601_v5 }
 0x1db   :  { %v6315_v63 = vpop.f32.mrb[8].mxu1  ;;  %v2830_v0 = vmax.f32 %v2774_v59, 0.0  ;;  %v2914_v23 = vor.u32 %v2912_v56, %v2911_v4  ;;  %v2915_v12 = vrot.slane %v2911_v4, 4  ;;  %v2777_v24 = vadd.f32 %v6514_v20, %v2680_v49  ;;  %v3077_v56 = vld [vmem:[#allocation2 + $0x14] sm:$0x1]  ;;  %v6624_v20 = vld [vmem:[%s8678_s3 + $0x40] sm:$0xff]  }
 0x1dc   :  { %v6316_v29 = vpop.f32.mrb[9].mxu1  ;;  %v2919_v53 = vrot.slane %v2917_v51, 7  ;;  %v7680_v51 = vadd.f32 %v7578_v18, %v7587_v45  ;;  %6363 = vmatprep.subr.bf16.mxu1 %v6624_v20  ;;  %v6627_v18 = vld [vmem:[%s8678_s3 + $0x8] sm:$0xff]   ;;  %v7698_v19 = vrot.slane %v4605_v32, 4  ;;  %v6630_v32 = vld [vmem:[%s8678_s3 + $0x58] sm:$0xff]  }
 0x1dd   :  { %v6317_v25 = vadd.f32 %v6316_v29, %v6315_v63  ;;  %v6318_v42 = vpop.f32.mrb[10].mxu1  ;;  %v6209_v50 = vpack.c.bf16 %v2830_v0, %v2830_v0  ;;  %v3069_v60 = vsel %vm6784_vm6, %v2914_v23, %v3068_v37  ;;  %v3072_v54 = vsel %vm6737_vm3, %v2915_v12, %v3071_v46  ;;  %v6626_v37 = vld [vmem:[%s8678_s3 + $0x48] sm:$0xff]   ;;  %6364 = vmatpush3.bf16.msra.mxu1 %v6625_v57  ;;  %v3083_v29 = vld [vmem:[#allocation2 + $0x1c] sm:$0x1] }
 0x1de   :  { %v6319_v59 = vpop.f32.mrb[11].mxu1  ;;  %3073 = vst [vmem:[#allocation2 + $0xc] sm:$0x1] %v3072_v54  ;;  %3070 = vst [vmem:[#allocation2 + $0x8] sm:$0xf] %v3069_v60  ;;  %v2831_v4 = vmax.f32 %v2777_v24, 0.0  ;;  %v2922_v49 = vor.u32 %v2920_v6, %v2919_v53  ;;  %v7685_v63 = vadd.f32 %v7580_v21, %v7587_v45  ;;  %6365 = vmatprep.subr.bf16.mxu1 %v6626_v37 }
 0x1df   :  { %v2923_v11 = vrot.slane %v2919_v53, 4  ;;  %v6320_v46 = vadd.f32 %v6319_v59, %v6318_v42  ;;  %v2925_v17 = vshrl.u32 %v6209_v50, 16  ;;  %v2685_v9 = vadd.f32 %v6317_v25, %v7613_v31  ;;  %v3080_v6 = vld [vmem:[#allocation2 + $0x18] sm:$0xf]  ;;  %v6638_v42 = vld [vmem:[%s8678_s3 + $0xc0] sm:$0xff]   ;;  %v7716_v59 = vpop.f32.mrb[40].mxu0 }
 0x1e0   :  { %v6210_v0 = vpack.c.bf16 %v2831_v4, %v2831_v4  ;;  %v3075_v23 = vsel %vm6784_vm6, %v2922_v49, %v3074_v28  ;;  %v2928_v31 = vshll.u32 %v6209_v50, 16  ;;  %v6628_v28 = vld [vmem:[%s8678_s3 + $0x50] sm:$0xff]   ;;  %v7700_v25 = vrot.slane %v4608_v55, 5  ;;  %v3086_v54 = vld [vmem:[#allocation2 + $0x20] sm:$0xf]  ;;  %6427 = vmatprep.subr.bf16.mxu0 %v6638_v42 }
 0x1e1   :  { %v3078_v12 = vsel %vm6737_vm3, %v2923_v11, %v3077_v56  ;;  %v2927_v24 = vrot.slane %v2925_v17, 7  ;;  %3076 = vst [vmem:[#allocation2 + $0x10] sm:$0xf] %v3075_v23  ;;  %v2782_v21 = vadd.f32 %v2781_v15, %v2685_v9  ;;  %v2688_v53 = vadd.f32 %v6320_v46, %v7617_v35  ;;  %v6639_v15 = vld [vmem:[%s8678_s3 + $0x80] sm:$0xff]   ;;  %v7729_v11 = vpop.f32.mrb[41].mxu0  ;;  %6366 = vmatpush3.bf16.msra.mxu1 %v6627_v18 }
 0x1e2   :  { %3079 = vst [vmem:[#allocation2 + $0x14] sm:$0x1] %v3078_v12  ;;  %v2933_v5 = vshrl.u32 %v6210_v0, 16  ;;  %v7711_v35 = vsel %vm7192_vm12, %v6042_v3, %v3614_v58  ;;  %v3089_v56 = vld [vmem:[#allocation2 + $0x24] sm:$0x1]  ;;  %v7723_v3 = vadd.f32 %v7582_v48, %v7587_v45  ;;  %v7727_v58 = vadd.f32 %v7589_v52, %v7587_v45  ;;  %v7741_v17 = vpop.f32.mrb[42].mxu0  ;;  %6367 = vmatprep.subr.bf16.mxu1 %v6628_v28 }
 0x1e3   :  { %v2930_v60 = vor.u32 %v2928_v31, %v2927_v24  ;;  %v2931_v55 = vrot.slane %v2927_v24, 4  ;;  %v2832_v20 = vmax.f32 %v2782_v21, 0.0  ;;  %v2785_v57 = vadd.f32 %v2784_v41, %v2688_v53  ;;  %v6629_v41 = vld [vmem:[%s8678_s3 + $0x10] sm:$0xff]   ;;  %v7743_v24 = vpop.f32.mrb[43].mxu0  ;;  %6428 = vmatpush3.bf16.msra.mxu0 %v6639_v15 }
 0x1e4   :  { %v6321_v50 = vpop.f32.mrb[12].mxu1  ;;  %v2935_v4 = vrot.slane %v2933_v5, 7  ;;  %v2936_v49 = vshll.u32 %v6210_v0, 16  ;;  %v6631_v5 = vld [vmem:[%s8678_s3 + $0x18] sm:$0xff]   ;;  %6429 = vmatprep.subr.bf16.mxu0 %v6640_v38 }
 0x1e5   :  { %v6322_v14 = vpop.f32.mrb[13].mxu1  ;;  %v3081_v45 = vsel %vm6784_vm6, %v2930_v60, %v3080_v6  ;;  %v3084_v52 = vsel %vm6737_vm3, %v2931_v55, %v3083_v29  ;;  %v6211_v46 = vpack.c.bf16 %v2832_v20, %v2832_v20  ;;  %v3238_v9 = vld [vmem:[#allocation2 + $0x8] sm:$0xf]  ;;  %v2833_v18 = vmax.f32 %v2785_v57, 0.0  ;;  %v3239_v28 = vld [vmem:[#allocation2 + $0xc] sm:$0x1]  ;;  %6368 = vmatpush3.bf16.msra.mxu1 %v6629_v41 }
 0x1e6   :  { %v6323_v48 = vadd.f32 %v6322_v14, %v6321_v50  ;;  %v6324_v37 = vpop.f32.mrb[14].mxu1  ;;  %3085 = vst [vmem:[#allocation2 + $0x1c] sm:$0x1] %v3084_v52  ;;  %3082 = vst [vmem:[#allocation2 + $0x18] sm:$0xf] %v3081_v45  ;;  %v2938_v23 = vor.u32 %v2936_v49, %v2935_v4  ;;  %v2939_v12 = vrot.slane %v2935_v4, 4  ;;  %v4611_v6 = vsel %vm6863_vm9, %v7698_v19, %v7700_v25 }
 0x1e7   :  { %v6325_v0 = vpop.f32.mrb[15].mxu1  ;;  %v2941_v21 = vshrl.u32 %v6211_v46, 16  ;;  %v2944_v53 = vshll.u32 %v6211_v46, 16  ;;  %v3092_v60 = vld [vmem:[#allocation2 + $0x28] sm:$0xf]  ;;  %v6212_v55 = vpack.c.bf16 %v2833_v18, %v2833_v18  ;;  %v3283_v20 = vshrl.u32 %v3238_v9, 16  ;;  %6369 = vmatprep.subr.bf16.mxu1 %v6630_v32 }
 0x1e8   :  { %v6326_v31 = vadd.f32 %v6325_v0, %v6324_v37  ;;  %v2693_v29 = vadd.f32 %v6323_v48, %v7621_v39  ;;  %v3087_v42 = vsel %vm6784_vm6, %v2938_v23, %v3086_v54  ;;  %v3090_v50 = vsel %vm6737_vm3, %v2939_v12, %v3089_v56  ;;  %v6616_v15 = vld [vmem:[#allocation2 + $0x8] ss:$8 sps:$4 sm:$0xff]   ;;  %v6632_v56 = vld [vmem:[%s8678_s3 + $0x60] sm:$0xff]   ;;  %v3095_v49 = vld [vmem:[#allocation2 + $0x2c] sm:$0x1]  ;;  %v7769_v23 = vpop.f32.mrb[44].mxu0 }
 0x1e9   :  { %v6641_v39 = vld [vmem:[%s8678_s3 + $0x88] sm:$0xff]   ;;  %3091 = vst [vmem:[#allocation2 + $0x24] sm:$0x1] %v3090_v50  ;;  %3088 = vst [vmem:[#allocation2 + $0x20] sm:$0xf] %v3087_v42  ;;  %v2943_v38 = vrot.slane %v2941_v21, 7  ;;  %3772 = vrot.lane.b32.xlu0 %v6616_v15, %s6702_s9  ;;  %6370 = vmatpush3.bf16.msra.mxu1 %v6631_v5 }
 0x1ea   :  { %v2790_v57 = vadd.f32 %v7657_v36, %v2693_v29  ;;  %v2696_v14 = vadd.f32 %v6326_v31, %v7629_v26  ;;  %v3286_v54 = vshll.u32 %v3238_v9, 16  ;;  %v7762_v4 = vld [vmem:[#allocation2 + $0x10] sm:$0xf]  ;;  %v2949_v41 = vshrl.u32 %v6212_v55, 16  ;;  %6430 = vmatpush3.bf16.msra.mxu0 %v6641_v39  ;;  %v3101_v32 = vld [vmem:[#allocation2 + $0x34] sm:$0x1]  ;;  %6371 = vmatprep.subr.bf16.mxu1 %v6632_v56 }
 0x1eb   :  { %v2952_v48 = vshll.u32 %v6212_v55, 16  ;;  %v3285_v37 = vrot.slane %v3283_v20, 4  ;;  %v3292_v45 = vshll.u32 %v3239_v28, 16  ;;  %v2946_v46 = vor.u32 %v2944_v53, %v2943_v38  ;;  %v3098_v0 = vld [vmem:[#allocation2 + $0x30] sm:$0xf]  ;;  %v6633_v12 = vld [vmem:[%s8678_s3 + $0x20] sm:$0xff]  }
 0x1ec   :  { %v6327_v36 = vpop.f32.mrb[16].mxu1  ;;  %v2834_v52 = vmax.f32 %v2790_v57, 0.0  ;;  %v2947_v26 = vrot.slane %v2943_v38, 4  ;;  %v2793_v9 = vadd.f32 %v7663_v33, %v2696_v14  ;;  %v2951_v31 = vrot.slane %v2949_v41, 7  ;;  %v7774_v29 = vpop.f32.mrb[45].mxu0  ;;  %v6634_v39 = vld [vmem:[%s8678_s3 + $0x68] sm:$0xff]  }
 0x1ed   :  { %v6328_v18 = vpop.f32.mrb[17].mxu1  ;;  %v3288_v21 = vrot.slane %v3286_v54, 5  ;;  %v3294_v28 = vrot.slane %v3292_v45, 5  ;;  %v3297_v42 = vshrl.u32 %v7762_v4, 16  ;;  %v3093_v55 = vsel %vm6784_vm6, %v2946_v46, %v3092_v60  ;;  %v7781_v20 = vpop.f32.mrb[46].mxu0  ;;  %6372 = vmatpush3.bf16.msra.mxu1 %v6633_v12 }
 0x1ee   :  { %v6329_v53 = vadd.f32 %v6328_v18, %v6327_v36  ;;  %v6330_v50 = vpop.f32.mrb[18].mxu1  ;;  %v6213_v33 = vpack.c.bf16 %v2834_v52, %v2834_v52  ;;  %v3096_v15 = vsel %vm6737_vm3, %v2947_v26, %v3095_v49  ;;  %3094 = vst [vmem:[#allocation2 + $0x28] sm:$0xf] %v3093_v55  ;;  %v2835_v5 = vmax.f32 %v2793_v9, 0.0  ;;  %v7786_v54 = vpop.f32.mrb[47].mxu0  ;;  %6373 = vmatprep.subr.bf16.mxu1 %v6634_v39 }
 0x1ef   :  { %v6331_v57 = vpop.f32.mrb[19].mxu1  ;;  %3097 = vst [vmem:[#allocation2 + $0x2c] sm:$0x1] %v3096_v15  ;;  %v2954_v38 = vor.u32 %v2952_v48, %v2951_v31  ;;  %v2955_v14 = vrot.slane %v2951_v31, 4  ;;  %v3289_v41 = vor.u32 %v3288_v21, %v3285_v37  ;;  %v3104_v52 = vld [vmem:[#allocation2 + $0x38] sm:$0xf] }
 0x1f0   :  { %v6332_v60 = vadd.f32 %v6331_v57, %v6330_v50  ;;  %v2957_v45 = vshrl.u32 %v6213_v33, 16  ;;  %v2960_v36 = vshll.u32 %v6213_v33, 16  ;;  %v2701_v49 = vadd.f32 %v6329_v53, %v7637_v61  ;;  %v6617_v18 = vld [vmem:[#allocation2 + $0x18] ss:$8 sps:$4 sm:$0xff]   ;;  %v6635_v48 = vld [vmem:[%s8678_s3 + $0x28] sm:$0xff]  }
 0x1f1   :  { %v6214_v56 = vpack.c.bf16 %v2835_v5, %v2835_v5  ;;  %v3099_v46 = vsel %vm6784_vm6, %v2954_v38, %v3098_v0  ;;  %v3102_v26 = vsel %vm6737_vm3, %v2955_v14, %v3101_v32  ;;  %v3290_v9 = vrot.slane %v3289_v41, 4  ;;  %v3241_v21 = vld [vmem:[#allocation2 + $0x14] sm:$0x1]  ;;  %v3107_v32 = vld [vmem:[#allocation2 + $0x3c] sm:$0x1]  ;;  %3774 = vrot.lane.b32.xlu0 %v6617_v18, %s6702_s9  ;;  %6374 = vmatpush3.bf16.msra.mxu1 %v6635_v48 }
 0x1f2   :  { %v2959_v37 = vrot.slane %v2957_v45, 7  ;;  %3103 = vst [vmem:[#allocation2 + $0x34] sm:$0x1] %v3102_v26  ;;  %3100 = vst [vmem:[#allocation2 + $0x30] sm:$0xf] %v3099_v46  ;;  %v2798_v61 = vadd.f32 %v7729_v11, %v2701_v49  ;;  %v2704_v31 = vadd.f32 %v6332_v60, %v7641_v40  ;;  %v3299_v53 = vrot.slane %v3297_v42, 4 }
 0x1f3   :  { %v6636_v0 = vld [vmem:[%s8678_s3 + $0x70] sm:$0xff]   ;;  %v2965_v12 = vshrl.u32 %v6214_v56, 16  ;;  %v2968_v50 = vshll.u32 %v6214_v56, 16  ;;  %v3295_v33 = vsel %vm6863_vm9, %v3290_v9, %v3294_v28  ;;  %v3300_v55 = vshll.u32 %v7762_v4, 16  ;;  %v3110_v57 = vld [vmem:[#allocation2 + $0x40] sm:$0xf] }
 0x1f4   :  { %v6333_v11 = vpop.f32.mrb[20].mxu1  ;;  %v2962_v15 = vor.u32 %v2960_v36, %v2959_v37  ;;  %v2963_v40 = vrot.slane %v2959_v37, 4  ;;  %v3113_v42 = vld [vmem:[#allocation2 + $0x44] sm:$0x1]  ;;  %v2836_v39 = vmax.f32 %v2798_v61, 0.0  ;;  %v2801_v5 = vadd.f32 %v7743_v24, %v2704_v31  ;;  %v6645_v38 = vld [vmem:[%s8678_s3 + $0xd0] sm:$0xff]   ;;  %6375 = vmatprep.subr.bf16.mxu1 %v6636_v0 }
 0x1f5   :  { %v6334_v14 = vpop.f32.mrb[21].mxu1  ;;  %v2967_v41 = vrot.slane %v2965_v12, 7  ;;  %v6034_v4 = vcombine.low %v3281_v16, %v3295_v33  ;;  %v3302_v28 = vrot.slane %v3300_v55, 5  ;;  %v3306_v60 = vshll.u32 %v3241_v21, 16  ;;  %v6637_v45 = vld [vmem:[%s8678_s3 + $0x30] sm:$0xff]   ;;  %6431 = vmatprep.subr.bf16.mxu0 %v6645_v38 }
 0x1f6   :  { %v6335_v24 = vadd.f32 %v6334_v14, %v6333_v11  ;;  %v6336_v36 = vpop.f32.mrb[22].mxu1  ;;  %v3105_v49 = vsel %vm6784_vm6, %v2962_v15, %v3104_v52  ;;  %v3108_v56 = vsel %vm6737_vm3, %v2963_v40, %v3107_v32  ;;  %v6215_v46 = vpack.c.bf16 %v2836_v39, %v2836_v39  ;;  %v3242_v21 = vld [vmem:[#allocation2 + $0x18] sm:$0xf]  ;;  %6432 = vmatpush3.bf16.msra.mxu0 %v6646_v10 }
 0x1f7   :  { %v6337_v16 = vpop.f32.mrb[23].mxu1  ;;  %3109 = vst [vmem:[#allocation2 + $0x3c] sm:$0x1] %v3108_v56  ;;  %3106 = vst [vmem:[#allocation2 + $0x38] sm:$0xf] %v3105_v49  ;;  %v2970_v26 = vor.u32 %v2968_v50, %v2967_v41  ;;  %v2971_v18 = vrot.slane %v2967_v41, 4  ;;  %3516 = vrot.lane.b32.xlu1 %v6034_v4, %s6702_s9  ;;  %v3303_v52 = vor.u32 %v3302_v28, %v3299_v53  ;;  %6376 = vmatpush3.bf16.msra.mxu1 %v6637_v45 }
 0x1f8   :  { %v2837_v9 = vmax.f32 %v2801_v5, 0.0  ;;  %v6338_v48 = vadd.f32 %v6337_v16, %v6336_v36  ;;  %v2709_v37 = vadd.f32 %v6335_v24, %v7645_v13  ;;  %v2973_v61 = vshrl.u32 %v6215_v46, 16  ;;  %v6644_v53 = vld [vmem:[%s8678_s3 + $0x38] sm:$0xff]   ;;  %6377 = vmatprep.subr.bf16.mxu1 %v6642_v7  ;;  %v3122_v36 = vld [vmem:[#allocation2 + $0x60] sm:$0xf] }
 0x1f9   :  { %v2976_v31 = vshll.u32 %v6215_v46, 16  ;;  %v3111_v0 = vsel %vm6784_vm6, %v2970_v26, %v3110_v57  ;;  %v3114_v32 = vsel %vm6737_vm3, %v2971_v18, %v3113_v42  ;;  %v6618_v50 = vld [vmem:[#allocation2 + $0x28] ss:$8 sps:$4 sm:$0xff]   ;;  %v7833_v33 = vrot.slane %v3303_v52, 4  ;;  %v3116_v11 = vld [vmem:[#allocation2 + $0x58] sm:$0xf] }
 0x1fa   :  { %v6216_v12 = vpack.c.bf16 %v2837_v9, %v2837_v9  ;;  %3115 = vst [vmem:[#allocation2 + $0x44] sm:$0x1] %v3114_v32  ;;  %3112 = vst [vmem:[#allocation2 + $0x40] sm:$0xf] %v3111_v0  ;;  %v2806_v13 = vadd.f32 %v7716_v59, %v2709_v37  ;;  %v2975_v55 = vrot.slane %v2973_v61, 7  ;;  %v2712_v15 = vadd.f32 %v6338_v48, %v7653_v47  ;;  %v6648_v26 = vld [vmem:[%s8678_s3 + $0xd8] sm:$0xff]  }
 0x1fb   :  { %v7840_v40 = vrot.slane %v3306_v60, 5  ;;  %v3119_v57 = vld [vmem:[#allocation2 + $0x5c] sm:$0x1]  ;;  %3776 = vrot.lane.b32.xlu0 %v6618_v50, %s6702_s9  ;;  %v3311_v5 = vshrl.u32 %v3242_v21, 16  ;;  %v3314_v38 = vshll.u32 %v3242_v21, 16  ;;  %6378 = vmatpush3.bf16.msra.mxu1 %v6644_v53 }
 0x1fc   :  { %v2981_v42 = vshrl.u32 %v6216_v12, 16  ;;  %v2984_v39 = vshll.u32 %v6216_v12, 16  ;;  %v6339_v14 = vpop.f32.mrb[24].mxu1  ;;  %v2838_v41 = vmax.f32 %v2806_v13, 0.0  ;;  %v2978_v4 = vor.u32 %v2976_v31, %v2975_v55  ;;  %v3125_v16 = vld [vmem:[#allocation2 + $0x64] sm:$0x1]  ;;  %6433 = vmatprep.subr.bf16.mxu0 %v6648_v26 }
 0x1fd   :  { %v2979_v28 = vrot.slane %v2975_v55, 4  ;;  %v2809_v59 = vadd.f32 %v7741_v17, %v2712_v15  ;;  %v6340_v45 = vpop.f32.mrb[25].mxu1  ;;  %v3309_v47 = vsel %vm6863_vm9, %v7833_v33, %v7840_v40  ;;  %v3313_v60 = vrot.slane %v3311_v5, 4  ;;  %v3243_v37 = vld [vmem:[#allocation2 + $0x1c] sm:$0x1] }
 0x1fe   :  { %v2983_v24 = vrot.slane %v2981_v42, 7  ;;  %v3316_v49 = vrot.slane %v3314_v38, 5  ;;  %v6341_v56 = vadd.f32 %v6340_v45, %v6339_v14  ;;  %v6342_v46 = vpop.f32.mrb[26].mxu1  ;;  %v6217_v7 = vpack.c.bf16 %v2838_v41, %v2838_v41  ;;  %v6649_v31 = vld [vmem:[%s8678_s3 + $0x98] sm:$0xff]   ;;  %v3244_v50 = vld [vmem:[#allocation2 + $0x20] sm:$0xf] }
 0x1ff   :  { %v3117_v10 = vsel %vm6784_vm6, %v2978_v4, %v3116_v11  ;;  %v3120_v17 = vsel %vm6737_vm3, %v2979_v28, %v3119_v57  ;;  %v6343_v18 = vpop.f32.mrb[27].mxu1  ;;  %v2839_v9 = vmax.f32 %v2809_v59, 0.0  ;;  %6434 = vmatpush3.bf16.msra.mxu0 %v6649_v31  ;;  %v6650_v57 = vld [vmem:[%s8678_s3 + $0x100] sm:$0xff]   ;;  %v3320_v38 = vshll.u32 %v3243_v37, 16  ;;  %v3131_v14 = vld [vmem:[#allocation2 + $0x6c] sm:$0x1] }
 0x200   :  { %3121 = vst [vmem:[#allocation2 + $0x5c] sm:$0x1] %v3120_v17  ;;  %3118 = vst [vmem:[#allocation2 + $0x58] sm:$0xf] %v3117_v10  ;;  %v2986_v52 = vor.u32 %v2984_v39, %v2983_v24  ;;  %v2987_v48 = vrot.slane %v2983_v24, 4  ;;  %v3317_v61 = vor.u32 %v3316_v49, %v3313_v60  ;;  %v6344_v21 = vadd.f32 %v6343_v18, %v6342_v46 }
 0x201   :  { %v2989_v0 = vshrl.u32 %v6217_v7, 16  ;;  %v2992_v32 = vshll.u32 %v6217_v7, 16  ;;  %v2717_v12 = vadd.f32 %v6341_v56, %v7680_v51  ;;  %v6218_v53 = vpack.c.bf16 %v2839_v9, %v2839_v9  ;;  %v6619_v15 = vld [vmem:[#allocation2 + $0x38] ss:$8 sps:$4 sm:$0xff]   ;;  %v3128_v39 = vld [vmem:[#allocation2 + $0x68] sm:$0xf]  ;;  %6527 = vmatprep.subr.bf16.mxu1 %v6650_v57 }
 0x202   :  { %v3123_v13 = vsel %vm6784_vm6, %v2986_v52, %v3122_v36  ;;  %v3126_v55 = vsel %vm6737_vm3, %v2987_v48, %v3125_v16  ;;  %v3318_v11 = vrot.slane %v3317_v61, 4  ;;  %v2720_v5 = vadd.f32 %v6344_v21, %v7685_v63  ;;  %3778 = vrot.lane.b32.xlu0 %v6619_v15, %s6702_s9  ;;  %v3134_v36 = vld [vmem:[#allocation2 + $0x70] sm:$0xf]  ;;  %v3137_v26 = vld [vmem:[#allocation2 + $0x74] sm:$0x1] }
 0x203   :  { %v2991_v42 = vrot.slane %v2989_v0, 7  ;;  %3127 = vst [vmem:[#allocation2 + $0x64] sm:$0x1] %v3126_v55  ;;  %3124 = vst [vmem:[#allocation2 + $0x60] sm:$0xf] %v3123_v13  ;;  %v2814_v51 = vadd.f32 %v7774_v29, %v2717_v12  ;;  %v2997_v41 = vshrl.u32 %v6218_v53, 16 }
 0x204   :  { %v3000_v4 = vshll.u32 %v6218_v53, 16  ;;  %v3325_v28 = vshrl.u32 %v3244_v50, 16  ;;  %v3328_v59 = vshll.u32 %v3244_v50, 16  ;;  %v6345_v60 = vpop.f32.mrb[28].mxu1  ;;  %v2817_v56 = vadd.f32 %v7786_v54, %v2720_v5  ;;  %v3245_v50 = vld [vmem:[#allocation2 + $0x24] sm:$0x1] }
 0x205   :  { %v2994_v45 = vor.u32 %v2992_v32, %v2991_v42  ;;  %v2995_v24 = vrot.slane %v2991_v42, 4  ;;  %v2840_v49 = vmax.f32 %v2814_v51, 0.0  ;;  %v2999_v46 = vrot.slane %v2997_v41, 7  ;;  %v6346_v29 = vpop.f32.mrb[29].mxu1  ;;  %v3246_v53 = vld [vmem:[#allocation2 + $0x28] sm:$0xf] }
 0x206   :  { %v3322_v7 = vrot.slane %v3320_v38, 5  ;;  %v3327_v63 = vrot.slane %v3325_v28, 4  ;;  %v3330_v10 = vrot.slane %v3328_v59, 5  ;;  %v6347_v18 = vadd.f32 %v6346_v29, %v6345_v60  ;;  %v6348_v9 = vpop.f32.mrb[30].mxu1  ;;  %v3140_v42 = vld [vmem:[#allocation2 + $0x78] sm:$0xf] }
 0x207   :  { %v3129_v17 = vsel %vm6784_vm6, %v2994_v45, %v3128_v39  ;;  %v3132_v16 = vsel %vm6737_vm3, %v2995_v24, %v3131_v14  ;;  %v6219_v52 = vpack.c.bf16 %v2840_v49, %v2840_v49  ;;  %v3002_v48 = vor.u32 %v3000_v4, %v2999_v46  ;;  %v6349_v54 = vpop.f32.mrb[31].mxu1  ;;  %v3143_v5 = vld [vmem:[#allocation2 + $0x7c] sm:$0x1]  ;;  %v3149_v45 = vld [vmem:[#allocation2 + $0x84] sm:$0x1] }
 0x208   :  { %3133 = vst [vmem:[#allocation2 + $0x6c] sm:$0x1] %v3132_v16  ;;  %3130 = vst [vmem:[#allocation2 + $0x68] sm:$0xf] %v3129_v17  ;;  %v3003_v37 = vrot.slane %v2999_v46, 4  ;;  %v2841_v61 = vmax.f32 %v2817_v56, 0.0  ;;  %v3323_v31 = vsel %vm6863_vm9, %v3318_v11, %v3322_v7  ;;  %v6350_v21 = vadd.f32 %v6349_v54, %v6348_v9 }
 0x209   :  { %v2725_v0 = vadd.f32 %v6347_v18, %v7723_v3  ;;  %v3005_v32 = vshrl.u32 %v6219_v52, 16  ;;  %v3008_v12 = vshll.u32 %v6219_v52, 16  ;;  %v3135_v13 = vsel %vm6784_vm6, %v3002_v48, %v3134_v36  ;;  %v3247_v24 = vld [vmem:[#allocation2 + $0x2c] sm:$0x1]  ;;  %v4356_v7 = vld [vmem:[#allocation2 + $0x10] sm:$0xf] }
 0x20a   :  { %v3138_v55 = vsel %vm6737_vm3, %v3003_v37, %v3137_v26  ;;  %v6220_v15 = vpack.c.bf16 %v2841_v61, %v2841_v61  ;;  %v6035_v11 = vcombine.low %v3309_v47, %v3323_v31  ;;  %3136 = vst [vmem:[#allocation2 + $0x70] sm:$0xf] %v3135_v13  ;;  %v2728_v39 = vadd.f32 %v6350_v21, %v7727_v58  ;;  %v3146_v47 = vld [vmem:[#allocation2 + $0x80] sm:$0xf]  ;;  %v4357_v48 = vld [vmem:[#allocation2 + $0x14] sm:$0x1] }
 0x20b   :  { %3139 = vst [vmem:[#allocation2 + $0x74] sm:$0x1] %v3138_v55  ;;  %v2822_v3 = vadd.f32 %v7769_v23, %v2725_v0  ;;  %v3007_v57 = vrot.slane %v3005_v32, 7  ;;  %v3331_v51 = vor.u32 %v3330_v10, %v3327_v63  ;;  %v3334_v41 = vshll.u32 %v3245_v50, 16  ;;  %v3152_v37 = vld [vmem:[#allocation2 + $0x88] sm:$0xf] }
 0x20c   :  { %v3013_v38 = vshrl.u32 %v6220_v15, 16  ;;  %v3016_v14 = vshll.u32 %v6220_v15, 16  ;;  %3518 = vrot.lane.b32.xlu1 %v6035_v11, %s6702_s9  ;;  %v3339_v4 = vshrl.u32 %v3246_v53, 16  ;;  %v2825_v40 = vadd.f32 %v7781_v20, %v2728_v39  ;;  %v6652_v20 = vld [vmem:[%s8678_s3 + $0xe0] sm:$0xff]   ;;  %v4358_v21 = vld [vmem:[#allocation2 + $0x18] sm:$0xf] }
 0x20d   :  { %v2842_v28 = vmax.f32 %v2822_v3, 0.0  ;;  %v3010_v59 = vor.u32 %v3008_v12, %v3007_v57  ;;  %v3011_v33 = vrot.slane %v3007_v57, 4  ;;  %v7890_v36 = vrot.slane %v3331_v51, 4  ;;  %6435 = vmatprep.subr.bf16.mxu0 %v6652_v20  ;;  %v3155_v12 = vld [vmem:[#allocation2 + $0x8c] sm:$0x1] }
 0x20e   :  { %v3015_v23 = vrot.slane %v3013_v38, 7  ;;  %v7892_v58 = vrot.slane %v3334_v41, 5  ;;  %v3341_v60 = vrot.slane %v3339_v4, 4  ;;  %v2843_v29 = vmax.f32 %v2825_v40, 0.0  ;;  %v3158_v55 = vld [vmem:[#allocation2 + $0x90] sm:$0xf] }
 0x20f   :  { %v6221_v49 = vpack.c.bf16 %v2842_v28, %v2842_v28  ;;  %v3141_v56 = vsel %vm6784_vm6, %v3010_v59, %v3140_v42  ;;  %v3144_v46 = vsel %vm6737_vm3, %v3011_v33, %v3143_v5  ;;  %v3342_v16 = vshll.u32 %v3246_v53, 16  ;;  %v6654_v42 = vld [vmem:[%s8678_s3 + $0xa0] sm:$0xff]   ;;  %v3161_v38 = vld [vmem:[#allocation2 + $0x94] sm:$0x1]  ;;  %v4359_v4 = vld [vmem:[#allocation2 + $0x1c] sm:$0x1] }
 0x210   :  { %3145 = vst [vmem:[#allocation2 + $0x7c] sm:$0x1] %v3144_v46  ;;  %3142 = vst [vmem:[#allocation2 + $0x78] sm:$0xf] %v3141_v56  ;;  %v3018_v63 = vor.u32 %v3016_v14, %v3015_v23  ;;  %v3019_v10 = vrot.slane %v3015_v23, 4  ;;  %v3337_v17 = vsel %vm6863_vm9, %v7890_v36, %v7892_v58  ;;  %v6222_v9 = vpack.c.bf16 %v2843_v29, %v2843_v29 }
 0x211   :  { %v3021_v26 = vshrl.u32 %v6221_v49, 16  ;;  %v3024_v18 = vshll.u32 %v6221_v49, 16  ;;  %v3348_v52 = vshll.u32 %v3247_v24, 16  ;;  %v3344_v31 = vrot.slane %v3342_v16, 5  ;;  %6436 = vmatpush3.bf16.msra.mxu0 %v6654_v42  ;;  %v3248_v24 = vld [vmem:[#allocation2 + $0x30] sm:$0xf] }
 0x212   :  { %v3147_v54 = vsel %vm6784_vm6, %v3018_v63, %v3146_v47  ;;  %v3150_v61 = vsel %vm6737_vm3, %v3019_v10, %v3149_v45  ;;  %v4389_v0 = vshrl.u32 %v4356_v7, 16  ;;  %v3029_v50 = vshrl.u32 %v6222_v9, 16  ;;  %v3249_v56 = vld [vmem:[#allocation2 + $0x34] sm:$0x1]  ;;  %v3250_v46 = vld [vmem:[#allocation2 + $0x38] sm:$0xf] }
 0x213   :  { %v3023_v32 = vrot.slane %v3021_v26, 7  ;;  %v3032_v53 = vshll.u32 %v6222_v9, 16  ;;  %3151 = vst [vmem:[#allocation2 + $0x84] sm:$0x1] %v3150_v61  ;;  %3148 = vst [vmem:[#allocation2 + $0x80] sm:$0xf] %v3147_v54  ;;  %v3345_v15 = vor.u32 %v3344_v31, %v3341_v60 }
 0x214   :  { %v3350_v13 = vrot.slane %v3348_v52, 5  ;;  %v4391_v11 = vrot.slane %v4389_v0, 4  ;;  %v4392_v3 = vshll.u32 %v4356_v7, 16  ;;  %v4398_v57 = vshll.u32 %v4357_v48, 16  ;;  %v3251_v10 = vld [vmem:[#allocation2 + $0x3c] sm:$0x1] }
 0x215   :  { %v3026_v39 = vor.u32 %v3024_v18, %v3023_v32  ;;  %v3027_v51 = vrot.slane %v3023_v32, 4  ;;  %v3031_v5 = vrot.slane %v3029_v50, 7  ;;  %v4403_v14 = vshrl.u32 %v4358_v21, 16  ;;  %v4100_v16 = vld [vmem:[#allocation2 + $0x8] sm:$0xe] }
 0x216   :  { %v3346_v41 = vrot.slane %v3345_v15, 4  ;;  %v4394_v28 = vrot.slane %v4392_v3, 5  ;;  %v4400_v59 = vrot.slane %v4398_v57, 5  ;;  %v4406_v33 = vshll.u32 %v4358_v21, 16  ;;  %v4101_v26 = vld [vmem:[#allocation2 + $0xc] sm:$0x1] }
 0x217   :  { %v3153_v40 = vsel %vm6784_vm6, %v3026_v39, %v3152_v37  ;;  %v3156_v47 = vsel %vm6737_vm3, %v3027_v51, %v3155_v12  ;;  %v3034_v45 = vor.u32 %v3032_v53, %v3031_v5  ;;  %v3035_v23 = vrot.slane %v3031_v5, 4  ;;  %v6656_v18 = vld [vmem:[%s8678_s3 + $0xe8] sm:$0xff]   ;;  %v4102_v31 = vld [vmem:[#allocation2 + $0x10] sm:$0xe]  ;;  %v4103_v50 = vld [vmem:[#allocation2 + $0x14] sm:$0x1] }
 0x218   :  { %3157 = vst [vmem:[#allocation2 + $0x8c] sm:$0x1] %v3156_v47  ;;  %3154 = vst [vmem:[#allocation2 + $0x88] sm:$0xf] %v3153_v40  ;;  %v3351_v36 = vsel %vm6863_vm9, %v3346_v41, %v3350_v13  ;;  %v4395_v58 = vor.u32 %v4394_v28, %v4391_v11  ;;  %v4405_v60 = vrot.slane %v4403_v14, 4  ;;  %v4408_v49 = vrot.slane %v4406_v33, 5  ;;  %6437 = vmatprep.subr.bf16.mxu0 %v6656_v18 }
 0x219   :  { %v3159_v29 = vsel %vm6784_vm6, %v3034_v45, %v3158_v55  ;;  %v3162_v7 = vsel %vm6737_vm3, %v3035_v23, %v3161_v38  ;;  %v6036_v20 = vcombine.low %v3337_v17, %v3351_v36  ;;  %v4412_v63 = vshll.u32 %v4359_v4, 16  ;;  %6438 = vmatpush3.bf16.msra.mxu0 %v6657_v1  ;;  %v4360_v11 = vld [vmem:[#allocation2 + $0x20] sm:$0xf]  ;;  %v4361_v51 = vld [vmem:[#allocation2 + $0x24] sm:$0x1]  ;;  %v6658_v45 = vld [vmem:[%s8678_s3 + $0xf0] sm:$0xff]  }
 0x21a   :  { %3163 = vst [vmem:[#allocation2 + $0x94] sm:$0x1] %v3162_v7  ;;  %3160 = vst [vmem:[#allocation2 + $0x90] sm:$0xf] %v3159_v29  ;;  %v4396_v9 = vrot.slane %v4395_v58, 4  ;;  %v4409_v52 = vor.u32 %v4408_v49, %v4405_v60  ;;  %v3353_v48 = vshrl.u32 %v3248_v24, 16  ;;  %6439 = vmatprep.subr.bf16.mxu0 %v6658_v45 }
 0x21b   :  { %v3356_v37 = vshll.u32 %v3248_v24, 16  ;;  %3520 = vrot.lane.b32.xlu1 %v6036_v20, %s6702_s9  ;;  %v4414_v34 = vrot.slane %v4412_v63, 5  ;;  %v3362_v17 = vshll.u32 %v3249_v56, 16  ;;  %v3367_v54 = vshrl.u32 %v3250_v46, 16  ;;  %v4362_v5 = vld [vmem:[#allocation2 + $0x28] sm:$0xf] }
 0x21c   :  { %v3370_v61 = vshll.u32 %v3250_v46, 16  ;;  %v4401_v21 = vsel %vm6863_vm9, %v4396_v9, %v4400_v59  ;;  %v4410_v0 = vrot.slane %v4409_v52, 4  ;;  %v3355_v32 = vrot.slane %v3353_v48, 4  ;;  %v4363_v40 = vld [vmem:[#allocation2 + $0x2c] sm:$0x1] }
 0x21d   :  { %v3358_v12 = vrot.slane %v3356_v37, 5  ;;  %v3364_v53 = vrot.slane %v3362_v17, 5  ;;  %v3369_v13 = vrot.slane %v3367_v54, 4  ;;  %v3376_v15 = vshll.u32 %v3251_v10, 16  ;;  %v4104_v60 = vld [vmem:[#allocation2 + $0x18] sm:$0xe] }
 0x21e   :  { %v3372_v55 = vrot.slane %v3370_v61, 5  ;;  %v4415_v3 = vsel %vm6863_vm9, %v4410_v0, %v4414_v34  ;;  %v6082_v42 = vrot.slane %v4100_v16, 9  ;;  %v4166_v39 = vrot.slane %v4101_v26, 5  ;;  %v4105_v49 = vld [vmem:[#allocation2 + $0x1c] sm:$0x1]  ;;  %v6660_v54 = vld [vmem:[%s8678_s3 + $0xb0] sm:$0xff]  }
 0x21f   :  { %v3359_v57 = vor.u32 %v3358_v12, %v3355_v32  ;;  %v6114_v38 = vcombine.low %v4401_v21, %v4415_v3  ;;  %v3378_v41 = vrot.slane %v3376_v15, 5  ;;  %v6083_v4 = vrot.slane %v4102_v31, 9  ;;  %v3254_v20 = vld [vmem:[#allocation2 + $0x58] sm:$0xf]  ;;  %v3255_v63 = vld [vmem:[#allocation2 + $0x5c] sm:$0x1]  ;;  %6440 = vmatpush3.bf16.msra.mxu0 %v6660_v54 }
 0x220   :  { %v3373_v14 = vor.u32 %v3372_v55, %v3369_v13  ;;  %v4167_v59 = vsel %vm7192_vm12, %v6082_v42, %v4166_v39  ;;  %v4170_v33 = vrot.slane %v4103_v50, 5  ;;  %v4417_v47 = vshrl.u32 %v4360_v11, 16  ;;  %v6620_v16 = vld [vmem:[#allocation2 + $0x58] ss:$8 sps:$4 sm:$0xff]   ;;  %v4107_v17 = vld [vmem:[#allocation2 + $0x24] sm:$0x1] }
 0x221   :  { %v3360_v28 = vrot.slane %v3359_v57, 4  ;;  %4636 = vrot.lane.b32.xlu0 %v6114_v38, %s6702_s9  ;;  %v4420_v24 = vshll.u32 %v4360_v11, 16  ;;  %v4426_v36 = vshll.u32 %v4361_v51, 16  ;;  %v4431_v58 = vshrl.u32 %v4362_v5, 16  ;;  %v4106_v52 = vld [vmem:[#allocation2 + $0x20] sm:$0xe] }
 0x222   :  { %v3374_v23 = vrot.slane %v3373_v14, 4  ;;  %v4171_v46 = vsel %vm7192_vm12, %v6083_v4, %v4170_v33  ;;  %v4419_v29 = vrot.slane %v4417_v47, 4  ;;  %v4434_v7 = vshll.u32 %v4362_v5, 16  ;;  %v4364_v32 = vld [vmem:[#allocation2 + $0x30] sm:$0xf]  ;;  %v6662_v12 = vld [vmem:[%s8678_s3 + $0xf8] sm:$0xff]  }
 0x223   :  { %v3365_v56 = vsel %vm6863_vm9, %v3360_v28, %v3364_v53  ;;  %v6098_v26 = vcombine.low %v4167_v59, %v4171_v46  ;;  %v4422_v18 = vrot.slane %v4420_v24, 5  ;;  %v4428_v9 = vrot.slane %v4426_v36, 5  ;;  %v4365_v15 = vld [vmem:[#allocation2 + $0x34] sm:$0x1]  ;;  %v6663_v11 = vld [vmem:[%s8678_s3 + $0xb8] sm:$0xff]   ;;  %6441 = vmatprep.subr.bf16.mxu0 %v6662_v12 }
 0x224   :  { %v3379_v10 = vsel %vm6863_vm9, %v3374_v23, %v3378_v41  ;;  %v4433_v37 = vrot.slane %v4431_v58, 4  ;;  %v4436_v1 = vrot.slane %v4434_v7, 5  ;;  %v4440_v34 = vshll.u32 %v4363_v40, 16  ;;  %v4366_v51 = vld [vmem:[#allocation2 + $0x38] sm:$0xf]  ;;  %6442 = vmatpush3.bf16.msra.mxu0 %v6663_v11 }
 0x225   :  { %v6037_v48 = vcombine.low %v3365_v56, %v3379_v10  ;;  %3780 = vrot.lane.b32.xlu0 %v6620_v16, %s6702_s9  ;;  %v4423_v61 = vor.u32 %v4422_v18, %v4419_v29  ;;  %v3395_v31 = vshrl.u32 %v3254_v20, 16  ;;  %v3398_v21 = vshll.u32 %v3254_v20, 16  ;;  %v4367_v45 = vld [vmem:[#allocation2 + $0x3c] sm:$0x1]  ;;  %v3256_v36 = vld [vmem:[#allocation2 + $0x60] sm:$0xf] }
 0x226   :  { %v3404_v0 = vshll.u32 %v3255_v63, 16  ;;  %v4437_v50 = vor.u32 %v4436_v1, %v4433_v37  ;;  %v4442_v53 = vrot.slane %v4440_v34, 5  ;;  %v6084_v13 = vrot.slane %v4104_v60, 9  ;;  %v3257_v46 = vld [vmem:[#allocation2 + $0x64] sm:$0x1] }
 0x227   :  { %3522 = vrot.lane.b32.xlu1 %v6037_v48, %s6702_s9  ;;  %v4174_v55 = vrot.slane %v4105_v49, 5  ;;  %v4424_v3 = vrot.slane %v4423_v61, 4  ;;  %v3397_v57 = vrot.slane %v3395_v31, 4  ;;  %v3400_v42 = vrot.slane %v3398_v21, 5  ;;  %v3258_v10 = vld [vmem:[#allocation2 + $0x68] sm:$0xf] }
 0x228   :  { %v3406_v39 = vrot.slane %v3404_v0, 5  ;;  %v4438_v5 = vrot.slane %v4437_v50, 4  ;;  %v6085_v14 = vrot.slane %v4106_v52, 9  ;;  %v4178_v41 = vrot.slane %v4107_v17, 5  ;;  %v4108_v16 = vld [vmem:[#allocation2 + $0x28] sm:$0xe] }
 0x229   :  { %v7958_v38 = vsel %vm7192_vm12, %v6084_v13, %v4174_v55  ;;  %v4429_v4 = vsel %vm6863_vm9, %v4424_v3, %v4428_v9  ;;  %v3401_v28 = vor.u32 %v3400_v42, %v3397_v57  ;;  %v4445_v59 = vshrl.u32 %v4364_v32, 16  ;;  %v4109_v48 = vld [vmem:[#allocation2 + $0x2c] sm:$0x1]  ;;  %v4110_v61 = vld [vmem:[#allocation2 + $0x30] sm:$0xe] }
 0x22a   :  { %v4448_v33 = vshll.u32 %v4364_v32, 16  ;;  %v4443_v40 = vsel %vm6863_vm9, %v4438_v5, %v4442_v53  ;;  %v4179_v47 = vsel %vm7192_vm12, %v6085_v14, %v4178_v41  ;;  %v4454_v23 = vshll.u32 %v4365_v15, 16  ;;  %v3259_v17 = vld [vmem:[#allocation2 + $0x6c] sm:$0x1]  ;;  %v6621_v31 = vld [vmem:[#allocation2 + $0x68] ss:$8 sps:$4 sm:$0xff]  }
 0x22b   :  { %4252 = vrot.lane.b32.xlu1 %v6098_v26, %s6702_s9  ;;  %v4459_v24 = vshrl.u32 %v4366_v51, 16  ;;  %v6115_v58 = vcombine.low %v4429_v4, %v4443_v40  ;;  %v3402_v60 = vrot.slane %v3401_v28, 4  ;;  %v6099_v49 = vcombine.low %v7958_v38, %v4179_v47  ;;  %v4111_v15 = vld [vmem:[#allocation2 + $0x34] sm:$0x1]  ;;  %v4368_v3 = vld [vmem:[#allocation2 + $0x40] sm:$0xf] }
 0x22c   :  { %v4447_v56 = vrot.slane %v4445_v59, 4  ;;  %v4450_v29 = vrot.slane %v4448_v33, 5  ;;  %v4456_v7 = vrot.slane %v4454_v23, 5  ;;  %v4462_v63 = vshll.u32 %v4366_v51, 16  ;;  %v4369_v4 = vld [vmem:[#allocation2 + $0x44] sm:$0x1] }
 0x22d   :  { %v4461_v20 = vrot.slane %v4459_v24, 4  ;;  %4638 = vrot.lane.b32.xlu0 %v6115_v58, %s6702_s9  ;;  %v3407_v26 = vsel %vm6863_vm9, %v3402_v60, %v3406_v39  ;;  %v4468_v18 = vshll.u32 %v4367_v45, 16  ;;  %v3409_v9 = vshrl.u32 %v3256_v36, 16  ;;  %v3260_v47 = vld [vmem:[#allocation2 + $0x70] sm:$0xf] }
 0x22e   :  { %v3412_v52 = vshll.u32 %v3256_v36, 16  ;;  %v6038_v37 = vcombine.low %v3393_v43, %v3407_v26  ;;  %v4451_v1 = vor.u32 %v4450_v29, %v4447_v56  ;;  %v4464_v34 = vrot.slane %v4462_v63, 5  ;;  %v3261_v45 = vld [vmem:[#allocation2 + $0x74] sm:$0x1]  ;;  %v3262_v60 = vld [vmem:[#allocation2 + $0x78] sm:$0xf] }
 0x22f   :  { %v3418_v54 = vshll.u32 %v3257_v46, 16  ;;  %v4470_v21 = vrot.slane %v4468_v18, 5  ;;  %v3411_v0 = vrot.slane %v3409_v9, 4  ;;  %v3423_v12 = vshrl.u32 %v3258_v10, 16  ;;  %v4114_v9 = vld [vmem:[#allocation2 + $0x40] sm:$0xe] }
 0x230   :  { %v3414_v32 = vrot.slane %v3412_v52, 5  ;;  %3524 = vrot.lane.b32.xlu1 %v6038_v37, %s6702_s9  ;;  %v4452_v50 = vrot.slane %v4451_v1, 4  ;;  %v4465_v53 = vor.u32 %v4464_v34, %v4461_v20  ;;  %v3426_v55 = vshll.u32 %v3258_v10, 16  ;;  %v4113_v20 = vld [vmem:[#allocation2 + $0x3c] sm:$0x1] }
 0x231   :  { %v3420_v13 = vrot.slane %v3418_v54, 5  ;;  %3782 = vrot.lane.b32.xlu0 %v6621_v31, %s6702_s9  ;;  %v3425_v44 = vrot.slane %v3423_v12, 4  ;;  %v3432_v43 = vshll.u32 %v3259_v17, 16  ;;  %v6086_v11 = vrot.slane %v4108_v16, 9  ;;  %v3263_v10 = vld [vmem:[#allocation2 + $0x7c] sm:$0x1] }
 0x232   :  { %v3415_v27 = vor.u32 %v3414_v32, %v3411_v0  ;;  %v4457_v57 = vsel %vm6863_vm9, %v4452_v50, %v4456_v7  ;;  %v4466_v42 = vrot.slane %v4465_v53, 4  ;;  %v3428_v39 = vrot.slane %v3426_v55, 5  ;;  %v4112_v7 = vld [vmem:[#allocation2 + $0x38] sm:$0xe]  ;;  %v4115_v52 = vld [vmem:[#allocation2 + $0x44] sm:$0x1] }
 0x233   :  { %v4182_v51 = vrot.slane %v4109_v48, 5  ;;  %v3434_v38 = vrot.slane %v3432_v43, 5  ;;  %v6087_v14 = vrot.slane %v4110_v61, 9  ;;  %v4186_v41 = vrot.slane %v4111_v15, 5  ;;  %v6622_v37 = vld [vmem:[#allocation2 + $0x78] ss:$8 sps:$4 sm:$0xff]  }
 0x234   :  { %v3416_v5 = vrot.slane %v3415_v27, 4  ;;  %4254 = vrot.lane.b32.xlu1 %v6099_v49, %s6702_s9  ;;  %v4471_v28 = vsel %vm6863_vm9, %v4466_v42, %v4470_v21  ;;  %v3429_v59 = vor.u32 %v3428_v39, %v3425_v44  ;;  %v4473_v40 = vshrl.u32 %v4368_v3, 16  ;;  %v4372_v54 = vld [vmem:[#allocation2 + $0x60] sm:$0xf]  ;;  %v4373_v55 = vld [vmem:[#allocation2 + $0x64] sm:$0x1] }
 0x235   :  { %v4183_v33 = vsel %vm7192_vm12, %v6086_v11, %v4182_v51  ;;  %v6116_v23 = vcombine.low %v4457_v57, %v4471_v28  ;;  %v4187_v36 = vsel %vm7192_vm12, %v6087_v14, %v4186_v41  ;;  %v4476_v58 = vshll.u32 %v4368_v3, 16  ;;  %v6643_v32 = vld [vmem:[#allocation2] ss:$8 sps:$4 sm:$0xff]   ;;  %v4375_v51 = vld [vmem:[#allocation2 + $0x6c] sm:$0x1] }
 0x236   :  { %v3421_v24 = vsel %vm6863_vm9, %v3416_v5, %v3420_v13  ;;  %v3430_v49 = vrot.slane %v3429_v59, 4  ;;  %v6100_v56 = vcombine.low %v4183_v33, %v4187_v36  ;;  %v4475_v46 = vrot.slane %v4473_v40, 4  ;;  %v4374_v11 = vld [vmem:[#allocation2 + $0x68] sm:$0xf]  ;;  %3228 = vst.msk [vmem:[#allocation3] sm:$0xff] %vm561_vm13, %v6643_v32 }
 0x237   :  { %v4482_v29 = vshll.u32 %v4369_v4, 16  ;;  %4640 = vrot.lane.b32.xlu0 %v6116_v23, %s6702_s9  ;;  %v4478_v63 = vrot.slane %v4476_v58, 5  ;;  %v3437_v16 = vshrl.u32 %v3260_v47, 16  ;;  %v3440_v26 = vshll.u32 %v3260_v47, 16  ;;  %v3264_v4 = vld [vmem:[#allocation2 + $0x80] sm:$0xf] }
 0x238   :  { %v3446_v18 = vshll.u32 %v3261_v45, 16  ;;  %v3435_v48 = vsel %vm6863_vm9, %v3430_v49, %v3434_v38  ;;  %v3451_v34 = vshrl.u32 %v3262_v60, 16  ;;  %v3454_v17 = vshll.u32 %v3262_v60, 16  ;;  %v6647_v47 = vld [vmem:[#allocation2 + $0x10] ss:$8 sps:$4 sm:$0xff]  }
 0x239   :  { %v4484_v1 = vrot.slane %v4482_v29, 5  ;;  %v6039_v61 = vcombine.low %v3421_v24, %v3435_v48  ;;  %v4479_v31 = vor.u32 %v4478_v63, %v4475_v46  ;;  %v3439_v21 = vrot.slane %v3437_v16, 4  ;;  %v3265_v58 = vld [vmem:[#allocation2 + $0x84] sm:$0x1]  ;;  %v3266_v60 = vld [vmem:[#allocation2 + $0x88] sm:$0xf] }
 0x23a   :  { %v3442_v0 = vrot.slane %v3440_v26, 5  ;;  %v3448_v12 = vrot.slane %v3446_v18, 5  ;;  %v3453_v50 = vrot.slane %v3451_v34, 4  ;;  %v3456_v53 = vrot.slane %v3454_v17, 5  ;;  %v3267_v46 = vld [vmem:[#allocation2 + $0x8c] sm:$0x1] }
 0x23b   :  { %v3460_v13 = vshll.u32 %v3263_v10, 16  ;;  %3526 = vrot.lane.b32.xlu1 %v6039_v61, %s6702_s9  ;;  %3784 = vrot.lane.b32.xlu0 %v6622_v37, %s6702_s9  ;;  %v4480_v15 = vrot.slane %v4479_v31, 4  ;;  %v6088_v44 = vrot.slane %v4112_v7, 9  ;;  %v4190_v43 = vrot.slane %v4113_v20, 5  ;;  %v4376_v29 = vld [vmem:[#allocation2 + $0x70] sm:$0xf] }
 0x23c   :  { %v3443_v27 = vor.u32 %v3442_v0, %v3439_v21  ;;  %v3457_v3 = vor.u32 %v3456_v53, %v3453_v50  ;;  %v6089_v42 = vrot.slane %v4114_v9, 9  ;;  %v4194_v39 = vrot.slane %v4115_v52, 5  ;;  %3229 = vst.msk [vmem:[#allocation3 + $0x28] sm:$0xff] %vm561_vm13, %v6647_v47  ;;  %v6623_v7 = vld [vmem:[#allocation2 + $0x88] ss:$8 sps:$4 sm:$0xff]  }
 0x23d   :  { %v3462_v57 = vrot.slane %v3460_v13, 5  ;;  %v4485_v5 = vsel %vm6863_vm9, %v4480_v15, %v4484_v1  ;;  %v4191_v14 = vsel %vm7192_vm12, %v6088_v44, %v4190_v43  ;;  %v4501_v41 = vshrl.u32 %v4372_v54, 16  ;;  %v4377_v52 = vld [vmem:[#allocation2 + $0x74] sm:$0x1]  ;;  %v4378_v17 = vld [vmem:[#allocation2 + $0x78] sm:$0xf] }
 0x23e   :  { %v3444_v38 = vrot.slane %v3443_v27, 4  ;;  %v6117_v28 = vcombine.low %v4485_v5, %v4499_v30  ;;  %v3458_v59 = vrot.slane %v3457_v3, 4  ;;  %v4195_v33 = vsel %vm7192_vm12, %v6089_v42, %v4194_v39  ;;  %v6651_v0 = vld [vmem:[#allocation2 + $0x20] ss:$8 sps:$4 sm:$0xff]   ;;  %v4379_v53 = vld [vmem:[#allocation2 + $0x7c] sm:$0x1] }
 0x23f   :  { %v4504_v40 = vshll.u32 %v4372_v54, 16  ;;  %4256 = vrot.lane.b32.xlu1 %v6100_v56, %s6702_s9  ;;  %v6101_v23 = vcombine.low %v4191_v14, %v4195_v33  ;;  %v4503_v24 = vrot.slane %v4501_v41, 4  ;;  %v4510_v36 = vshll.u32 %v4373_v55, 16  ;;  %v4116_v43 = vld [vmem:[#allocation2 + $0x58] sm:$0xe]  ;;  %3230 = vst.msk [vmem:[#allocation3 + $0x50] sm:$0xff] %vm561_vm13, %v6651_v0 }
 0x240   :  { %v3449_v45 = vsel %vm6863_vm9, %v3444_v38, %v3448_v12  ;;  %4642 = vrot.lane.b32.xlu0 %v6117_v28, %s6702_s9  ;;  %v3463_v8 = vsel %vm6863_vm9, %v3458_v59, %v3462_v57  ;;  %v4515_v30 = vshrl.u32 %v4374_v11, 16  ;;  %v4518_v49 = vshll.u32 %v4374_v11, 16  ;;  %v4117_v11 = vld [vmem:[#allocation2 + $0x5c] sm:$0x1]  ;;  %v6653_v3 = vld [vmem:[#allocation2 + $0x10] ss:$8 sps:$4 sm:$0xff]  }
 0x241   :  { %v4506_v22 = vrot.slane %v4504_v40, 5  ;;  %v6040_v56 = vcombine.low %v3449_v45, %v3463_v8  ;;  %v4512_v20 = vrot.slane %v4510_v36, 5  ;;  %v4524_v63 = vshll.u32 %v4375_v51, 16  ;;  %v4118_v5 = vld [vmem:[#allocation2 + $0x60] sm:$0xe]  ;;  %4348 = vst.msk [vmem:[#allocation3 + $0x18] sm:$0xff] %vm561_vm13, %v6653_v3 }
 0x242   :  { %v3465_v10 = vshrl.u32 %v3264_v4, 16  ;;  %v4517_v26 = vrot.slane %v4515_v30, 4  ;;  %v4520_v18 = vrot.slane %v4518_v49, 5  ;;  %v3468_v9 = vshll.u32 %v3264_v4, 16  ;;  %v4119_v38 = vld [vmem:[#allocation2 + $0x64] sm:$0x1] }
 0x243   :  { %v4507_v16 = vor.u32 %v4506_v22, %v4503_v24  ;;  %3528 = vrot.lane.b32.xlu1 %v6040_v56, %s6702_s9  ;;  %v4526_v48 = vrot.slane %v4524_v63, 5  ;;  %v3474_v1 = vshll.u32 %v3265_v58, 16  ;;  %v3479_v34 = vshrl.u32 %v3266_v60, 16  ;;  %v6655_v59 = vld [vmem:[#allocation2 + $0x30] ss:$8 sps:$4 sm:$0xff]  }
 0x244   :  { %v3467_v37 = vrot.slane %v3465_v10, 4  ;;  %3786 = vrot.lane.b32.xlu0 %v6623_v7, %s6702_s9  ;;  %v4521_v61 = vor.u32 %v4520_v18, %v4517_v26  ;;  %v3470_v31 = vrot.slane %v3468_v9, 5  ;;  %v3482_v21 = vshll.u32 %v3266_v60, 16  ;;  %v4381_v8 = vld [vmem:[#allocation2 + $0x84] sm:$0x1]  ;;  %3231 = vst.msk [vmem:[#allocation3 + $0x78] sm:$0xff] %vm561_vm13, %v6655_v59 }
 0x245   :  { %v4508_v54 = vrot.slane %v4507_v16, 4  ;;  %v3476_v32 = vrot.slane %v3474_v1, 5  ;;  %v3481_v12 = vrot.slane %v3479_v34, 4  ;;  %v3488_v50 = vshll.u32 %v3267_v46, 16  ;;  %v4383_v10 = vld [vmem:[#allocation2 + $0x8c] sm:$0x1] }
 0x246   :  { %v4529_v13 = vshrl.u32 %v4376_v29, 16  ;;  %v4522_v15 = vrot.slane %v4521_v61, 4  ;;  %v3471_v27 = vor.u32 %v3470_v31, %v3467_v37  ;;  %v3484_v44 = vrot.slane %v3482_v21, 5  ;;  %v4123_v61 = vld [vmem:[#allocation2 + $0x74] sm:$0x1] }
 0x247   :  { %v4513_v55 = vsel %vm6863_vm9, %v4508_v54, %v4512_v20  ;;  %4258 = vrot.lane.b32.xlu1 %v6101_v23, %s6702_s9  ;;  %v3490_v57 = vrot.slane %v3488_v50, 5  ;;  %v4532_v39 = vshll.u32 %v4376_v29, 16  ;;  %v4538_v51 = vshll.u32 %v4377_v52, 16  ;;  %v4380_v23 = vld [vmem:[#allocation2 + $0x80] sm:$0xf] }
 0x248   :  { %v4531_v42 = vrot.slane %v4529_v13, 4  ;;  %v4527_v14 = vsel %vm6863_vm9, %v4522_v15, %v4526_v48  ;;  %v3472_v41 = vrot.slane %v3471_v27, 4  ;;  %v3485_v4 = vor.u32 %v3484_v44, %v3481_v12  ;;  %v4382_v29 = vld [vmem:[#allocation2 + $0x88] sm:$0xf]  ;;  %v4121_v48 = vld [vmem:[#allocation2 + $0x6c] sm:$0x1] }
 0x249   :  { %v4543_v28 = vshrl.u32 %v4378_v17, 16  ;;  %v6118_v33 = vcombine.low %v4513_v55, %v4527_v14  ;;  %v4534_v40 = vrot.slane %v4532_v39, 5  ;;  %v4540_v47 = vrot.slane %v4538_v51, 5  ;;  %v4120_v52 = vld [vmem:[#allocation2 + $0x68] sm:$0xe] }
 0x24a   :  { %v4546_v45 = vshll.u32 %v4378_v17, 16  ;;  %v3477_v24 = vsel %vm6863_vm9, %v3472_v41, %v3476_v32  ;;  %v3486_v36 = vrot.slane %v3485_v4, 4  ;;  %v4552_v60 = vshll.u32 %v4379_v53, 16  ;;  %v4122_v54 = vld [vmem:[#allocation2 + $0x70] sm:$0xe] }
 0x24b   :  { %v4545_v58 = vrot.slane %v4543_v28, 4  ;;  %4644 = vrot.lane.b32.xlu0 %v6118_v33, %s6702_s9  ;;  %v4535_v22 = vor.u32 %v4534_v40, %v4531_v42  ;;  %v6090_v49 = vrot.slane %v4116_v43, 9  ;;  %v4198_v46 = vrot.slane %v4117_v11, 5  ;;  %v4384_v12 = vld [vmem:[#allocation2 + $0x90] sm:$0xf] }
 0x24c   :  { %v4548_v30 = vrot.slane %v4546_v45, 5  ;;  %v3491_v56 = vsel %vm6863_vm9, %v3486_v36, %v3490_v57  ;;  %v4554_v7 = vrot.slane %v4552_v60, 5  ;;  %v6091_v20 = vrot.slane %v4118_v5, 9  ;;  %v4385_v15 = vld [vmem:[#allocation2 + $0x94] sm:$0x1] }
 0x24d   :  { %v4202_v63 = vrot.slane %v4119_v38, 5  ;;  %v6041_v16 = vcombine.low %v3477_v24, %v3491_v56  ;;  %v4536_v26 = vrot.slane %v4535_v22, 4  ;;  %v4199_v9 = vsel %vm7192_vm12, %v6090_v49, %v4198_v46  ;;  %v4124_v27 = vld [vmem:[#allocation2 + $0x78] sm:$0xe]  ;;  %v6659_v57 = vld [vmem:[#allocation2 + $0x20] ss:$8 sps:$4 sm:$0xff]  }
 0x24e   :  { %v4549_v18 = vor.u32 %v4548_v30, %v4545_v58  ;;  %v4557_v1 = vshrl.u32 %v4380_v23, 16  ;;  %v4560_v34 = vshll.u32 %v4380_v23, 16  ;;  %v4566_v17 = vshll.u32 %v4381_v8, 16  ;;  %v4125_v38 = vld [vmem:[#allocation2 + $0x7c] sm:$0x1]  ;;  %4349 = vst.msk [vmem:[#allocation3 + $0x40] sm:$0xff] %vm561_vm13, %v6659_v57 }
 0x24f   :  { %v4203_v37 = vsel %vm7192_vm12, %v6091_v20, %v4202_v63  ;;  %3530 = vrot.lane.b32.xlu1 %v6041_v16, %s6702_s9  ;;  %v4541_v31 = vsel %vm6863_vm9, %v4536_v26, %v4540_v47  ;;  %v4571_v32 = vshrl.u32 %v4382_v29, 16  ;;  %v4574_v55 = vshll.u32 %v4382_v29, 16  ;;  %v4126_v14 = vld [vmem:[#allocation2 + $0x80] sm:$0xe]  ;;  %v4127_v41 = vld [vmem:[#allocation2 + $0x84] sm:$0x1] }
 0x250   :  { %v4550_v21 = vrot.slane %v4549_v18, 4  ;;  %v6102_v0 = vcombine.low %v4199_v9, %v4203_v37  ;;  %v4559_v50 = vrot.slane %v4557_v1, 4  ;;  %v4562_v53 = vrot.slane %v4560_v34, 5  ;;  %v6661_v4 = vld [vmem:[#allocation2 + $0x50] ss:$8 sps:$4 sm:$0xff]  }
 0x251   :  { %v4568_v13 = vrot.slane %v4566_v17, 5  ;;  %v4573_v43 = vrot.slane %v4571_v32, 4  ;;  %v4580_v11 = vshll.u32 %v4383_v10, 16  ;;  %v6092_v3 = vrot.slane %v4120_v52, 9  ;;  %v4128_v47 = vld [vmem:[#allocation2 + $0x88] sm:$0xe] }
 0x252   :  { %v4555_v44 = vsel %vm6863_vm9, %v4550_v21, %v4554_v7  ;;  %v4563_v39 = vor.u32 %v4562_v53, %v4559_v50  ;;  %v4576_v51 = vrot.slane %v4574_v55, 5  ;;  %v4206_v5 = vrot.slane %v4121_v48, 5  ;;  %v4129_v58 = vld [vmem:[#allocation2 + $0x8c] sm:$0x1]  ;;  %v4130_v60 = vld [vmem:[#allocation2 + $0x90] sm:$0xe] }
 0x253   :  { %v6119_v42 = vcombine.low %v4541_v31, %v4555_v44  ;;  %4260 = vrot.lane.b32.xlu1 %v6102_v0, %s6702_s9  ;;  %v4582_v28 = vrot.slane %v4580_v11, 5  ;;  %v6093_v59 = vrot.slane %v4122_v54, 9  ;;  %v4210_v33 = vrot.slane %v4123_v61, 5  ;;  %3232 = vst.msk [vmem:[#allocation3 + $0xa0] sm:$0xff] %vm561_vm13, %v6661_v4  ;;  %v4131_v46 = vld [vmem:[#allocation2 + $0x94] sm:$0x1] }
 0x254   :  { %v4585_v40 = vshrl.u32 %v4384_v12, 16  ;;  %v4564_v45 = vrot.slane %v4563_v39, 4  ;;  %v4577_v23 = vor.u32 %v4576_v51, %v4573_v43  ;;  %v4207_v24 = vsel %vm7192_vm12, %v6092_v3, %v4206_v5  ;;  %v3551_v63 = vld [vmem:[#allocation2 + $0xc] sm:$0x1]  ;;  %v3550_v10 = vld [vmem:[#allocation2 + $0x8] sm:$0xe] }
 0x255   :  { %4646 = vrot.lane.b32.xlu0 %v6119_v42, %s6702_s9  ;;  %v4588_v36 = vshll.u32 %v4384_v12, 16  ;;  %v4211_v8 = vsel %vm7192_vm12, %v6093_v59, %v4210_v33  ;;  %v4594_v30 = vshll.u32 %v4385_v15, 16  ;;  %v6094_v49 = vrot.slane %v4124_v27, 9  ;;  %v3552_v16 = vld [vmem:[#allocation2 + $0x10] sm:$0xe] }
 0x256   :  { %v4587_v22 = vrot.slane %v4585_v40, 4  ;;  %v4569_v29 = vsel %vm6863_vm9, %v4564_v45, %v4568_v13  ;;  %v4578_v56 = vrot.slane %v4577_v23, 4  ;;  %v6103_v7 = vcombine.low %v4207_v24, %v4211_v8  ;;  %v3553_v26 = vld [vmem:[#allocation2 + $0x14] sm:$0x1]  ;;  %v3554_v37 = vld [vmem:[#allocation2 + $0x18] sm:$0xe] }
 0x257   :  { %v4590_v20 = vrot.slane %v4588_v36, 5  ;;  %v4596_v18 = vrot.slane %v4594_v30, 5  ;;  %v4214_v9 = vrot.slane %v4125_v38, 5  ;;  %v6095_v52 = vrot.slane %v4126_v14, 9  ;;  %v3555_v61 = vld [vmem:[#allocation2 + $0x1c] sm:$0x1] }
 0x258   :  { %v4218_v48 = vrot.slane %v4127_v41, 5  ;;  %v4583_v1 = vsel %vm6863_vm9, %v4578_v56, %v4582_v28  ;;  %4262 = vrot.lane.b32.xlu1 %v6103_v7, %s6702_s9  ;;  %v6096_v17 = vrot.slane %v4128_v47, 9  ;;  %v4222_v54 = vrot.slane %v4129_v58, 5  ;;  %v3556_v12 = vld [vmem:[#allocation2 + $0x20] sm:$0xe] }
 0x259   :  { %v4591_v34 = vor.u32 %v4590_v20, %v4587_v22  ;;  %v6120_v31 = vcombine.low %v4569_v29, %v4583_v1  ;;  %v4215_v21 = vsel %vm7192_vm12, %v6094_v49, %v4214_v9  ;;  %v6097_v32 = vrot.slane %v4130_v60, 9  ;;  %v3557_v50 = vld [vmem:[#allocation2 + $0x24] sm:$0x1]  ;;  %v6665_v53 = vld [vmem:[#allocation2 + $0x30] ss:$8 sps:$4 sm:$0xff]  }
 0x25a   :  { %v4219_v0 = vsel %vm7192_vm12, %v6095_v52, %v4218_v48  ;;  %v4223_v15 = vsel %vm7192_vm12, %v6096_v17, %v4222_v54  ;;  %v4226_v27 = vrot.slane %v4131_v46, 5  ;;  %v3558_v44 = vld [vmem:[#allocation2 + $0x28] sm:$0xe]  ;;  %v3559_v43 = vld [vmem:[#allocation2 + $0x2c] sm:$0x1]  ;;  %v3618_v3 = vrot.slane %v3551_v63, 5 }
 0x25b   :  { %v4592_v13 = vrot.slane %v4591_v34, 4  ;;  %v6104_v55 = vcombine.low %v4215_v21, %v4219_v0  ;;  %v3560_v11 = vld [vmem:[#allocation2 + $0x30] sm:$0xe]  ;;  %4648 = vrot.lane.b32.xlu0 %v6120_v31, %s6702_s9  ;;  %v6043_v57 = vrot.slane %v3550_v10, 9  ;;  %v6044_v42 = vrot.slane %v3552_v16, 9  ;;  %4350 = vst.msk [vmem:[#allocation3 + $0x68] sm:$0xff] %vm561_vm13, %v6665_v53  ;;  %v3773_v58 = vpop.permute.xlu0 %3772 }
 0x25c   :  { %v3622_v39 = vrot.slane %v3553_v26, 5  ;;  %v3561_v51 = vld [vmem:[#allocation2 + $0x34] sm:$0x1]  ;;  %v6666_v5 = vld [vmem:[#allocation2 + $0x60] ss:$8 sps:$4 sm:$0xff]   ;;  %v4227_v14 = vsel %vm7192_vm12, %v6097_v32, %v4226_v27  ;;  %v6045_v41 = vrot.slane %v3554_v37, 9 }
 0x25d   :  { %v4597_v38 = vsel %vm6863_vm9, %v4592_v13, %v4596_v18  ;;  %4264 = vrot.lane.b32.xlu1 %v6104_v55, %s6702_s9  ;;  %v3626_v4 = vrot.slane %v3555_v61, 5  ;;  %v3562_v28 = vld [vmem:[#allocation2 + $0x38] sm:$0xe]  ;;  %v3563_v59 = vld [vmem:[#allocation2 + $0x3c] sm:$0x1]  ;;  %v6105_v40 = vcombine.low %v4223_v15, %v4227_v14  ;;  %v3619_v47 = vsel %vm7192_vm12, %v6043_v57, %v3618_v3  ;;  %3233 = vst.msk [vmem:[#allocation3 + $0xc8] sm:$0xff] %vm561_vm13, %v6666_v5 }
 0x25e   :  { %v6121_v33 = vcombine.low %v4597_v38, %v4611_v6  ;;  %v3623_v45 = vsel %vm7192_vm12, %v6044_v42, %v3622_v39  ;;  %v3564_v23 = vld [vmem:[#allocation2 + $0x50] sm:$0xe]  ;;  %v3565_v24 = vld [vmem:[#allocation2 + $0x54] sm:$0x1]  ;;  %v3566_v36 = vld [vmem:[#allocation2 + $0x58] sm:$0xe]  ;;  %v6058_v60 = vcombine.low %v7711_v35, %v3619_v47 }
 0x25f   :  { %v3627_v8 = vsel %vm7192_vm12, %v6045_v41, %v3626_v4  ;;  %v6046_v19 = vrot.slane %v3556_v12, 9  ;;  %v3630_v25 = vrot.slane %v3557_v50, 5  ;;  %v3567_v6 = vld [vmem:[#allocation2 + $0x5c] sm:$0x1]  ;;  %v3804_v22 = vld [vmem:[#allocation2 + $0x8] sm:$0xf] }
 0x260   :  { %4650 = vrot.lane.b32.xlu0 %v6121_v33, %s6702_s9  ;;  %v6059_v30 = vcombine.low %v3623_v45, %v3627_v8  ;;  %v6047_v49 = vrot.slane %v3558_v44, 9  ;;  %v3634_v46 = vrot.slane %v3559_v43, 5  ;;  %v6048_v29 = vrot.slane %v3560_v11, 9  ;;  %v3805_v56 = vld [vmem:[#allocation2 + $0xc] sm:$0x1]  ;;  %3708 = vst.msk [vmem:[#allocation3 + $0x8] sm:$0xff] %vm561_vm13, %v6058_v60 }
 0x261   :  { %v3806_v7 = vld [vmem:[#allocation2 + $0x10] sm:$0xf]  ;;  %4266 = vrot.lane.b32.xlu1 %v6105_v40, %s6702_s9  ;;  %v3631_v35 = vsel %vm7192_vm12, %v6046_v19, %v3630_v25  ;;  %v3638_v20 = vrot.slane %v3561_v51, 5  ;;  %v6049_v63 = vrot.slane %v3562_v28, 9  ;;  %v3642_v10 = vrot.slane %v3563_v59, 5  ;;  %3796 = vst.msk [vmem:[#allocation3 + $0x8] sm:$0xff] %vm877_vm14, %v3773_v58 }
 0x262   :  { %v3807_v16 = vld [vmem:[#allocation2 + $0x14] sm:$0x1]  ;;  %3709 = vst.msk [vmem:[#allocation3 + $0x30] sm:$0xff] %vm561_vm13, %v6059_v30  ;;  %v3635_v26 = vsel %vm7192_vm12, %v6047_v49, %v3634_v46  ;;  %v6050_v18 = vrot.slane %v3564_v23, 9  ;;  %v3646_v9 = vrot.slane %v3565_v24, 5  ;;  %v6051_v52 = vrot.slane %v3566_v36, 9 }
 0x263   :  { %v3568_v48 = vld [vmem:[#allocation2 + $0x60] sm:$0xe]  ;;  %v6060_v1 = vcombine.low %v3631_v35, %v3635_v26  ;;  %v3639_v34 = vsel %vm7192_vm12, %v6048_v29, %v3638_v20  ;;  %v3643_v17 = vsel %vm7192_vm12, %v6049_v63, %v3642_v10  ;;  %v3650_v54 = vrot.slane %v3567_v6, 5  ;;  %v3569_v61 = vld [vmem:[#allocation2 + $0x64] sm:$0x1]  ;;  %v3775_v39 = vpop.permute.xlu0 %3774 }
 0x264   :  { %v6667_v37 = vld [vmem:[#allocation2 + $0x40] ss:$8 sps:$4 sm:$0xff]   ;;  %v6061_v21 = vcombine.low %v3639_v34, %v3643_v17  ;;  %v3647_v0 = vsel %vm7192_vm12, %v6050_v18, %v3646_v9  ;;  %v3837_v32 = vshrl.u32 %v3804_v22, 16  ;;  %v3840_v12 = vshll.u32 %v3804_v22, 16  ;;  %v3571_v50 = vld [vmem:[#allocation2 + $0x6c] sm:$0x1] }
 0x265   :  { %v3570_v31 = vld [vmem:[#allocation2 + $0x68] sm:$0xe]  ;;  %4351 = vst.msk [vmem:[#allocation3 + $0x90] sm:$0xff] %vm561_vm13, %v6667_v37  ;;  %v6668_v53 = vld [vmem:[#allocation2 + $0x70] ss:$8 sps:$4 sm:$0xff]   ;;  %3710 = vst.msk [vmem:[#allocation3 + $0x58] sm:$0xff] %vm561_vm13, %v6060_v1  ;;  %v3651_v13 = vsel %vm7192_vm12, %v6051_v52, %v3650_v54 }
 0x266   :  { %v3846_v55 = vshll.u32 %v3805_v56, 16  ;;  %v3851_v15 = vshrl.u32 %v3806_v7, 16  ;;  %v3854_v27 = vshll.u32 %v3806_v7, 16  ;;  %v3808_v44 = vld [vmem:[#allocation2 + $0x18] sm:$0xf]  ;;  %3711 = vst.msk [vmem:[#allocation3 + $0x80] sm:$0xff] %vm561_vm13, %v6061_v21  ;;  %v6062_v43 = vcombine.low %v3647_v0, %v3651_v13 }
 0x267   :  { %v3839_v11 = vrot.slane %v3837_v32, 4  ;;  %v3842_v3 = vrot.slane %v3840_v12, 5  ;;  %v3860_v57 = vshll.u32 %v3807_v16, 16  ;;  %v3809_v42 = vld [vmem:[#allocation2 + $0x1c] sm:$0x1]  ;;  %3234 = vst.msk [vmem:[#allocation3 + $0xf0] sm:$0xff] %vm561_vm13, %v6668_v53 }
 0x268   :  { %v3848_v51 = vrot.slane %v3846_v55, 5  ;;  %v3853_v5 = vrot.slane %v3851_v15, 4  ;;  %v3856_v38 = vrot.slane %v3854_v27, 5  ;;  %v6052_v14 = vrot.slane %v3568_v48, 9  ;;  %v3810_v41 = vld [vmem:[#allocation2 + $0x20] sm:$0xf] }
 0x269   :  { %3797 = vst.msk [vmem:[#allocation3 + $0x30] sm:$0xff] %vm877_vm14, %v3775_v39  ;;  %v3843_v4 = vor.u32 %v3842_v3, %v3839_v11  ;;  %v3862_v28 = vrot.slane %v3860_v57, 5  ;;  %v3654_v59 = vrot.slane %v3569_v61, 5  ;;  %v6053_v33 = vrot.slane %v3570_v31, 9  ;;  %v3811_v40 = vld [vmem:[#allocation2 + $0x24] sm:$0x1]  ;;  %v3517_v49 = vpop.permute.xlu1 %3516 }
 0x26a   :  { %3712 = vst.msk [vmem:[#allocation3 + $0xa8] sm:$0xff] %vm561_vm13, %v6062_v43  ;;  %v4837_v47 = vld [vmem:[#allocation3 + $0x8] sm:$0xff]  ;;  %v3857_v45 = vor.u32 %v3856_v38, %v3853_v5  ;;  %v3658_v23 = vrot.slane %v3571_v50, 5  ;;  %v3865_v24 = vshrl.u32 %v3808_v44, 16  ;;  %v3868_v36 = vshll.u32 %v3808_v44, 16 }
 0x26b   :  { %v3572_v58 = vld [vmem:[#allocation2 + $0x70] sm:$0xe]  ;;  %v3573_v60 = vld [vmem:[#allocation2 + $0x74] sm:$0x1]  ;;  %v3574_v8 = vld [vmem:[#allocation2 + $0x78] sm:$0xe]  ;;  %5227 = vmatprep.mubr.bf16.mxu1 %v4837_v47  ;;  %v3655_v25 = vsel %vm7192_vm12, %v6052_v14, %v3654_v59 }
 0x26c   :  { %v3844_v19 = vrot.slane %v3843_v4, 4  ;;  %v3874_v6 = vshll.u32 %v3809_v42, 16  ;;  %v3879_v22 = vshrl.u32 %v3810_v41, 16  ;;  %v3575_v30 = vld [vmem:[#allocation2 + $0x7c] sm:$0x1]  ;;  %v3858_v46 = vrot.slane %v3857_v45, 4 }
 0x26d   :  { %v3659_v29 = vsel %vm7192_vm12, %v6053_v33, %v3658_v23  ;;  %v3867_v56 = vrot.slane %v3865_v24, 4  ;;  %v3870_v7 = vrot.slane %v3868_v36, 5  ;;  %v3812_v35 = vld [vmem:[#allocation2 + $0x28] sm:$0xf]  ;;  %v3813_v20 = vld [vmem:[#allocation2 + $0x2c] sm:$0x1]  ;;  %v3777_v21 = vpop.permute.xlu0 %3776 }
 0x26e   :  { %3540 = vst.msk [vmem:[#allocation3] sm:$0xff] %vm877_vm14, %v3517_v49  ;;  %v3849_v63 = vsel %vm6863_vm9, %v3844_v19, %v3848_v51  ;;  %v6063_v10 = vcombine.low %v3655_v25, %v3659_v29  ;;  %v8106_v16 = vrot.slane %v3874_v6, 5  ;;  %v3881_v26 = vrot.slane %v3879_v22, 4  ;;  %v3814_v18 = vld [vmem:[#allocation2 + $0x30] sm:$0xf]  ;;  %3798 = vst.msk [vmem:[#allocation3 + $0x58] sm:$0xff] %vm877_vm14, %v3777_v21 }
 0x26f   :  { %v3863_v9 = vsel %vm6863_vm9, %v3858_v46, %v3862_v28  ;;  %v3871_v52 = vor.u32 %v3870_v7, %v3867_v56  ;;  %v3882_v48 = vshll.u32 %v3810_v41, 16  ;;  %v3888_v37 = vshll.u32 %v3811_v40, 16  ;;  %v6670_v1 = vld [vmem:[#allocation2 + $0x60] ss:$8 sps:$4 sm:$0xff]   ;;  %v3815_v31 = vld [vmem:[#allocation2 + $0x34] sm:$0x1] }
 0x270   :  { %v6074_v34 = vcombine.low %v3849_v63, %v3863_v9  ;;  %3713 = vst.msk [vmem:[#allocation3 + $0xd0] sm:$0xff] %vm561_vm13, %v6063_v10  ;;  %v6054_v17 = vrot.slane %v3572_v58, 9  ;;  %v3662_v54 = vrot.slane %v3573_v60, 5  ;;  %v6055_v61 = vrot.slane %v3574_v8, 9  ;;  %v3576_v53 = vld [vmem:[#allocation2 + $0x80] sm:$0xe] }
 0x271   :  { %v3872_v0 = vrot.slane %v3871_v52, 4  ;;  %v3884_v32 = vrot.slane %v3882_v48, 5  ;;  %v3890_v12 = vrot.slane %v3888_v37, 5  ;;  %v3666_v50 = vrot.slane %v3575_v30, 5  ;;  %v3577_v13 = vld [vmem:[#allocation2 + $0x84] sm:$0x1] }
 0x272   :  { %v3578_v55 = vld [vmem:[#allocation2 + $0x88] sm:$0xe]  ;;  %4352 = vst.msk [vmem:[#allocation3 + $0xb8] sm:$0xff] %vm561_vm13, %v6670_v1  ;;  %4092 = vst.msk [vmem:[#allocation3 + $0x10] sm:$0xff] %vm561_vm13, %v6074_v34  ;;  %v3663_v15 = vsel %vm7192_vm12, %v6054_v17, %v3662_v54  ;;  %v3893_v27 = vshrl.u32 %v3812_v35, 16  ;;  %v3896_v44 = vshll.u32 %v3812_v35, 16 }
 0x273   :  { %v3902_v43 = vshll.u32 %v3813_v20, 16  ;;  %v3579_v11 = vld [vmem:[#allocation2 + $0x8c] sm:$0x1]  ;;  %v6671_v3 = vld [vmem:[#allocation2 + $0x80] ss:$8 sps:$4 sm:$0xff]   ;;  %v3877_v57 = vsel %vm6863_vm9, %v3872_v0, %v8106_v16  ;;  %v3885_v42 = vor.u32 %v3884_v32, %v3881_v26  ;;  %v3667_v39 = vsel %vm7192_vm12, %v6055_v61, %v3666_v50  ;;  %v4842_v24 = vld [vmem:[#allocation3 + $0x30] sm:$0xff] }
 0x274   :  { %v3907_v51 = vshrl.u32 %v3814_v18, 16  ;;  %v3816_v5 = vld [vmem:[#allocation2 + $0x38] sm:$0xf]  ;;  %v6664_v38 = vld [vmem:[%s8678_s3 + $0x108] sm:$0xff]   ;;  %v6064_v14 = vcombine.low %v3663_v15, %v3667_v39  ;;  %v3895_v41 = vrot.slane %v3893_v27, 4  ;;  %v3898_v4 = vrot.slane %v3896_v44, 5  ;;  %v3779_v16 = vpop.permute.xlu0 %3778 }
 0x275   :  { %v8124_v28 = vrot.slane %v3902_v43, 5  ;;  %3235 = vst.msk [vmem:[#allocation3 + $0x118] sm:$0xff] %vm561_vm13, %v6671_v3  ;;  %v6672_v59 = vld [vmem:[#allocation2 + $0x70] ss:$8 sps:$4 sm:$0xff]   ;;  %v4836_v33 = vld [vmem:[#allocation3] sm:$0xff]  ;;  %v3886_v40 = vrot.slane %v3885_v42, 4 }
 0x276   :  { %v3909_v47 = vrot.slane %v3907_v51, 4  ;;  %v3910_v45 = vshll.u32 %v3814_v18, 16  ;;  %v3916_v23 = vshll.u32 %v3815_v31, 16  ;;  %5228 = vmatmul.mubr.bf16.vlgmr.msra.gmra.mrb[32].mxu1 %v4836_v33  ;;  %3714 = vst.msk [vmem:[#allocation3 + $0xf8] sm:$0xff] %vm561_vm13, %v6064_v14  ;;  %v3899_v36 = vor.u32 %v3898_v4, %v3895_v41  ;;  %v3817_v19 = vld [vmem:[#allocation2 + $0x3c] sm:$0x1] }
 0x277   :  { %v6056_v58 = vrot.slane %v3576_v53, 9  ;;  %v3670_v60 = vrot.slane %v3577_v13, 5  ;;  %v6057_v8 = vrot.slane %v3578_v55, 9  ;;  %4353 = vst.msk [vmem:[#allocation3 + $0xe0] sm:$0xff] %vm561_vm13, %v6672_v59  ;;  %v6676_v25 = vld [vmem:[%s8678_s3 + $0x100] sm:$0xff]   ;;  %5235 = vmatprep.mubr.bf16.mxu1 %v4842_v24  ;;  %v3891_v6 = vsel %vm6863_vm9, %v3886_v40, %v3890_v12  ;;  %v6669_v29 = vld [vmem:[%s8678_s3 + $0x110] sm:$0xff]  }
 0x278   :  { %6528 = vmatpush3.bf16.msra.mxu1 %v6676_v25  ;;  %v3912_v22 = vrot.slane %v3910_v45, 5  ;;  %v3918_v30 = vrot.slane %v3916_v23, 5  ;;  %v3674_v49 = vrot.slane %v3579_v11, 5  ;;  %v3818_v46 = vld [vmem:[#allocation2 + $0x40] sm:$0xf]  ;;  %v6075_v56 = vcombine.low %v3877_v57, %v3891_v6  ;;  %3799 = vst.msk [vmem:[#allocation3 + $0x80] sm:$0xff] %vm877_vm14, %v3779_v16 }
 0x279   :  { %6529 = vmatprep.subr.bf16.mxu1 %v6664_v38  ;;  %v3900_v7 = vrot.slane %v3899_v36, 4  ;;  %v3671_v35 = vsel %vm7192_vm12, %v6056_v58, %v3670_v60  ;;  %v3819_v20 = vld [vmem:[#allocation2 + $0x44] sm:$0x1]  ;;  %v3921_v63 = vshrl.u32 %v3816_v5, 16  ;;  %v3820_v10 = vld [vmem:[#allocation2 + $0x58] sm:$0xf] }
 0x27a   :  { %v3913_v26 = vor.u32 %v3912_v22, %v3909_v47  ;;  %v3675_v18 = vsel %vm7192_vm12, %v6057_v8, %v3674_v49  ;;  %v3924_v9 = vshll.u32 %v3816_v5, 16  ;;  %v3930_v52 = vshll.u32 %v3817_v19, 16  ;;  %v3821_v48 = vld [vmem:[#allocation2 + $0x5c] sm:$0x1]  ;;  %4093 = vst.msk [vmem:[#allocation3 + $0x38] sm:$0xff] %vm561_vm13, %v6075_v56 }
 0x27b   :  { %v3905_v37 = vsel %vm6863_vm9, %v3900_v7, %v8124_v28  ;;  %v6065_v1 = vcombine.low %v3671_v35, %v3675_v18  ;;  %v3923_v34 = vrot.slane %v3921_v63, 4  ;;  %v3935_v17 = vshrl.u32 %v3818_v46, 16  ;;  %v6673_v54 = vld [vmem:[#allocation2 + $0x80] ss:$8 sps:$4 sm:$0xff]   ;;  %v6675_v32 = vld [vmem:[%s8678_s3 + $0x118] sm:$0xff]  }
 0x27c   :  { %6530 = vmatpush3.bf16.msra.mxu1 %v6664_v38  ;;  %v3914_v61 = vrot.slane %v3913_v26, 4  ;;  %v3926_v31 = vrot.slane %v3924_v9, 5  ;;  %v3932_v21 = vrot.slane %v3930_v52, 5  ;;  %v3938_v0 = vshll.u32 %v3818_v46, 16  ;;  %v3822_v53 = vld [vmem:[#allocation2 + $0x60] sm:$0xf] }
 0x27d   :  { %3715 = vst.msk [vmem:[#allocation3 + $0x120] sm:$0xff] %vm561_vm13, %v6065_v1  ;;  %v3937_v12 = vrot.slane %v3935_v17, 4  ;;  %v3944_v50 = vshll.u32 %v3819_v20, 16  ;;  %6531 = vmatprep.subr.bf16.mxu1 %v6669_v29  ;;  %v3949_v13 = vshrl.u32 %v3820_v10, 16  ;;  %v3952_v55 = vshll.u32 %v3820_v10, 16  ;;  %4354 = vst.msk [vmem:[#allocation3 + $0x108] sm:$0xff] %vm561_vm13, %v6673_v54 }
 0x27e   :  { %v3919_v15 = vsel %vm6863_vm9, %v3914_v61, %v3918_v30  ;;  %v3927_v27 = vor.u32 %v3926_v31, %v3923_v34  ;;  %v3940_v44 = vrot.slane %v3938_v0, 5  ;;  %v3823_v43 = vld [vmem:[#allocation2 + $0x64] sm:$0x1]  ;;  %v3958_v11 = vshll.u32 %v3821_v48, 16  ;;  %v3824_v3 = vld [vmem:[#allocation2 + $0x68] sm:$0xf]  ;;  %v3519_v23 = vpop.permute.xlu1 %3518 }
 0x27f   :  { %v6076_v57 = vcombine.low %v3905_v37, %v3919_v15  ;;  %v3946_v42 = vrot.slane %v3944_v50, 5  ;;  %v3951_v39 = vrot.slane %v3949_v13, 4  ;;  %v3954_v51 = vrot.slane %v3952_v55, 5  ;;  %v3825_v5 = vld [vmem:[#allocation2 + $0x6c] sm:$0x1]  ;;  %3541 = vst.msk [vmem:[#allocation3 + $0x28] sm:$0xff] %vm877_vm14, %v3519_v23 }
 0x280   :  { %v3928_v38 = vrot.slane %v3927_v27, 4  ;;  %v3941_v14 = vor.u32 %v3940_v44, %v3937_v12  ;;  %6532 = vmatpush3.bf16.msra.mxu1 %v6669_v29  ;;  %v3960_v41 = vrot.slane %v3958_v11, 5  ;;  %v3963_v4 = vshrl.u32 %v3822_v53, 16  ;;  %v6674_v28 = vld [vmem:[#allocation2 + $0x90] ss:$8 sps:$4 sm:$0xff]  }
 0x281   :  { %4094 = vst.msk [vmem:[#allocation3 + $0x60] sm:$0xff] %vm561_vm13, %v6076_v57  ;;  %v3955_v59 = vor.u32 %v3954_v51, %v3951_v39  ;;  %v3966_v33 = vshll.u32 %v3822_v53, 16  ;;  %v3972_v40 = vshll.u32 %v3823_v43, 16  ;;  %v3826_v47 = vld [vmem:[#allocation2 + $0x70] sm:$0xf]  ;;  %v3977_v45 = vshrl.u32 %v3824_v3, 16  ;;  %6533 = vmatprep.subr.bf16.mxu1 %v6675_v32 }
 0x282   :  { %v3933_v24 = vsel %vm6863_vm9, %v3928_v38, %v3932_v21  ;;  %v3942_v36 = vrot.slane %v3941_v14, 4  ;;  %v3965_v58 = vrot.slane %v3963_v4, 4  ;;  %v3980_v60 = vshll.u32 %v3824_v3, 16  ;;  %4355 = vst.msk [vmem:[#allocation3 + $0x130] sm:$0xff] %vm561_vm13, %v6674_v28  ;;  %v3827_v6 = vld [vmem:[#allocation2 + $0x74] sm:$0x1] }
 0x283   :  { %v3956_v8 = vrot.slane %v3955_v59, 4  ;;  %v3968_v19 = vrot.slane %v3966_v33, 5  ;;  %v3974_v25 = vrot.slane %v3972_v40, 5  ;;  %v3979_v22 = vrot.slane %v3977_v45, 4  ;;  %v3828_v56 = vld [vmem:[#allocation2 + $0x78] sm:$0xf] }
 0x284   :  { %v3947_v30 = vsel %vm6863_vm9, %v3942_v36, %v3946_v42  ;;  %v3982_v49 = vrot.slane %v3980_v60, 5  ;;  %v3986_v46 = vshll.u32 %v3825_v5, 16  ;;  %v3991_v29 = vshrl.u32 %v3826_v47, 16  ;;  %6534 = vmatpush3.bf16.msra.mxu1 %v6675_v32  ;;  %v3829_v10 = vld [vmem:[#allocation2 + $0x7c] sm:$0x1] }
 0x285   :  { %v6077_v7 = vcombine.low %v3933_v24, %v3947_v30  ;;  %v3961_v35 = vsel %vm6863_vm9, %v3956_v8, %v3960_v41  ;;  %v3969_v20 = vor.u32 %v3968_v19, %v3965_v58  ;;  %v3994_v63 = vshll.u32 %v3826_v47, 16  ;;  %v3830_v16 = vld [vmem:[#allocation2 + $0x80] sm:$0xf]  ;;  %v3831_v1 = vld [vmem:[#allocation2 + $0x84] sm:$0x1]  ;;  %v4847_v3 = vld [vmem:[#allocation3 + $0x58] sm:$0xff] }
 0x286   :  { %v3983_v26 = vor.u32 %v3982_v49, %v3979_v22  ;;  %v3988_v18 = vrot.slane %v3986_v46, 5  ;;  %v3993_v9 = vrot.slane %v3991_v29, 4  ;;  %v4000_v52 = vshll.u32 %v3827_v6, 16  ;;  %v3832_v0 = vld [vmem:[#allocation2 + $0x88] sm:$0xf] }
 0x287   :  { %4095 = vst.msk [vmem:[#allocation3 + $0x88] sm:$0xff] %vm561_vm13, %v6077_v7  ;;  %v3970_v48 = vrot.slane %v3969_v20, 4  ;;  %v3996_v37 = vrot.slane %v3994_v63, 5  ;;  %v4005_v34 = vshrl.u32 %v3828_v56, 16  ;;  %v4008_v17 = vshll.u32 %v3828_v56, 16  ;;  %v4841_v15 = vld [vmem:[#allocation3 + $0x28] sm:$0xff] }
 0x288   :  { %v3984_v54 = vrot.slane %v3983_v26, 4  ;;  %v4002_v61 = vrot.slane %v4000_v52, 5  ;;  %v4014_v31 = vshll.u32 %v3829_v10, 16  ;;  %v4019_v21 = vshrl.u32 %v3830_v16, 16  ;;  %v3833_v13 = vld [vmem:[#allocation2 + $0x8c] sm:$0x1]  ;;  %5236 = vmatmul.mubr.bf16.gmra.mrb[36].mxu1 %v4841_v15 }
 0x289   :  { %v3975_v32 = vsel %vm6863_vm9, %v3970_v48, %v3974_v25  ;;  %v3997_v12 = vor.u32 %v3996_v37, %v3993_v9  ;;  %v4007_v50 = vrot.slane %v4005_v34, 4  ;;  %v4010_v53 = vrot.slane %v4008_v17, 5  ;;  %v3834_v55 = vld [vmem:[#allocation2 + $0x90] sm:$0xf]  ;;  %v3835_v5 = vld [vmem:[#allocation2 + $0x94] sm:$0x1]  ;;  %5243 = vmatprep.mubr.bf16.mxu1 %v4847_v3 }
 0x28a   :  { %v6078_v27 = vcombine.low %v3961_v35, %v3975_v32  ;;  %v3989_v44 = vsel %vm6863_vm9, %v3984_v54, %v3988_v18  ;;  %v4016_v43 = vrot.slane %v4014_v31, 5  ;;  %v4021_v11 = vrot.slane %v4019_v21, 4  ;;  %v4668_v38 = vld [vmem:[#allocation2 + $0x10] sm:$0xe]  ;;  %v4669_v14 = vld [vmem:[#allocation2 + $0x14] sm:$0x1] }
 0x28b   :  { %v3998_v57 = vrot.slane %v3997_v12, 4  ;;  %v4011_v42 = vor.u32 %v4010_v53, %v4007_v50  ;;  %v4022_v39 = vshll.u32 %v3830_v16, 16  ;;  %v4028_v51 = vshll.u32 %v3831_v1, 16  ;;  %v4670_v33 = vld [vmem:[#allocation2 + $0x18] sm:$0xe] }
 0x28c   :  { %4096 = vst.msk [vmem:[#allocation3 + $0xb0] sm:$0xff] %vm561_vm13, %v6078_v27  ;;  %v4033_v41 = vshrl.u32 %v3832_v0, 16  ;;  %v4036_v4 = vshll.u32 %v3832_v0, 16  ;;  %v4042_v28 = vshll.u32 %v3833_v13, 16  ;;  %v4047_v59 = vshrl.u32 %v3834_v55, 16 }
 0x28d   :  { %v4003_v40 = vsel %vm6863_vm9, %v3998_v57, %v4002_v61  ;;  %v4012_v47 = vrot.slane %v4011_v42, 4  ;;  %v4024_v45 = vrot.slane %v4022_v39, 5  ;;  %v4030_v23 = vrot.slane %v4028_v51, 5  ;;  %v4671_v24 = vld [vmem:[#allocation2 + $0x1c] sm:$0x1]  ;;  %v3521_v10 = vpop.permute.xlu1 %3520 }
 0x28e   :  { %v6079_v36 = vcombine.low %v3989_v44, %v4003_v40  ;;  %v4035_v58 = vrot.slane %v4033_v41, 4  ;;  %v4038_v60 = vrot.slane %v4036_v4, 5  ;;  %v4044_v8 = vrot.slane %v4042_v28, 5  ;;  %v4672_v19 = vld [vmem:[#allocation2 + $0x20] sm:$0xe]  ;;  %3542 = vst.msk [vmem:[#allocation3 + $0x50] sm:$0xff] %vm877_vm14, %v3521_v10 }
 0x28f   :  { %v4017_v25 = vsel %vm6863_vm9, %v4012_v47, %v4016_v43  ;;  %v4025_v6 = vor.u32 %v4024_v45, %v4021_v11  ;;  %v4049_v22 = vrot.slane %v4047_v59, 4  ;;  %v4050_v30 = vshll.u32 %v3834_v55, 16  ;;  %v4673_v49 = vld [vmem:[#allocation2 + $0x24] sm:$0x1]  ;;  %v4674_v46 = vld [vmem:[#allocation2 + $0x28] sm:$0xe] }
 0x290   :  { %4097 = vst.msk [vmem:[#allocation3 + $0xd8] sm:$0xff] %vm561_vm13, %v6079_v36  ;;  %v4039_v29 = vor.u32 %v4038_v60, %v4035_v58  ;;  %v4056_v56 = vshll.u32 %v3835_v5, 16  ;;  %v6122_v7 = vrot.slane %v4668_v38, 9  ;;  %v4734_v35 = vrot.slane %v4669_v14, 5  ;;  %v4675_v20 = vld [vmem:[#allocation2 + $0x2c] sm:$0x1] }
 0x291   :  { %v4676_v63 = vld [vmem:[#allocation2 + $0x30] sm:$0xe]  ;;  %v4026_v16 = vrot.slane %v4025_v6, 4  ;;  %v4052_v26 = vrot.slane %v4050_v30, 5  ;;  %v6123_v18 = vrot.slane %v4670_v33, 9  ;;  %v4738_v9 = vrot.slane %v4671_v24, 5 }
 0x292   :  { %v4677_v52 = vld [vmem:[#allocation2 + $0x34] sm:$0x1]  ;;  %v4678_v48 = vld [vmem:[#allocation2 + $0x38] sm:$0xe]  ;;  %v4679_v37 = vld [vmem:[#allocation2 + $0x3c] sm:$0x1]  ;;  %v4735_v17 = vsel %vm7192_vm12, %v6122_v7, %v4734_v35 }
 0x293   :  { %v4040_v1 = vrot.slane %v4039_v29, 4  ;;  %v4058_v34 = vrot.slane %v4056_v56, 5  ;;  %v6124_v54 = vrot.slane %v4672_v19, 9  ;;  %v4680_v61 = vld [vmem:[#allocation2 + $0x40] sm:$0xe]  ;;  %v4031_v31 = vsel %vm6863_vm9, %v4026_v16, %v4030_v23  ;;  %v4637_v41 = vpop.permute.xlu0 %4636 }
 0x294   :  { %v4053_v21 = vor.u32 %v4052_v26, %v4049_v22  ;;  %v4739_v0 = vsel %vm7192_vm12, %v6123_v18, %v4738_v9  ;;  %v4742_v32 = vrot.slane %v4673_v49, 5  ;;  %v4681_v12 = vld [vmem:[#allocation2 + $0x44] sm:$0x1]  ;;  %v4682_v50 = vld [vmem:[#allocation2 + $0x48] sm:$0xe]  ;;  %v6080_v53 = vcombine.low %v4017_v25, %v4031_v31  ;;  %4660 = vst.msk [vmem:[#allocation3 + $0x18] sm:$0xff] %vm877_vm14, %v4637_v41 }
 0x295   :  { %v4045_v13 = vsel %vm6863_vm9, %v4040_v1, %v4044_v8  ;;  %v6138_v55 = vcombine.low %v4735_v17, %v4739_v0  ;;  %v6125_v15 = vrot.slane %v4674_v46, 9  ;;  %v4683_v27 = vld [vmem:[#allocation2 + $0x4c] sm:$0x1]  ;;  %v4684_v44 = vld [vmem:[#allocation2 + $0x60] sm:$0xe]  ;;  %v4746_v3 = vrot.slane %v4675_v20, 5 }
 0x296   :  { %v4054_v43 = vrot.slane %v4053_v21, 4  ;;  %v4743_v11 = vsel %vm7192_vm12, %v6124_v54, %v4742_v32  ;;  %v6126_v57 = vrot.slane %v4676_v63, 9  ;;  %v4685_v42 = vld [vmem:[#allocation2 + $0x64] sm:$0x1]  ;;  %4098 = vst.msk [vmem:[#allocation3 + $0x100] sm:$0xff] %vm561_vm13, %v6080_v53  ;;  %v4750_v39 = vrot.slane %v4677_v52, 5 }
 0x297   :  { %4828 = vst.msk [vmem:[#allocation3 + $0x20] sm:$0xff] %vm561_vm13, %v6138_v55  ;;  %v6127_v51 = vrot.slane %v4678_v48, 9  ;;  %v4754_v5 = vrot.slane %v4679_v37, 5  ;;  %v6128_v38 = vrot.slane %v4680_v61, 9  ;;  %v4686_v14 = vld [vmem:[#allocation2 + $0x68] sm:$0xe]  ;;  %v4747_v28 = vsel %vm7192_vm12, %v6125_v15, %v4746_v3  ;;  %v3781_v20 = vpop.permute.xlu0 %3780 }
 0x298   :  { %v4059_v4 = vsel %vm6863_vm9, %v4054_v43, %v4058_v34  ;;  %v4758_v59 = vrot.slane %v4681_v12, 5  ;;  %v6129_v33 = vrot.slane %v4682_v50, 9  ;;  %v4687_v40 = vld [vmem:[#allocation2 + $0x6c] sm:$0x1]  ;;  %v4688_v47 = vld [vmem:[#allocation2 + $0x70] sm:$0xe]  ;;  %v6139_v23 = vcombine.low %v4743_v11, %v4747_v28 }
 0x299   :  { %v6081_v45 = vcombine.low %v4045_v13, %v4059_v4  ;;  %v4751_v24 = vsel %vm7192_vm12, %v6126_v57, %v4750_v39  ;;  %v4755_v36 = vsel %vm7192_vm12, %v6127_v51, %v4754_v5  ;;  %v4689_v58 = vld [vmem:[#allocation2 + $0x74] sm:$0x1]  ;;  %v4690_v2 = vld [vmem:[#allocation2 + $0x78] sm:$0xe]  ;;  %v4691_v60 = vld [vmem:[#allocation2 + $0x7c] sm:$0x1]  ;;  %v3523_v9 = vpop.permute.xlu1 %3522 }
 0x29a   :  { %v4846_v8 = vld [vmem:[#allocation3 + $0x50] sm:$0xff]  ;;  %v4852_v19 = vld [vmem:[#allocation3 + $0x80] sm:$0xff]  ;;  %v6140_v25 = vcombine.low %v4751_v24, %v4755_v36  ;;  %v4759_v6 = vsel %vm7192_vm12, %v6128_v38, %v4758_v59  ;;  %v4762_v22 = vrot.slane %v4683_v27, 5  ;;  %v6130_v30 = vrot.slane %v4684_v44, 9  ;;  %4829 = vst.msk [vmem:[#allocation3 + $0x48] sm:$0xff] %vm561_vm13, %v6139_v23 }
 0x29b   :  { %v4692_v49 = vld [vmem:[#allocation2 + $0x80] sm:$0xe]  ;;  %5244 = vmatmul.mubr.bf16.gmra.mrb[40].mxu1 %v4846_v8  ;;  %4099 = vst.msk [vmem:[#allocation3 + $0x128] sm:$0xff] %vm561_vm13, %v6081_v45  ;;  %v4766_v46 = vrot.slane %v4685_v42, 5  ;;  %v6131_v29 = vrot.slane %v4686_v14, 9  ;;  %v4770_v56 = vrot.slane %v4687_v40, 5 }
 0x29c   :  { %v6132_v7 = vrot.slane %v4688_v47, 9  ;;  %v4693_v35 = vld [vmem:[#allocation2 + $0x84] sm:$0x1]  ;;  %5251 = vmatprep.mubr.bf16.mxu1 %v4852_v19  ;;  %4830 = vst.msk [vmem:[#allocation3 + $0x70] sm:$0xff] %vm561_vm13, %v6140_v25  ;;  %v4763_v63 = vsel %vm7192_vm12, %v6129_v33, %v4762_v22  ;;  %v4774_v10 = vrot.slane %v4689_v58, 5  ;;  %v6133_v16 = vrot.slane %v4690_v2, 9 }
 0x29d   :  { %v4778_v26 = vrot.slane %v4691_v60, 5  ;;  %v4694_v18 = vld [vmem:[#allocation2 + $0x88] sm:$0xe]  ;;  %3800 = vst.msk [vmem:[#allocation3 + $0xa8] sm:$0xff] %vm877_vm14, %v3781_v20  ;;  %v6141_v52 = vcombine.low %v4759_v6, %v4763_v63  ;;  %v4767_v48 = vsel %vm7192_vm12, %v6130_v30, %v4766_v46  ;;  %v4771_v37 = vsel %vm7192_vm12, %v6131_v29, %v4770_v56  ;;  %v4695_v1 = vld [vmem:[#allocation2 + $0x8c] sm:$0x1]  ;;  %v4253_v3 = vpop.permute.xlu1 %4252 }
 0x29e   :  { %v6134_v34 = vrot.slane %v4692_v49, 9  ;;  %v4696_v17 = vld [vmem:[#allocation2 + $0x90] sm:$0xe]  ;;  %3543 = vst.msk [vmem:[#allocation3 + $0x78] sm:$0xff] %vm877_vm14, %v3523_v9  ;;  %v6142_v54 = vcombine.low %v4767_v48, %v4771_v37  ;;  %v4775_v61 = vsel %vm7192_vm12, %v6132_v7, %v4774_v10  ;;  %v4782_v21 = vrot.slane %v4693_v35, 5  ;;  %v4839_v15 = vld [vmem:[#allocation3 + $0x18] sm:$0xff] }
 0x29f   :  { %v4779_v31 = vsel %vm7192_vm12, %v6133_v16, %v4778_v26  ;;  %v4697_v0 = vld [vmem:[#allocation2 + $0x94] sm:$0x1]  ;;  %v4698_v32 = vld [vmem:[#allocation2 + $0x98] sm:$0xe]  ;;  %4831 = vst.msk [vmem:[#allocation3 + $0x98] sm:$0xff] %vm561_vm13, %v6141_v52  ;;  %v6135_v50 = vrot.slane %v4694_v18, 9  ;;  %5324 = vmatprep.mubr.bf16.mxu0 %v4839_v15  ;;  %v4639_v38 = vpop.permute.xlu0 %4638 }
 0x2a0   :  { %v6143_v12 = vcombine.low %v4775_v61, %v4779_v31  ;;  %v4786_v53 = vrot.slane %v4695_v1, 5  ;;  %v4699_v13 = vld [vmem:[#allocation2 + $0x9c] sm:$0x1]  ;;  %v6136_v55 = vrot.slane %v4696_v17, 9  ;;  %4832 = vst.msk [vmem:[#allocation3 + $0xc0] sm:$0xff] %vm561_vm13, %v6142_v54  ;;  %v4783_v27 = vsel %vm7192_vm12, %v6134_v34, %v4782_v21  ;;  %v4840_v18 = vld [vmem:[#allocation3 + $0x20] sm:$0xff] }
 0x2a1   :  { %v4790_v44 = vrot.slane %v4697_v0, 5  ;;  %v6137_v43 = vrot.slane %v4698_v32, 9  ;;  %v4794_v11 = vrot.slane %v4699_v13, 5  ;;  %4276 = vst.msk [vmem:[#allocation3 + $0x10] sm:$0xff] %vm877_vm14, %v4253_v3  ;;  %4661 = vst.msk [vmem:[#allocation3 + $0x40] sm:$0xff] %vm877_vm14, %v4639_v38  ;;  %v4845_v34 = vld [vmem:[#allocation3 + $0x48] sm:$0xff] }
 0x2a2   :  { %4833 = vst.msk [vmem:[#allocation3 + $0xe8] sm:$0xff] %vm561_vm13, %v6143_v12  ;;  %v4787_v57 = vsel %vm7192_vm12, %v6135_v50, %v4786_v53  ;;  %v3525_v4 = vpop.permute.xlu1 %3524  ;;  %vm5544_vm3 = vcmask 1044484  }
 0x2a3   :  { %v6144_v42 = vcombine.low %v4783_v27, %v4787_v57  ;;  %v4791_v39 = vsel %vm7192_vm12, %v6136_v55, %v4790_v44  ;;  %v4795_v51 = vsel %vm7192_vm12, %v6137_v43, %v4794_v11  ;;  %3544 = vst.msk [vmem:[#allocation3 + $0xa0] sm:$0xff] %vm877_vm14, %v3525_v4  ;;  %v3783_v28 = vpop.permute.xlu0 %3782  ;;  %v4850_v54 = vld [vmem:[#allocation3 + $0x70] sm:$0xff] }
 0x2a4   :  { %v6145_v5 = vcombine.low %v4791_v39, %v4795_v51  ;;  %v4857_v41 = vld [vmem:[#allocation3 + $0xa8] sm:$0xff]  ;;  %3801 = vst.msk [vmem:[#allocation3 + $0xd0] sm:$0xff] %vm877_vm14, %v3783_v28 }
 0x2a5   :  { %4834 = vst.msk [vmem:[#allocation3 + $0x110] sm:$0xff] %vm561_vm13, %v6144_v42  ;;  %v4851_v14 = vld [vmem:[#allocation3 + $0x78] sm:$0xff] }
 0x2a6   :  { %4835 = vst.msk [vmem:[#allocation3 + $0x138] sm:$0xff] %vm561_vm13, %v6145_v5  ;;  %5252 = vmatmul.mubr.bf16.gmra.mrb[44].mxu1 %v4851_v14  ;;  %v4255_v59 = vpop.permute.xlu1 %4254  ;;  %v4855_v21 = vld [vmem:[#allocation3 + $0x98] sm:$0xff] }
 0x2a7   :  { %5259 = vmatprep.mubr.bf16.mxu1 %v4857_v41  ;;  %4277 = vst.msk [vmem:[#allocation3 + $0x38] sm:$0xff] %vm877_vm14, %v4255_v59  ;;  %v4860_v0 = vld [vmem:[#allocation3 + $0xc0] sm:$0xff] }
 0x2a8   :  { %v4838_v62 = vld [vmem:[#allocation3 + $0x10] sm:$0xff]  ;;  %v4844_v33 = vld [vmem:[#allocation3 + $0x40] sm:$0xff] }
 0x2a9   :  { %5325 = vmatmul.mubr.bf16.vlgmr.msra.gmra.mrb[48].mxu0 %v4838_v62  ;;  %v4641_v40 = vpop.permute.xlu0 %4640  ;;  %v4865_v50 = vld [vmem:[#allocation3 + $0xe8] sm:$0xff] }
 0x2aa   :  { %5332 = vmatprep.mubr.bf16.mxu0 %v4844_v33  ;;  %4662 = vst.msk [vmem:[#allocation3 + $0x68] sm:$0xff] %vm877_vm14, %v4641_v40  ;;  %v4856_v47 = vld [vmem:[#allocation3 + $0xa0] sm:$0xff] }
 0x2ab   :  { %v4862_v45 = vld [vmem:[#allocation3 + $0xd0] sm:$0xff] }
 0x2ac   :  { %v4870_v53 = vld [vmem:[#allocation3 + $0x110] sm:$0xff] }
 0x2ad   :  { %v3527_v23 = vpop.permute.xlu1 %3526  ;;  %v3785_v24 = vpop.permute.xlu0 %3784  ;;  %v4875_v55 = vld [vmem:[#allocation3 + $0x138] sm:$0xff] }
 0x2ae   :  { %5260 = vmatmul.mubr.bf16.gmra.mrb[48].mxu1 %v4856_v47  ;;  %3545 = vst.msk [vmem:[#allocation3 + $0xc8] sm:$0xff] %vm877_vm14, %v3527_v23  ;;  %3802 = vst.msk [vmem:[#allocation3 + $0xf8] sm:$0xff] %vm877_vm14, %v3785_v24  ;;  %v4843_v36 = vld [vmem:[#allocation3 + $0x38] sm:$0xff]  ;;  %v8258_v23 = vld [vmem:[%s8679_s4] ss:$0 sm:$0xff] }
 0x2af   :  { %5267 = vmatprep.mubr.bf16.mxu1 %v4862_v45 }
 0x2b1   :  { %5333 = vmatmul.mubr.bf16.gmra.mrb[52].mxu0 %v4843_v36  ;;  %v4257_v58 = vpop.permute.xlu1 %4256  ;;  %v4849_v2 = vld [vmem:[#allocation3 + $0x68] sm:$0xff] }
 0x2b2   :  { %4278 = vst.msk [vmem:[#allocation3 + $0x60] sm:$0xff] %vm877_vm14, %v4257_v58  ;;  %v4643_v60 = vpop.permute.xlu0 %4642  ;;  %5340 = vmatprep.mubr.bf16.mxu0 %v4849_v2 }
 0x2b3   :  { %4663 = vst.msk [vmem:[#allocation3 + $0x90] sm:$0xff] %vm877_vm14, %v4643_v60 }
 0x2b5   :  { %v3529_v8 = vpop.permute.xlu1 %3528  ;;  %v4861_v19 = vld [vmem:[#allocation3 + $0xc8] sm:$0xff]  ;;  %v4867_v6 = vld [vmem:[#allocation3 + $0xf8] sm:$0xff] }
 0x2b6   :  { %3546 = vst.msk [vmem:[#allocation3 + $0xf0] sm:$0xff] %vm877_vm14, %v3529_v8  ;;  %v3787_v25 = vpop.permute.xlu0 %3786  ;;  %5268 = vmatmul.mubr.bf16.gmra.mrb[52].mxu1 %v4861_v19 }
 0x2b7   :  { %3803 = vst.msk [vmem:[#allocation3 + $0x120] sm:$0xff] %vm877_vm14, %v3787_v25  ;;  %5275 = vmatprep.mubr.bf16.mxu1 %v4867_v6 }
 0x2b9   :  { %v4259_v22 = vpop.permute.xlu1 %4258  ;;  %v4848_v30 = vld [vmem:[#allocation3 + $0x60] sm:$0xff] }
 0x2ba   :  { %4279 = vst.msk [vmem:[#allocation3 + $0x88] sm:$0xff] %vm877_vm14, %v4259_v22  ;;  %5341 = vmatmul.mubr.bf16.gmra.mrb[56].mxu0 %v4848_v30  ;;  %v4854_v49 = vld [vmem:[#allocation3 + $0x90] sm:$0xff] }
 0x2bb   :  { %5348 = vmatprep.mubr.bf16.mxu0 %v4854_v49 }
 0x2bd   :  { %v4645_v46 = vpop.permute.xlu0 %4644  ;;  %v4866_v29 = vld [vmem:[#allocation3 + $0xf0] sm:$0xff] }
 0x2be   :  { %4664 = vst.msk [vmem:[#allocation3 + $0xb8] sm:$0xff] %vm877_vm14, %v4645_v46  ;;  %5276 = vmatmul.mubr.bf16.gmra.mrb[56].mxu1 %v4866_v29  ;;  %v4872_v56 = vld [vmem:[#allocation3 + $0x120] sm:$0xff] }
 0x2bf   :  { %5283 = vmatprep.mubr.bf16.mxu1 %v4872_v56 }
 0x2c1   :  { %v3531_v7 = vpop.permute.xlu1 %3530  ;;  %v4853_v35 = vld [vmem:[#allocation3 + $0x88] sm:$0xff] }
 0x2c2   :  { %3547 = vst.msk [vmem:[#allocation3 + $0x118] sm:$0xff] %vm877_vm14, %v3531_v7  ;;  %5349 = vmatmul.mubr.bf16.gmra.mrb[60].mxu0 %v4853_v35 }
 0x2c5   :  { %v4261_v20 = vpop.permute.xlu1 %4260  ;;  %v4859_v63 = vld [vmem:[#allocation3 + $0xb8] sm:$0xff] }
 0x2c6   :  { %4280 = vst.msk [vmem:[#allocation3 + $0xb0] sm:$0xff] %vm877_vm14, %v4261_v20  ;;  %5356 = vmatprep.mubr.bf16.mxu0 %v4859_v63 }
 0x2c7   :  { %v4647_v10 = vpop.permute.xlu0 %4646 }
 0x2c8   :  { %4665 = vst.msk [vmem:[#allocation3 + $0xe0] sm:$0xff] %vm877_vm14, %v4647_v10 }
 0x2c9   :  { %v4871_v16 = vld [vmem:[#allocation3 + $0x118] sm:$0xff] }
 0x2ca   :  { %v4263_v26 = vpop.permute.xlu1 %4262  ;;  %5284 = vmatmul.mubr.bf16.gmra.mrb[60].mxu1 %v4871_v16 }
 0x2cb   :  { %4281 = vst.msk [vmem:[#allocation3 + $0xd8] sm:$0xff] %vm877_vm14, %v4263_v26  ;;  %6535 = vmatprep.mubr.msk.bf16.mxu1 %vm561_vm13, %v4840_v18 }
 0x2cd   :  { %v4649_v9 = vpop.permute.xlu0 %4648  ;;  %v4858_v52 = vld [vmem:[#allocation3 + $0xb0] sm:$0xff] }
 0x2ce   :  { %4666 = vst.msk [vmem:[#allocation3 + $0x108] sm:$0xff] %vm877_vm14, %v4649_v9  ;;  %5357 = vmatmul.mubr.bf16.gmra.mrb[64].mxu0 %v4858_v52 }
 0x2cf   :  { %v4265_v48 = vpop.permute.xlu1 %4264  ;;  %v4864_v37 = vld [vmem:[#allocation3 + $0xe0] sm:$0xff] }
 0x2d0   :  { %4282 = vst.msk [vmem:[#allocation3 + $0x100] sm:$0xff] %vm877_vm14, %v4265_v48  ;;  %5364 = vmatprep.mubr.bf16.mxu0 %v4864_v37 }
 0x2d2   :  { %v4651_v1 = vpop.permute.xlu0 %4650  ;;  %6536 = vmatmul.mubr.msk.bf16.vlgmr.msra.gmra.mrb[64].mxu1 %vm561_vm13, %v4845_v34  ;;  %v4863_v61 = vld [vmem:[#allocation3 + $0xd8] sm:$0xff] }
 0x2d3   :  { %4667 = vst.msk [vmem:[#allocation3 + $0x130] sm:$0xff] %vm877_vm14, %v4651_v1  ;;  %v4267_v17 = vpop.permute.xlu1 %4266  ;;  %6539 = vmatprep.mubr.msk.bf16.mxu1 %vm561_vm13, %v4850_v54 }
 0x2d4   :  { %4283 = vst.msk [vmem:[#allocation3 + $0x128] sm:$0xff] %vm877_vm14, %v4267_v17 }
 0x2d5   :  { %v4869_v31 = vld [vmem:[#allocation3 + $0x108] sm:$0xff] }
 0x2d6   :  { %5365 = vmatmul.mubr.bf16.gmra.mrb[68].mxu0 %v4863_v61 }
 0x2d7   :  { %5372 = vmatprep.mubr.bf16.mxu0 %v4869_v31  ;;  %v4868_v32 = vld [vmem:[#allocation3 + $0x100] sm:$0xff] }
 0x2da   :  { %6540 = vmatmul.mubr.msk.bf16.gmra.mrb[68].mxu1 %vm561_vm13, %v4855_v21  ;;  %v4874_v12 = vld [vmem:[#allocation3 + $0x130] sm:$0xff] }
 0x2db   :  { %6543 = vmatprep.mubr.msk.bf16.mxu1 %vm561_vm13, %v4860_v0  ;;  %v4873_v13 = vld [vmem:[#allocation3 + $0x128] sm:$0xff] }
 0x2de   :  { %5373 = vmatmul.mubr.bf16.gmra.mrb[72].mxu0 %v4868_v32 }
 0x2df   :  { %5380 = vmatprep.mubr.bf16.mxu0 %v4874_v12 }
 0x2e2   :  { %6544 = vmatmul.mubr.msk.bf16.gmra.mrb[72].mxu1 %vm561_vm13, %v4865_v50 }
 0x2e3   :  { %6547 = vmatprep.mubr.msk.bf16.mxu1 %vm561_vm13, %v4870_v53 }
 0x2e6   :  { %5381 = vmatmul.mubr.bf16.gmra.mrb[76].mxu0 %v4873_v13 }
 0x2ea   :  { %6548 = vmatmul.mubr.msk.bf16.gmra.mrb[76].mxu1 %vm561_vm13, %v4875_v55 }
 0x349   :  { %v6379_v15 = vpop.f32.mrb[32].mxu1 }
 0x34a   :  { %v6380_v27 = vpop.f32.mrb[33].mxu1 }
 0x34b   :  { %v6381_v44 = vadd.f32 %v6380_v27, %v6379_v15  ;;  %v6382_v43 = vpop.f32.mrb[34].mxu1 }
 0x34c   :  { %v6383_v11 = vpop.f32.mrb[35].mxu1 }
 0x34d   :  { %v6384_v3 = vadd.f32 %v6383_v11, %v6382_v43  ;;  %v5230_v60 = vadd.f32 %v6381_v44, %v8258_v23 }
 0x34f   :  { %v5233_v6 = vadd.f32 %v6384_v3, %v8258_v23 }
 0x35b   :  { %v6385_v57 = vpop.f32.mrb[36].mxu1 }
 0x35c   :  { %v6386_v42 = vpop.f32.mrb[37].mxu1 }
 0x35d   :  { %v6387_v39 = vadd.f32 %v6386_v42, %v6385_v57  ;;  %v6388_v51 = vpop.f32.mrb[38].mxu1 }
 0x35e   :  { %v6389_v5 = vpop.f32.mrb[39].mxu1 }
 0x35f   :  { %v6390_v38 = vadd.f32 %v6389_v5, %v6388_v51  ;;  %v5238_v16 = vadd.f32 %v6387_v39, %v8258_v23 }
 0x361   :  { %v5241_v52 = vadd.f32 %v6390_v38, %v8258_v23 }
 0x36e   :  { %v6391_v14 = vpop.f32.mrb[40].mxu1 }
 0x36f   :  { %v6392_v41 = vpop.f32.mrb[41].mxu1 }
 0x370   :  { %v6393_v4 = vadd.f32 %v6392_v41, %v6391_v14  ;;  %v6394_v28 = vpop.f32.mrb[42].mxu1 }
 0x371   :  { %v6395_v62 = vpop.f32.mrb[43].mxu1 }
 0x372   :  { %v6396_v59 = vadd.f32 %v6395_v62, %v6394_v28  ;;  %v5246_v12 = vadd.f32 %v6393_v4, %v8258_v23 }
 0x374   :  { %v5249_v55 = vadd.f32 %v6396_v59, %v8258_v23 }
 0x379   :  { %v6397_v33 = vpop.f32.mrb[44].mxu1 }
 0x37a   :  { %v6398_v40 = vpop.f32.mrb[45].mxu1 }
 0x37b   :  { %v6399_v47 = vadd.f32 %v6398_v40, %v6397_v33  ;;  %v6400_v45 = vpop.f32.mrb[46].mxu1 }
 0x37c   :  { %v6401_v24 = vpop.f32.mrb[47].mxu1  ;;  %v6443_v36 = vpop.f32.mrb[48].mxu0 }
 0x37d   :  { %v6402_v58 = vadd.f32 %v6401_v24, %v6400_v45  ;;  %v6444_v2 = vpop.f32.mrb[49].mxu0  ;;  %v5254_v38 = vadd.f32 %v6399_v47, %v8258_v23 }
 0x37e   :  { %v6445_v8 = vadd.f32 %v6444_v2, %v6443_v36  ;;  %v6446_v19 = vpop.f32.mrb[50].mxu0 }
 0x37f   :  { %v6447_v25 = vpop.f32.mrb[51].mxu0  ;;  %v5257_v28 = vadd.f32 %v6402_v58, %v8258_v23 }
 0x380   :  { %v6448_v22 = vadd.f32 %v6447_v25, %v6446_v19  ;;  %v8262_v30 = vadd.f32 %v6445_v8, %v5230_v60 }
 0x381   :  { %v6403_v49 = vpop.f32.mrb[48].mxu1 }
 0x382   :  { %v8264_v46 = vadd.f32 %v6448_v22, %v5233_v6  ;;  %v6404_v29 = vpop.f32.mrb[49].mxu1 }
 0x383   :  { %v6405_v56 = vadd.f32 %v6404_v29, %v6403_v49  ;;  %v6406_v7 = vpop.f32.mrb[50].mxu1 }
 0x384   :  { %v6407_v35 = vpop.f32.mrb[51].mxu1  ;;  %v6449_v20 = vpop.f32.mrb[52].mxu0 }
 0x385   :  { %v6408_v63 = vadd.f32 %v6407_v35, %v6406_v7  ;;  %v6450_v10 = vpop.f32.mrb[53].mxu0  ;;  %v5262_v47 = vadd.f32 %v6405_v56, %v8258_v23  ;;  %v5488_v7 = vld [vmem:[%s8675_s0 + $0x10] sm:$0xff] }
 0x386   :  { %v6451_v26 = vadd.f32 %v6450_v10, %v6449_v20  ;;  %v6452_v18 = vpop.f32.mrb[54].mxu0 }
 0x387   :  { %v6453_v9 = vpop.f32.mrb[55].mxu0  ;;  %v5265_v58 = vadd.f32 %v6408_v63, %v8258_v23 }
 0x388   :  { %v6454_v48 = vadd.f32 %v6453_v9, %v6452_v18  ;;  %v5335_v37 = vadd.f32 %v6451_v26, %v5238_v16  ;;  %v5486_v16 = vld [vmem:[%s8675_s0] sm:$0xff]  ;;  %v5489_v9 = vld [vmem:[%s8675_s0 + $0x18] sm:$0xff] }
 0x389   :  { %v6409_v34 = vpop.f32.mrb[52].mxu1 }
 0x38a   :  { %v8268_v1 = vadd.f32 %v6454_v48, %v5241_v52  ;;  %v6410_v17 = vpop.f32.mrb[53].mxu1 }
 0x38b   :  { %v6411_v54 = vadd.f32 %v6410_v17, %v6409_v34  ;;  %v6412_v61 = vpop.f32.mrb[54].mxu1 }
 0x38c   :  { %v6413_v31 = vpop.f32.mrb[55].mxu1 }
 0x38d   :  { %v6455_v21 = vpop.f32.mrb[56].mxu0  ;;  %v6414_v0 = vadd.f32 %v6413_v31, %v6412_v61  ;;  %v5270_v56 = vadd.f32 %v6411_v54, %v8258_v23 }
 0x38e   :  { %v6456_v32 = vpop.f32.mrb[57].mxu0 }
 0x38f   :  { %v6457_v50 = vadd.f32 %v6456_v32, %v6455_v21  ;;  %v6458_v53 = vpop.f32.mrb[58].mxu0  ;;  %v5273_v63 = vadd.f32 %v6414_v0, %v8258_v23 }
 0x390   :  { %v6459_v13 = vpop.f32.mrb[59].mxu0 }
 0x391   :  { %v6460_v15 = vadd.f32 %v6459_v13, %v6458_v53  ;;  %v6415_v27 = vpop.f32.mrb[56].mxu1  ;;  %v8272_v44 = vadd.f32 %v6457_v50, %v5246_v12 }
 0x392   :  { %v6416_v43 = vpop.f32.mrb[57].mxu1 }
 0x393   :  { %v6417_v11 = vadd.f32 %v6416_v43, %v6415_v27  ;;  %v6418_v3 = vpop.f32.mrb[58].mxu1  ;;  %v8274_v57 = vadd.f32 %v6460_v15, %v5249_v55 }
 0x394   :  { %v6419_v42 = vpop.f32.mrb[59].mxu1 }
 0x395   :  { %v6461_v39 = vpop.f32.mrb[60].mxu0  ;;  %v6420_v51 = vadd.f32 %v6419_v42, %v6418_v3  ;;  %v8301_v48 = vadd.f32 %v6417_v11, %v8258_v23 }
 0x396   :  { %v6462_v5 = vpop.f32.mrb[61].mxu0 }
 0x397   :  { %v6463_v14 = vadd.f32 %v6462_v5, %v6461_v39  ;;  %v6464_v41 = vpop.f32.mrb[62].mxu0 }
 0x398   :  { %v6465_v4 = vpop.f32.mrb[63].mxu0 }
 0x399   :  { %v6466_v62 = vadd.f32 %v6465_v4, %v6464_v41  ;;  %v8278_v59 = vadd.f32 %v6463_v14, %v5254_v38  ;;  %v5492_v38 = vld [vmem:[%s8675_s0 + $0x30] sm:$0xff] }
 0x39b   :  { %v8280_v33 = vadd.f32 %v6466_v62, %v5257_v28 }
 0x39d   :  { %v6421_v40 = vpop.f32.mrb[60].mxu1 }
 0x39e   :  { %v6422_v45 = vpop.f32.mrb[61].mxu1 }
 0x39f   :  { %v6423_v24 = vadd.f32 %v6422_v45, %v6421_v40  ;;  %v6424_v36 = vpop.f32.mrb[62].mxu1  ;;  %v5490_v40 = vld [vmem:[%s8675_s0 + $0x20] sm:$0xff] }
 0x3a0   :  { %v6425_v2 = vpop.f32.mrb[63].mxu1 }
 0x3a1   :  { %v6467_v60 = vpop.f32.mrb[64].mxu0  ;;  %v6426_v8 = vadd.f32 %v6425_v2, %v6424_v36  ;;  %v8313_v31 = vadd.f32 %v6423_v24, %v8258_v23 }
 0x3a2   :  { %v6468_v19 = vpop.f32.mrb[65].mxu0 }
 0x3a3   :  { %v6469_v25 = vadd.f32 %v6468_v19, %v6467_v60  ;;  %v6470_v6 = vpop.f32.mrb[66].mxu0  ;;  %v8316_v21 = vadd.f32 %v6426_v8, %v8258_v23  ;;  %v5493_v8 = vld [vmem:[%s8675_s0 + $0x38] sm:$0xff] }
 0x3a4   :  { %v6471_v22 = vpop.f32.mrb[67].mxu0 }
 0x3a5   :  { %v6472_v49 = vadd.f32 %v6471_v22, %v6470_v6  ;;  %v6537_v29 = vpop.f32.mrb[64].mxu1  ;;  %v8287_v35 = vadd.f32 %v6469_v25, %v5262_v47 }
 0x3a6   :  { %v5432_v20 = vadd.f32 %v6537_v29, %v5335_v37  ;;  %v5423_v10 = vpop.f32.mrb[65].mxu1  ;;  %v8304_v37 = vadd.f32 %v6420_v51, %v8258_v23 }
 0x3a7   :  { %v5424_v26 = vadd.f32 %v5423_v10, %v8262_v30  ;;  %v6538_v18 = vpop.f32.mrb[66].mxu1  ;;  %v8298_v52 = vadd.f32 %v6472_v49, %v5265_v58  ;;  %v5487_v30 = vld [vmem:[%s8675_s0 + $0x8] sm:$0xff] }
 0x3a8   :  { %v8306_v34 = vadd.f32 %v5488_v7, %v5432_v20  ;;  %v5435_v17 = vadd.f32 %v6538_v18, %v8268_v1  ;;  %v5426_v54 = vpop.f32.mrb[67].mxu1  ;;  %v5491_v58 = vld [vmem:[%s8675_s0 + $0x28] sm:$0xff] }
 0x3a9   :  { %v6473_v61 = vpop.f32.mrb[68].mxu0  ;;  %v8318_v0 = vadd.f32 %v5486_v16, %v5424_v26  ;;  %v5427_v32 = vadd.f32 %v5426_v54, %v8264_v46 }
 0x3aa   :  { %v6474_v12 = vpop.f32.mrb[69].mxu0  ;;  %v8321_v50 = vadd.f32 %v5489_v9, %v5435_v17  ;;  %v5712_v1 = vrot.slane %v8306_v34, 3  ;;  %v5575_v53 = vrot.slane %v8306_v34, 7  ;;  %v5644_v13 = vrot.slane %v8306_v34, 1 }
 0x3ab   :  { %v6475_v55 = vadd.f32 %v6474_v12, %v6473_v61  ;;  %v6476_v15 = vpop.f32.mrb[70].mxu0  ;;  %v8326_v27 = vadd.f32 %v5487_v30, %v5427_v32  ;;  %v5709_v23 = vrot.slane %v8318_v0, 5  ;;  %v5573_v43 = vrot.slane %v8318_v0, 1 }
 0x3ac   :  { %v6477_v11 = vpop.f32.mrb[71].mxu0  ;;  %v5714_v46 = vrot.slane %v8321_v50, 2  ;;  %v5577_v3 = vrot.slane %v8321_v50, 6  ;;  %v5641_v42 = vrot.slane %v8318_v0, 3  ;;  %v5777_v39 = vrot.slane %v8318_v0, 7 }
 0x3ad   :  { %v6478_v51 = vadd.f32 %v6477_v11, %v6476_v15  ;;  %v6541_v5 = vpop.f32.mrb[68].mxu1  ;;  %v5367_v14 = vadd.f32 %v6475_v55, %v5270_v56  ;;  %v5710_v41 = vrot.slane %v8326_v27, 4  ;;  %v5574_v4 = vsel %vm5535_vm15, %v8326_v27, %v5573_v43  ;;  %v5496_v15 = vld [vmem:[%s8675_s0 + $0x50] sm:$0xff] }
 0x3ae   :  { %v5448_v28 = vadd.f32 %v6541_v5, %v8278_v59  ;;  %v5439_v62 = vpop.f32.mrb[69].mxu1  ;;  %v5576_v45 = vsel %vm5538_vm0, %v5575_v53, %v5574_v4  ;;  %v5642_v24 = vrot.slane %v8326_v27, 2  ;;  %v5778_v36 = vrot.slane %v8326_v27, 6 }
 0x3af   :  { %v5440_v2 = vadd.f32 %v5439_v62, %v8272_v44  ;;  %v6542_v60 = vpop.f32.mrb[70].mxu1  ;;  %v5370_v19 = vadd.f32 %v6478_v51, %v5273_v63  ;;  %v5711_v59 = vsel %vm5535_vm15, %v5710_v41, %v5709_v23  ;;  %v5578_v47 = vsel %vm5541_vm1, %v5577_v3, %v5576_v45 }
 0x3b0   :  { %v8353_v25 = vadd.f32 %v5492_v38, %v5448_v28  ;;  %v5451_v6 = vadd.f32 %v6542_v60, %v8280_v33  ;;  %v5442_v22 = vpop.f32.mrb[71].mxu1  ;;  %v5713_v44 = vsel %vm5538_vm0, %v5712_v1, %v5711_v59  ;;  %v5643_v49 = vsel %vm5535_vm15, %v5642_v24, %v5641_v42  ;;  %v5494_v42 = vld [vmem:[%s8675_s0 + $0x40] sm:$0xff]  ;;  %v5497_v28 = vld [vmem:[%s8675_s0 + $0x58] sm:$0xff] }
 0x3b1   :  { %v6479_v29 = vpop.f32.mrb[72].mxu0  ;;  %v8361_v7 = vadd.f32 %v5490_v40, %v5440_v2  ;;  %v5443_v20 = vadd.f32 %v5442_v22, %v8274_v57  ;;  %v5715_v10 = vsel %vm5541_vm1, %v5714_v46, %v5713_v44  ;;  %v5645_v16 = vsel %vm5538_vm0, %v5644_v13, %v5643_v49 }
 0x3b2   :  { %v6480_v56 = vpop.f32.mrb[73].mxu0  ;;  %v8366_v33 = vadd.f32 %v5493_v8, %v5451_v6  ;;  %v5719_v63 = vrot.slane %v8353_v25, 7  ;;  %v5583_v26 = vrot.slane %v8353_v25, 3  ;;  %v5646_v18 = vsel %vm5541_vm1, %v8321_v50, %v5645_v16 }
 0x3b3   :  { %v6481_v9 = vadd.f32 %v6480_v56, %v6479_v29  ;;  %v6482_v17 = vpop.f32.mrb[74].mxu0  ;;  %v8372_v54 = vadd.f32 %v5491_v58, %v5443_v20  ;;  %v5716_v57 = vrot.slane %v8361_v7, 1  ;;  %v5579_v30 = vrot.slane %v8361_v7, 5 }
 0x3b4   :  { %v6483_v61 = vpop.f32.mrb[75].mxu0  ;;  %v5721_v32 = vrot.slane %v8366_v33, 6  ;;  %v5585_v12 = vrot.slane %v8366_v33, 2  ;;  %v5647_v1 = vrot.slane %v8361_v7, 7  ;;  %v5651_v53 = vrot.slane %v8353_v25, 5 }
 0x3b5   :  { %v6484_v13 = vadd.f32 %v6483_v61, %v6482_v17  ;;  %v6545_v55 = vpop.f32.mrb[72].mxu1  ;;  %v5717_v23 = vsel %vm5544_vm3, %v5716_v57, %v5715_v10  ;;  %v5580_v43 = vsel %vm5544_vm3, %v5579_v30, %v5578_v47  ;;  %v5581_v11 = vrot.slane %v8372_v54, 4  ;;  %v5500_v61 = vld [vmem:[%s8675_s0 + $0x70] sm:$0xff] }
 0x3b6   :  { %v5464_v46 = vadd.f32 %v6545_v55, %v5367_v14  ;;  %v5455_v3 = vpop.f32.mrb[73].mxu1  ;;  %v5718_v51 = vsel %vm5547_vm2, %v8372_v54, %v5717_v23  ;;  %v5375_v5 = vadd.f32 %v6481_v9, %v8301_v48  ;;  %v5648_v38 = vsel %vm5544_vm3, %v5647_v1, %v5646_v18  ;;  %v5495_v48 = vld [vmem:[%s8675_s0 + $0x48] sm:$0xff] }
 0x3b7   :  { %v5456_v41 = vadd.f32 %v5455_v3, %v8287_v35  ;;  %v6546_v4 = vpop.f32.mrb[74].mxu1  ;;  %v5720_v14 = vsel %vm5550_vm4, %v5719_v63, %v5718_v51  ;;  %v5582_v62 = vsel %vm5547_vm2, %v5581_v11, %v5580_v43  ;;  %v5378_v40 = vadd.f32 %v6484_v13, %v8304_v37 }
 0x3b8   :  { %v8400_v45 = vadd.f32 %v5496_v15, %v5464_v46  ;;  %v5467_v24 = vadd.f32 %v6546_v4, %v5370_v19  ;;  %v5458_v2 = vpop.f32.mrb[75].mxu1  ;;  %v5722_v35 = vsel %vm5553_vm5, %v5721_v32, %v5720_v14  ;;  %v5584_v60 = vsel %vm5550_vm4, %v5583_v26, %v5582_v62  ;;  %v5501_v46 = vld [vmem:[%s8675_s0 + $0x78] sm:$0xff] }
 0x3b9   :  { %v6485_v8 = vpop.f32.mrb[76].mxu0  ;;  %v8407_v59 = vadd.f32 %v5494_v42, %v5456_v41  ;;  %v5459_v47 = vadd.f32 %v5458_v2, %v8298_v52  ;;  %5737 = vrot.lane.b32.xlu0 %v5722_v35, %s6702_s9  ;;  %v5586_v37 = vsel %vm5553_vm5, %v5585_v12, %v5584_v60  ;;  %v5649_v19 = vrot.slane %v8372_v54, 6  ;;  %v5498_v12 = vld [vmem:[%s8675_s0 + $0x60] sm:$0xff]  ;;  %v5499_v42 = vld [vmem:[%s8675_s0 + $0x68] sm:$0xff]  ;;  %s6703_s0 = smov [#allocation4]  }
 0x3ba   :  { %v6486_v6 = vpop.f32.mrb[77].mxu0  ;;  %v8413_v22 = vadd.f32 %v5497_v28, %v5467_v24  ;;  %v5653_v58 = vrot.slane %v8366_v33, 4  ;;  %v5779_v44 = vsel %vm5535_vm15, %v5778_v36, %v5777_v39  ;;  %v5780_v49 = vrot.slane %v8306_v34, 5 }
 0x3bb   :  { %v6487_v52 = vadd.f32 %v6486_v6, %v6485_v8  ;;  %v6488_v29 = vpop.f32.mrb[78].mxu0  ;;  %v8422_v20 = vadd.f32 %v5495_v48, %v5459_v47  ;;  %v5650_v10 = vsel %vm5547_vm2, %v5649_v19, %v5648_v38  ;;  %v5782_v16 = vrot.slane %v8321_v50, 4 }
 0x3bc   :  { %v6489_v56 = vpop.f32.mrb[79].mxu0  ;;  %v5652_v63 = vsel %vm5550_vm4, %v5651_v53, %v5650_v10  ;;  %v5781_v26 = vsel %vm5538_vm0, %v5780_v49, %v5779_v44  ;;  %v5784_v18 = vrot.slane %v8361_v7, 3  ;;  %v5786_v9 = vrot.slane %v8372_v54, 2 }
 0x3bd   :  { %v6490_v39 = vadd.f32 %v6489_v56, %v6488_v29  ;;  %v5383_v36 = vadd.f32 %v6487_v52, %v8313_v31  ;;  %v6549_v17 = vpop.f32.mrb[76].mxu1  ;;  %5601 = vrot.lane.b32.xlu0 %v5586_v37, %s6702_s9  ;;  %v5654_v57 = vsel %vm5553_vm5, %v5653_v58, %v5652_v63  ;;  %v5783_v30 = vsel %vm5541_vm1, %v5782_v16, %v5781_v26 }
 0x3be   :  { %v5471_v32 = vpop.f32.mrb[77].mxu1  ;;  %v5785_v1 = vsel %vm5544_vm3, %v5784_v18, %v5783_v30  ;;  %v5788_v31 = vrot.slane %v8353_v25, 1  ;;  %v5723_v53 = vrot.slane %v8407_v59, 5  ;;  %v5724_v13 = vrot.slane %v8422_v20, 4 }
 0x3bf   :  { %v5480_v55 = vadd.f32 %v6549_v17, %v5383_v36  ;;  %v5472_v15 = vadd.f32 %v5471_v32, %v5375_v5  ;;  %v5386_v23 = vadd.f32 %v6490_v39, %v8316_v21  ;;  %v6550_v43 = vpop.f32.mrb[78].mxu1  ;;  %v5787_v11 = vsel %vm5547_vm2, %v5786_v9, %v5785_v1 }
 0x3c0   :  { %v5474_v3 = vpop.f32.mrb[79].mxu1  ;;  %v5789_v51 = vsel %vm5550_vm4, %v5788_v31, %v5787_v11  ;;  %v5725_v38 = vsel %vm5535_vm15, %v5724_v13, %v5723_v53  ;;  %v5726_v5 = vrot.slane %v8400_v45, 3  ;;  %v5728_v21 = vrot.slane %v8413_v22, 2 }
 0x3c1   :  { %v8456_v41 = vadd.f32 %v5500_v61, %v5480_v55  ;;  %v8458_v4 = vadd.f32 %v5498_v12, %v5472_v15  ;;  %v5483_v28 = vadd.f32 %v6550_v43, %v5386_v23  ;;  %v5475_v14 = vadd.f32 %v5474_v3, %v5378_v40  ;;  %5669 = vrot.lane.b32.xlu0 %v5654_v57, %s6702_s9 }
 0x3c2   :  { %v5790_v62 = vsel %vm5553_vm5, %v8366_v33, %v5789_v51  ;;  %v5727_v24 = vsel %vm5538_vm0, %v5726_v5, %v5725_v38  ;;  %v5587_v2 = vrot.slane %v8407_v59, 1  ;;  %v5589_v48 = vrot.slane %v8400_v45, 7 }
 0x3c3   :  { %v8466_v35 = vadd.f32 %v5501_v46, %v5483_v28  ;;  %v8468_v60 = vadd.f32 %v5499_v42, %v5475_v14  ;;  %v5729_v8 = vsel %vm5541_vm1, %v5728_v21, %v5727_v24  ;;  %v5730_v47 = vrot.slane %v8458_v4, 1 }
 0x3c4   :  { %v5733_v40 = vrot.slane %v8456_v41, 7  ;;  %v5588_v37 = vsel %vm5535_vm15, %v8422_v20, %v5587_v2  ;;  %v5591_v19 = vrot.slane %v8413_v22, 6  ;;  %v5593_v6 = vrot.slane %v8458_v4, 5 }
 0x3c5   :  { %5805 = vrot.lane.b32.xlu0 %v5790_v62, %s6702_s9  ;;  %v5731_v58 = vsel %vm5544_vm3, %v5730_v47, %v5729_v8  ;;  %v5735_v44 = vrot.slane %v8466_v35, 6  ;;  %v5590_v49 = vsel %vm5538_vm0, %v5589_v48, %v5588_v37  ;;  %v5595_v52 = vrot.slane %v8468_v60, 4 }
 0x3c6   :  { %v5732_v29 = vsel %vm5547_vm2, %v8468_v60, %v5731_v58  ;;  %v5592_v10 = vsel %vm5541_vm1, %v5591_v19, %v5590_v49  ;;  %v5597_v16 = vrot.slane %v8456_v41, 3  ;;  %v5599_v56 = vrot.slane %v8466_v35, 2 }
 0x3c7   :  { %v5734_v63 = vsel %vm5550_vm4, %v5733_v40, %v5732_v29  ;;  %v5594_v26 = vsel %vm5544_vm3, %v5593_v6, %v5592_v10  ;;  %v5655_v18 = vrot.slane %v8407_v59, 3  ;;  %v5656_v9 = vrot.slane %v8422_v20, 2 }
 0x3c8   :  { %v5736_v39 = vsel %vm5553_vm5, %v5735_v44, %v5734_v63  ;;  %v5596_v36 = vsel %vm5547_vm2, %v5595_v52, %v5594_v26  ;;  %v5658_v17 = vrot.slane %v8400_v45, 1  ;;  %v5661_v57 = vrot.slane %v8458_v4, 7 }
 0x3c9   :  { %5739 = vrot.lane.b32.xlu1 %v5736_v39, %s6702_s9  ;;  %v5598_v30 = vsel %vm5550_vm4, %v5597_v16, %v5596_v36  ;;  %v5657_v61 = vsel %vm5535_vm15, %v5656_v9, %v5655_v18  ;;  %v5663_v32 = vrot.slane %v8468_v60, 6  ;;  %v5665_v31 = vrot.slane %v8456_v41, 5 }
 0x3ca   :  { %v5600_v12 = vsel %vm5553_vm5, %v5599_v56, %v5598_v30  ;;  %v5659_v1 = vsel %vm5538_vm0, %v5658_v17, %v5657_v61  ;;  %v5667_v13 = vrot.slane %v8466_v35, 4  ;;  %v5791_v55 = vrot.slane %v8407_v59, 7 }
 0x3cb   :  { %v5660_v53 = vsel %vm5541_vm1, %v8413_v22, %v5659_v1  ;;  %v5792_v15 = vrot.slane %v8422_v20, 6  ;;  %v5794_v43 = vrot.slane %v8400_v45, 5  ;;  %v5796_v11 = vrot.slane %v8413_v22, 4 }
 0x3cc   :  { %v5662_v23 = vsel %vm5544_vm3, %v5661_v57, %v5660_v53  ;;  %v5798_v46 = vrot.slane %v8458_v4, 3  ;;  %v5800_v51 = vrot.slane %v8468_v60, 2  ;;  %v5802_v38 = vrot.slane %v8456_v41, 1 }
 0x3cd   :  { %5603 = vrot.lane.b32.xlu1 %v5600_v12, %s6702_s9  ;;  %v5664_v3 = vsel %vm5547_vm2, %v5663_v32, %v5662_v23  ;;  %v5793_v42 = vsel %vm5535_vm15, %v5792_v15, %v5791_v55  ;;  %v5678_v28 = vrot.slane %v8326_v27, 3  ;;  %v5680_v14 = vrot.slane %v8306_v34, 2 }
 0x3ce   :  { %v5666_v5 = vsel %vm5550_vm4, %v5665_v31, %v5664_v3  ;;  %v5795_v21 = vsel %vm5538_vm0, %v5794_v43, %v5793_v42  ;;  %v5682_v2 = vrot.slane %v8321_v50, 1  ;;  %v5685_v48 = vrot.slane %v8372_v54, 7 }
 0x3cf   :  { %v5668_v62 = vsel %vm5553_vm5, %v5667_v13, %v5666_v5  ;;  %v5797_v24 = vsel %vm5541_vm1, %v5796_v11, %v5795_v21  ;;  %v5687_v47 = vrot.slane %v8353_v25, 6  ;;  %v5677_v40 = vrot.slane %v8318_v0, 4 }
 0x3d0   :  { %v5799_v8 = vsel %vm5544_vm3, %v5798_v46, %v5797_v24  ;;  %v5534_v37 = vrot.slane %v8326_v27, 7  ;;  %v5689_v6 = vrot.slane %v8366_v33, 5  ;;  %v5537_v58 = vrot.slane %v8306_v34, 6 }
 0x3d1   :  { %5671 = vrot.lane.b32.xlu1 %v5668_v62, %s6702_s9  ;;  %v5801_v19 = vsel %vm5547_vm2, %v5800_v51, %v5799_v8  ;;  %v5540_v44 = vrot.slane %v8321_v50, 5  ;;  %v5679_v52 = vsel %vm5535_vm15, %v5678_v28, %v5677_v40  ;;  %v5543_v29 = vrot.slane %v8361_v7, 4 }
 0x3d2   :  { %v5803_v49 = vsel %vm5550_vm4, %v5802_v38, %v5801_v19  ;;  %v5546_v10 = vrot.slane %v8372_v54, 3  ;;  %v5681_v56 = vsel %vm5538_vm0, %v5680_v14, %v5679_v52  ;;  %v5549_v63 = vrot.slane %v8353_v25, 2 }
 0x3d3   :  { %v5804_v16 = vsel %vm5553_vm5, %v8466_v35, %v5803_v49  ;;  %v5536_v26 = vsel %vm5535_vm15, %v5534_v37, %v8318_v0  ;;  %v5683_v18 = vsel %vm5541_vm1, %v5682_v2, %v5681_v56  ;;  %v5609_v39 = vrot.slane %v8318_v0, 2 }
 0x3d4   :  { %v5539_v9 = vsel %vm5538_vm0, %v5537_v58, %v5536_v26  ;;  %v5610_v36 = vrot.slane %v8326_v27, 1  ;;  %v5684_v17 = vsel %vm5544_vm3, %v8361_v7, %v5683_v18  ;;  %v5613_v30 = vrot.slane %v8321_v50, 7 }
 0x3d5   :  { %5807 = vrot.lane.b32.xlu1 %v5804_v16, %s6702_s9  ;;  %v5542_v57 = vsel %vm5541_vm1, %v5540_v44, %v5539_v9  ;;  %v5615_v61 = vrot.slane %v8361_v7, 6  ;;  %v5686_v32 = vsel %vm5547_vm2, %v5685_v48, %v5684_v17  ;;  %v5617_v31 = vrot.slane %v8372_v54, 5  ;;  %s5818_s9 = sshll.u32 %s6703_s0, 4  ;;  %s5819_s9 = int_to_ptr.vmem [resolvable:$true] %s5818_s9 }
 0x3d6   :  { %v5545_v12 = vsel %vm5544_vm3, %v5543_v29, %v5542_v57  ;;  %v5611_v1 = vsel %vm5535_vm15, %v5610_v36, %v5609_v39  ;;  %v5688_v53 = vsel %vm5550_vm4, %v5687_v47, %v5686_v32  ;;  %v5552_v13 = vrot.slane %v8366_v33, 1  ;;  %s6677_s2 = scalar_lea.vmem %s5819_s9, 1024  ;;  %p6682_p1 = scmp.lt.s32.totalorder %s5819_s9, %s5819_s9 }
 0x3d7   :  { %v5548_v55 = vsel %vm5547_vm2, %v5546_v10, %v5545_v12  ;;  %v5612_v15 = vsel %vm5538_vm0, %v8306_v34, %v5611_v1  ;;  %v5690_v23 = vsel %vm5553_vm5, %v5689_v6, %v5688_v53  ;;  %v5619_v46 = vrot.slane %v8353_v25, 4  ;;  %p6678_p0 = scmp.ne.s32.totalorder %s5819_s9, %s6677_s2  ;;  %p6683_p2 = scmp.lt.s32.totalorder %s6677_s2, %s6677_s2 }
 0x3d8   :  { %v5551_v43 = vsel %vm5550_vm4, %v5549_v63, %v5548_v55  ;;  %v5614_v11 = vsel %vm5541_vm1, %v5613_v30, %v5612_v15  ;;  %5707 = vst.msk [vmem:[#allocation4 + $0x10] sm:$0xff] %vm561_vm13, %v5690_v23  ;;  %v5745_v51 = vrot.slane %v8318_v0, 6  ;;  %v5746_v38 = vrot.slane %v8326_v27, 5 }
 0x3d9   :  { %v5554_v3 = vsel %vm5553_vm5, %v5552_v13, %v5551_v43  ;;  %v5616_v42 = vsel %vm5544_vm3, %v5615_v61, %v5614_v11  ;;  %v5621_v21 = vrot.slane %v8366_v33, 3  ;;  %v5748_v28 = vrot.slane %v8306_v34, 4  ;;  %p6684_p3 = por %p6683_p2, %p6682_p1 }
 0x3da   :  { %5571 = vst.msk [vmem:[#allocation4] sm:$0xff] %vm561_vm13, %v5554_v3  ;;  %v5618_v5 = vsel %vm5547_vm2, %v5617_v31, %v5616_v42  ;;  %v5752_v14 = vrot.slane %v8361_v7, 2  ;;  %v5747_v24 = vsel %vm5535_vm15, %v5746_v38, %v5745_v51  ;;  %v5750_v2 = vrot.slane %v8321_v50, 3 }
 0x3db   :  { %v5620_v62 = vsel %vm5550_vm4, %v5619_v46, %v5618_v5  ;;  %v5754_v0 = vrot.slane %v8372_v54, 1  ;;  %v5749_v48 = vsel %vm5538_vm0, %v5748_v28, %v5747_v24  ;;  %v5757_v8 = vrot.slane %v8366_v33, 7  ;;  %p6685_p4 = pnand %p6684_p3, %p6678_p0 }
 0x3dc   :  { %v5622_v27 = vsel %vm5553_vm5, %v5621_v21, %v5620_v62  ;;  %v5692_v47 = vrot.slane %v8422_v20, 3  ;;  %v5751_v34 = vsel %vm5541_vm1, %v5750_v2, %v5749_v48  ;;  %v5694_v7 = vrot.slane %v8400_v45, 2 }
 0x3dd   :  { %5639 = vst.msk [vmem:[#allocation4 + $0x8] sm:$0xff] %vm561_vm13, %v5622_v27  ;;  %v5696_v40 = vrot.slane %v8413_v22, 1  ;;  %v5699_v50 = vrot.slane %v8468_v60, 7  ;;  %v5753_v54 = vsel %vm5544_vm3, %v5752_v14, %v5751_v34  ;;  %v5701_v37 = vrot.slane %v8456_v41, 6 }
 0x3de   :  { %v5691_v19 = vrot.slane %v8407_v59, 4  ;;  %v5555_v33 = vrot.slane %v8422_v20, 7  ;;  %v5755_v6 = vsel %vm5547_vm2, %v5754_v0, %v5753_v54  ;;  %v5703_v58 = vrot.slane %v8466_v35, 5 }
 0x3df   :  { %v5557_v44 = vrot.slane %v8400_v45, 6  ;;  %v5559_v49 = vrot.slane %v8413_v22, 5  ;;  %v5756_v52 = vsel %vm5550_vm4, %v8353_v25, %v5755_v6  ;;  %v5561_v10 = vrot.slane %v8458_v4, 4 }
 0x3e0   :  { %v5693_v29 = vsel %vm5535_vm15, %v5692_v47, %v5691_v19  ;;  %v5563_v16 = vrot.slane %v8468_v60, 3  ;;  %v5758_v56 = vsel %vm5553_vm5, %v5757_v8, %v5756_v52  ;;  %v5565_v26 = vrot.slane %v8456_v41, 2 }
 0x3e1   :  { %v5695_v63 = vsel %vm5538_vm0, %v5694_v7, %v5693_v29  ;;  %v5556_v18 = vsel %vm5535_vm15, %v5555_v33, %v8407_v59  ;;  %5775 = vst.msk [vmem:[#allocation4 + $0x18] sm:$0xff] %vm561_vm13, %v5758_v56  ;;  %v5623_v39 = vrot.slane %v8407_v59, 2  ;;  %v5624_v36 = vrot.slane %v8422_v20, 1 }
 0x3e2   :  { %v5697_v9 = vsel %vm5541_vm1, %v5696_v40, %v5695_v63  ;;  %v5558_v25 = vsel %vm5538_vm0, %v5557_v44, %v5556_v18  ;;  %v5627_v30 = vrot.slane %v8413_v22, 7  ;;  %v5629_v61 = vrot.slane %v8458_v4, 6 }
 0x3e3   :  { %v5698_v17 = vsel %vm5544_vm3, %v8458_v4, %v5697_v9  ;;  %v5560_v57 = vsel %vm5541_vm1, %v5559_v49, %v5558_v25  ;;  %v5625_v1 = vsel %vm5535_vm15, %v5624_v36, %v5623_v39  ;;  %v5631_v31 = vrot.slane %v8468_v60, 5 }
 0x3e4   :  { %v5700_v32 = vsel %vm5547_vm2, %v5699_v50, %v5698_v17  ;;  %v5562_v12 = vsel %vm5544_vm3, %v5561_v10, %v5560_v57  ;;  %v5567_v13 = vrot.slane %v8466_v35, 1  ;;  %v5626_v15 = vsel %vm5538_vm0, %v8400_v45, %v5625_v1 }
 0x3e5   :  { %v5702_v53 = vsel %vm5550_vm4, %v5701_v37, %v5700_v32  ;;  %v5564_v55 = vsel %vm5547_vm2, %v5563_v16, %v5562_v12  ;;  %v5628_v11 = vsel %vm5541_vm1, %v5627_v30, %v5626_v15  ;;  %v5633_v46 = vrot.slane %v8456_v41, 4 }
 0x3e6   :  { %v5704_v23 = vsel %vm5553_vm5, %v5703_v58, %v5702_v53  ;;  %v5566_v43 = vsel %vm5550_vm4, %v5565_v26, %v5564_v55  ;;  %v5630_v42 = vsel %vm5544_vm3, %v5629_v61, %v5628_v11  ;;  %v5759_v51 = vrot.slane %v8407_v59, 6 }
 0x3e7   :  { %5708 = vst.msk [vmem:[#allocation4 + $0x30] sm:$0xff] %vm561_vm13, %v5704_v23  ;;  %v5568_v3 = vsel %vm5553_vm5, %v5567_v13, %v5566_v43  ;;  %v5760_v38 = vrot.slane %v8422_v20, 5  ;;  %v5632_v5 = vsel %vm5547_vm2, %v5631_v31, %v5630_v42  ;;  %v5635_v21 = vrot.slane %v8466_v35, 3 }
 0x3e8   :  { %5572 = vst.msk [vmem:[#allocation4 + $0x20] sm:$0xff] %vm561_vm13, %v5568_v3  ;;  %v5762_v28 = vrot.slane %v8400_v45, 4  ;;  %v5766_v14 = vrot.slane %v8458_v4, 2  ;;  %v5634_v62 = vsel %vm5550_vm4, %v5633_v46, %v5632_v5  ;;  %v5764_v2 = vrot.slane %v8413_v22, 3 }
 0x3e9   :  { %v5761_v24 = vsel %vm5535_vm15, %v5760_v38, %v5759_v51  ;;  %v5768_v59 = vrot.slane %v8468_v60, 1  ;;  %v5636_v20 = vsel %vm5553_vm5, %v5635_v21, %v5634_v62  ;;  %v5771_v48 = vrot.slane %v8466_v35, 7 }
 0x3ea   :  { %v5763_v0 = vsel %vm5538_vm0, %v5762_v28, %v5761_v24  ;;  %5640 = vst.msk [vmem:[#allocation4 + $0x28] sm:$0xff] %vm561_vm13, %v5636_v20 }
 0x3eb   :  { %v5765_v27 = vsel %vm5541_vm1, %v5764_v2, %v5763_v0 }
 0x3ec   :  { %v5767_v45 = vsel %vm5544_vm3, %v5766_v14, %v5765_v27 }
 0x3ed   :  { %v5769_v4 = vsel %vm5547_vm2, %v5768_v59, %v5767_v45 }
 0x3ee   :  { %v5770_v8 = vsel %vm5550_vm4, %v8456_v41, %v5769_v4 }
 0x3ef   :  { %v5772_v22 = vsel %vm5553_vm5, %v5771_v48, %v5770_v8 }
 0x3f0   :  { %5776 = vst.msk [vmem:[#allocation4 + $0x38] sm:$0xff] %vm561_vm13, %v5772_v22 }
 0x42b   :  { %v5738_v60 = vpop.permute.xlu0 %5737 }
 0x42c   :  { %5743 = vst.msk [vmem:[#allocation4 + $0x10] sm:$0xff] %vm877_vm14, %v5738_v60 }
 0x42f   :  { %v5602_v47 = vpop.permute.xlu0 %5601 }
 0x430   :  { %5607 = vst.msk [vmem:[#allocation4] sm:$0xff] %vm877_vm14, %v5602_v47 }
 0x433   :  { %v5670_v34 = vpop.permute.xlu0 %5669 }
 0x434   :  { %5675 = vst.msk [vmem:[#allocation4 + $0x8] sm:$0xff] %vm877_vm14, %v5670_v34 }
 0x437   :  { %v5806_v7 = vpop.permute.xlu0 %5805 }
 0x438   :  { %5811 = vst.msk [vmem:[#allocation4 + $0x18] sm:$0xff] %vm877_vm14, %v5806_v7 }
 0x43b   :  { %v5740_v35 = vpop.permute.xlu1 %5739 }
 0x43c   :  { %5744 = vst.msk [vmem:[#allocation4 + $0x30] sm:$0xff] %vm877_vm14, %v5740_v35 }
 0x43f   :  { %v5604_v41 = vpop.permute.xlu1 %5603 }
 0x440   :  { %5608 = vst.msk [vmem:[#allocation4 + $0x20] sm:$0xff] %vm877_vm14, %v5604_v41 }
 0x443   :  { %v5672_v40 = vpop.permute.xlu1 %5671 }
 0x444   :  { %5676 = vst.msk [vmem:[#allocation4 + $0x28] sm:$0xff] %vm877_vm14, %v5672_v40 }
 0x447   :  { %v5808_v50 = vpop.permute.xlu1 %5807 }
 0x448   :  { %5812 = vst.msk [vmem:[#allocation4 + $0x38] sm:$0xff] %vm877_vm14, %v5808_v50 }
 0x449   :  { %6688 = shalt.err (!%p6685_p4)
}
 0x44a   :  { %s6689_s29 = scalar_lea.hbm %s8680_s5, 1024 }
 0x44b   :  { %p6690_p5 = scmp.ne.s32.totalorder %s8680_s5, %s6689_s29  ;;  %p6693_p6 = scmp.lt.u32.totalorder %s6689_s29, %s8680_s5 }
 0x44d   :  { %p6695_p7 = pnand %p6693_p6, %p6690_p5 }
 0x44f   :  { %6698 = shalt.err (!%p6695_p7)
}
 0x450   :  { %s6704_s10 = smov 512   ;;  %s6705_s11 = smov 32  }
 0x451   :  { %5824 = dma.vmem_to_hbm [thread:$0]  %s5819_s9, 1024, %s8680_s5, [#allocation5], %s6704_s10, %s6704_s10, %s6705_s11  }
 0x452   :  { %6699 = dma.done.wait [#allocation5], 1024  }
 0x453   :  { %6700 = vsyncadd [#allocation5], 4294966272 }
 0x454   :  { %5828 = vsyncpa [#allocation5], 1 }

</bundles_post_ra>
